<compile_context>
chip_gen: v6e
topology: v6e:2x2x1
jax: 0.10.0
libtpu: 0.0.40
codegen_flags: <defaults>
</compile_context>

<pallas_src>
import jax
import jax.numpy as jnp
from jax import lax
from jax.experimental import pallas as pl
from jax.experimental.pallas import tpu as pltpu

SELU_ALPHA = 1.6732632423543772
SELU_SCALE = 1.0507009873554805
LN_EPS = 1e-6


def _selu(x):
    # exp() restricted to the non-positive branch: identical values, but huge
    # positive pre-activations can no longer overflow in the discarded branch.
    return SELU_SCALE * jnp.where(
        x > 0, x, SELU_ALPHA * (jnp.exp(jnp.minimum(x, 0.0)) - 1.0))


def _layernorm_unbiased(x, alpha, beta):
    # torch-style custom LayerNorm: std uses (N-1) divisor, eps added OUTSIDE sqrt
    d = x.shape[-1]
    avg = jnp.mean(x, axis=-1, keepdims=True)
    var = jnp.sum((x - avg) ** 2, axis=-1, keepdims=True) / (d - 1)
    std = jnp.sqrt(var) + LN_EPS
    return (x - avg) / std * alpha + beta


def _pad_to(n, m):
    return ((n + m - 1) // m) * m


def _block_diag(blocks):
    # (n, H, H) -> (n*H, n*H) block-diagonal
    n, h, _ = blocks.shape
    eye = jnp.eye(n, dtype=blocks.dtype)
    return (eye[:, None, :, None] * blocks[:, :, None, :]).reshape(n * h, n * h)


# --------------------------------- wrapper + kernel ---------------------------------
def adafnn_forward(params, tseq, x):
    """Pallas-backed forward pass of MyAdaFNN (eval mode). Returns (B, T)."""
    T = tseq.shape[0]
    B = x.shape[0]
    n_base, _, H = params["w1"].shape
    D = n_base * H
    TP = _pad_to(T, 128)          # lane-dense time axis
    BP = _pad_to(B, 8)            # sublane-dense batch
    f32 = jnp.float32
    inv_h = 1.0 / H
    inv_hm1 = 1.0 / (H - 1)

    # ---------------- host-side packing (tiny, one-time per call) ----------------
    # trapezoid weights: <f,g> = sum_t w[t] f[t] g[t].  tseq must be increasing
    # (same assumption as the PyTorch reference).
    hstep = tseq[1:] - tseq[:-1]
    w = jnp.concatenate([hstep[:1], hstep[:-1] + hstep[1:], hstep[-1:]]) * 0.5

    tcol = jnp.zeros((TP, 1), f32).at[:T, 0].set(tseq.astype(f32))
    xw = jnp.zeros((8 + BP, TP), f32)
    xw = xw.at[0, :T].set(w.astype(f32))           # row 0   : trapezoid weights (zero pad)
    xw = xw.at[8:8 + B, :T].set(x.astype(f32))     # rows 8+ : batch x (zero pad)

    lin_w = params["lin_w"].astype(f32)
    eye = jnp.eye(n_base, dtype=f32)

    w1row = params["w1"].astype(f32).reshape(1, D)
    b1row = params["b1"].astype(f32).reshape(1, D)
    b2row = params["b2"].astype(f32).reshape(1, D)
    b3row = params["b3"].astype(f32).reshape(1, D)
    w2bd = _block_diag(params["w2"].astype(f32))                    # (D, D)
    w3bd = _block_diag(params["w3"].astype(f32))                    # (D, D)
    w4blk = (eye[:, None, :]
             * params["w4"].astype(f32)[:, 0, :, None]).reshape(D, n_base)
    b4row = params["b4"].astype(f32).reshape(1, n_base)

    # Fold the basis linear transform into the final Linear (exact composition).
    w4p = w4blk @ lin_w.T                                           # (D, nb)
    b4p = b4row @ lin_w.T                                           # (1, nb)
    w4p_pad = jnp.zeros((D, D), f32).at[:, :n_base].set(w4p)        # zero pad lanes
    b4p_pad = jnp.zeros((1, D), f32).at[:, :n_base].set(b4p)

    la = jnp.transpose(params["ln_alpha"].astype(f32), (1, 0, 2)).reshape(3, D)
    lb = jnp.transpose(params["ln_beta"].astype(f32), (1, 0, 2)).reshape(3, D)

    # 0/1 group indicator (which basis each of the D stacked hidden units
    # belongs to), group axis lane-padded to D; and per-layer indicator^T*alpha
    # broadcast matrices with the extra group rows zeroed.
    g = jnp.repeat(eye, H, axis=0)                                  # (D, nb)
    g_pad = jnp.zeros((D, D), f32).at[:, :n_base].set(g)
    ga_pad = jnp.zeros((3, D, D), f32).at[:, :n_base, :].set(
        g.T[None, :, :] * la[:, None, :])

    pmat = jnp.concatenate(
        [w2bd[None], w3bd[None], w4p_pad[None], g_pad[None], ga_pad], axis=0)   # (7, D, D)
    prow = jnp.concatenate([w1row, b1row, b2row, b3row, b4p_pad, lb], axis=0)   # (8, D)

    # --------------------------------- kernel ---------------------------------
    def kernel(pmat_ref, prow_ref, tcol_ref, xw_ref, out_ref):
        w2 = pmat_ref[0]
        w3 = pmat_ref[1]
        w4 = pmat_ref[2]
        g_ind = pmat_ref[3]                    # (D, D) 0/1 indicator (lane-padded groups)
        w1r = prow_ref[0:1, :]
        b1r = prow_ref[1:2, :]
        b2r = prow_ref[2:3, :]
        b3r = prow_ref[3:4, :]
        b4r = prow_ref[4:5, :]
        t = tcol_ref[...]                      # (TP, 1)
        wrow = xw_ref[0:1, :]                  # (1, TP) trapezoid weights (zero in pad)
        xb = xw_ref[8:8 + BP, :]               # (BP, TP) batch (zero in pad)

        def fused_layer(h, k):
            # h -> SELU(h + LayerNorm_per_16wide_group(h)); torch-style LN:
            # unbiased (H-1) variance, eps OUTSIDE sqrt.  2 MXU matmuls:
            # stacked moments, then stacked broadcast with alpha folded in.
            ga = pmat_ref[4 + k]                                        # (D, D) = ind^T * alpha_k
            lbr = prow_ref[5 + k:6 + k, :]                              # (1, D) beta_k
            stacked = jnp.concatenate([h, h * h], axis=0)               # (2TP, D)
            mom = jnp.dot(stacked, g_ind, preferred_element_type=f32)   # (2TP, D)
            s1 = mom[:TP, :]                                            # per-group Σx
            s2 = mom[TP:, :]                                            # per-group Σx²
            mean_g = s1 * inv_h
            var_g = jnp.maximum((s2 - s1 * mean_g) * inv_hm1, 0.0)      # unbiased, clamped
            inv_g = pl.reciprocal(jnp.sqrt(var_g) + LN_EPS)             # exact 1/(std+eps)
            stacked2 = jnp.concatenate([inv_g, mean_g * inv_g], axis=0)  # (2TP, D)
            bc = jnp.dot(stacked2, ga, preferred_element_type=f32)       # (2TP, D)
            s_ia = bc[:TP, :]                                            # inv*alpha per lane
            s_mia = bc[TP:, :]                                           # mean*inv*alpha per lane
            # TODO(synk): nn.Dropout has no deterministic Pallas equivalent;
            # the kernel runs in eval mode (identity).
            return _selu(h + h * s_ia - s_mia + lbr)

        # ---- stacked MicroNN MLPs; layer 0 has in_d == 1 -> outer product ----
        h = t * w1r + b1r                                               # (TP, D)
        h = fused_layer(h, 0)
        h = jnp.dot(h, w2, preferred_element_type=f32) + b2r
        h = fused_layer(h, 1)
        h = jnp.dot(h, w3, preferred_element_type=f32) + b3r
        h = fused_layer(h, 2)

        # final per-basis Linear with lin_w already folded in; lanes >= n_base
        # are exactly zero (zero weight columns / bias lanes).
        nb_t = jnp.dot(h, w4, preferred_element_type=f32) + b4r         # (TP, D)

        # trapezoidal L2 norm (weights are zero in the padded time region)
        trap = jnp.dot(wrow, nb_t * nb_t, preferred_element_type=f32)   # (1, D)
        inv_l2 = pl.reciprocal(jnp.sqrt(trap) + 1e-6, approx=True)      # EUP
        norm_t = nb_t * inv_l2                                          # (TP, D)

        # scores: trapezoidal inner products <x_b, basis_i>
        xw_ = xb * wrow                                                 # (BP, TP)
        score = jnp.dot(xw_, norm_t, preferred_element_type=f32)        # (BP, D)

        # reconstruction: out = score @ normalized_bases
        out = lax.dot_general(score, norm_t, (((1,), (1,)), ((), ())),
                              preferred_element_type=f32)               # (BP, TP)
        out_ref[...] = out.astype(out_ref.dtype)

    vmem = pl.BlockSpec(memory_space=pltpu.MemorySpace.VMEM)
    out = pl.pallas_call(
        kernel,
        out_shape=jax.ShapeDtypeStruct((BP, TP), jnp.float32),
        in_specs=[vmem, vmem, vmem, vmem],
        out_specs=vmem,
    )(pmat, prow, tcol, xw)
    return out[:B, :T]


# ------------- pure-JAX reference (mirrors the PyTorch code path) -------------
def adafnn_reference(params, tseq, x):
    n_base = params["lin_w"].shape[0]
    B = x.shape[0]
    hstep = tseq[1:] - tseq[:-1]

    def inner(f1, f2):
        prod = f1 * f2
        return (prod[:, :-1] + prod[:, 1:]) @ hstep[:, None] / 2.0

    t = tseq[:, None]                                           # (T, 1)
    bases = []
    for i in range(n_base):
        h = t * params["w1"][i] + params["b1"][i]
        h = h + _layernorm_unbiased(h, params["ln_alpha"][i][0:1], params["ln_beta"][i][0:1])
        h = _selu(h)
        h = h @ params["w2"][i] + params["b2"][i]
        h = h + _layernorm_unbiased(h, params["ln_alpha"][i][1:2], params["ln_beta"][i][1:2])
        h = _selu(h)
        h = h @ params["w3"][i] + params["b3"][i]
        h = h + _layernorm_unbiased(h, params["ln_alpha"][i][2:3], params["ln_beta"][i][2:3])
        h = _selu(h)
        o = jnp.sum(h * params["w4"][i], axis=-1, keepdims=True) + params["b4"][i]  # (T,1)
        bases.append(o.T)                                       # (1, T)
    bases = params["lin_w"] @ jnp.concatenate(bases, axis=0)    # (n_base, T)
    l2 = jnp.sqrt(inner(bases, bases))                          # (n_base, 1)
    normalized = [bases[i:i + 1] / (l2[i, 0] + 1e-6) for i in range(n_base)]
    score = jnp.concatenate(
        [inner(jnp.tile(b, (B, 1)), x) for b in normalized], axis=-1)  # (B, n_base)
    return score @ jnp.concatenate(normalized, axis=0)          # (B, T)


# ---------------- deterministic parameter construction ----------------
def init_params(key, n_base=4, hidden=16):
    ks = jax.random.split(key, 11)
    H = hidden

    def rn(k, shape, scale=1.0):
        return (scale * jax.random.normal(k, shape)).astype(jnp.float32)

    return dict(
        lin_w=rn(ks[0], (n_base, n_base)),                 # BasisLinearTransform.weights
        w1=rn(ks[1], (n_base, 1, H)),                      # Linear(1, H), stored (in, out)
        b1=rn(ks[2], (n_base, 1, H), 0.1),
        w2=rn(ks[3], (n_base, H, H), 1.0 / jnp.sqrt(H)),   # Linear(H, H)
        b2=rn(ks[4], (n_base, 1, H), 0.1),
        w3=rn(ks[5], (n_base, H, H), 1.0 / jnp.sqrt(H)),   # Linear(H, H)
        b3=rn(ks[6], (n_base, 1, H), 0.1),
        w4=rn(ks[7], (n_base, 1, H), 1.0 / jnp.sqrt(H)),   # Linear(H, 1), stored as row
        b4=rn(ks[8], (n_base, 1, 1), 0.1),
        ln_alpha=rn(ks[9], (n_base, 3, H)),                # LayerNorm alphas (3 hidden layers)
        ln_beta=rn(ks[10], (n_base, 3, H)),                # LayerNorm betas
    )


if __name__ == "__main__":
    n_base, hidden, T, B = 4, 16, 101, 2
    key = jax.random.PRNGKey(0)
    kp, kx = jax.random.split(key)

    params = init_params(kp, n_base=n_base, hidden=hidden)
    tseq = jnp.linspace(0.0, 1.0, T, dtype=jnp.float32)
    x = jax.random.normal(kx, (B, T), dtype=jnp.float32)

    out = adafnn_forward(params, tseq, x)
    out = jax.block_until_ready(out)

    ref = adafnn_reference(params, tseq, x)
    assert out.shape == (B, T)
    assert bool(jnp.isfinite(out).all())
    # Tolerance unchanged from the previously-validated version: the dominant
    # error term is still the approximate EUP reciprocal in the L2
    # normalization; the moment-trick LayerNorm adds only ~1e-6 relative error
    # at these scales (LN 1/std itself stays exact).
    assert bool(jnp.allclose(out, ref, rtol=2e-2, atol=5e-3)), float(
        jnp.max(jnp.abs(out - ref)))

    print("KERNEL_OK")
</pallas_src>

<mosaic_0001>
module attributes {stable_mosaic.version = 11 : i64} {
  func.func @kernel(%arg0: memref<7x64x64xf32, #tpu.memory_space<vmem>>, %arg1: memref<8x64xf32, #tpu.memory_space<vmem>>, %arg2: memref<128x1xf32, #tpu.memory_space<vmem>>, %arg3: memref<16x128xf32, #tpu.memory_space<vmem>>, %arg4: memref<8x128xf32, #tpu.memory_space<vmem>>) attributes {dimension_semantics = [], scalar_prefetch = 0 : i64, scratch_operands = 0 : i64, tpu.core_type = #tpu.core_type<tc>} {
    %c0 = arith.constant 0 : index
    %c0_0 = arith.constant 0 : index
    %c0_1 = arith.constant 0 : index
    %0 = vector.load %arg0[%c0, %c0_0, %c0_1] : memref<7x64x64xf32, #tpu.memory_space<vmem>>, vector<1x64x64xf32>
    %1 = vector.shape_cast %0 : vector<1x64x64xf32> to vector<64x64xf32>
    %c1 = arith.constant 1 : index
    %c0_2 = arith.constant 0 : index
    %c0_3 = arith.constant 0 : index
    %2 = vector.load %arg0[%c1, %c0_2, %c0_3] : memref<7x64x64xf32, #tpu.memory_space<vmem>>, vector<1x64x64xf32>
    %3 = vector.shape_cast %2 : vector<1x64x64xf32> to vector<64x64xf32>
    %c2 = arith.constant 2 : index
    %c0_4 = arith.constant 0 : index
    %c0_5 = arith.constant 0 : index
    %4 = vector.load %arg0[%c2, %c0_4, %c0_5] : memref<7x64x64xf32, #tpu.memory_space<vmem>>, vector<1x64x64xf32>
    %5 = vector.shape_cast %4 : vector<1x64x64xf32> to vector<64x64xf32>
    %c3 = arith.constant 3 : index
    %c0_6 = arith.constant 0 : index
    %c0_7 = arith.constant 0 : index
    %6 = vector.load %arg0[%c3, %c0_6, %c0_7] : memref<7x64x64xf32, #tpu.memory_space<vmem>>, vector<1x64x64xf32>
    %7 = vector.shape_cast %6 : vector<1x64x64xf32> to vector<64x64xf32>
    %c0_8 = arith.constant 0 : index
    %c0_9 = arith.constant 0 : index
    %8 = vector.load %arg1[%c0_8, %c0_9] : memref<8x64xf32, #tpu.memory_space<vmem>>, vector<1x64xf32>
    %c1_10 = arith.constant 1 : index
    %c0_11 = arith.constant 0 : index
    %9 = vector.load %arg1[%c1_10, %c0_11] : memref<8x64xf32, #tpu.memory_space<vmem>>, vector<1x64xf32>
    %c2_12 = arith.constant 2 : index
    %c0_13 = arith.constant 0 : index
    %10 = vector.load %arg1[%c2_12, %c0_13] : memref<8x64xf32, #tpu.memory_space<vmem>>, vector<1x64xf32>
    %c3_14 = arith.constant 3 : index
    %c0_15 = arith.constant 0 : index
    %11 = vector.load %arg1[%c3_14, %c0_15] : memref<8x64xf32, #tpu.memory_space<vmem>>, vector<1x64xf32>
    %c4 = arith.constant 4 : index
    %c0_16 = arith.constant 0 : index
    %12 = vector.load %arg1[%c4, %c0_16] : memref<8x64xf32, #tpu.memory_space<vmem>>, vector<1x64xf32>
    %c0_17 = arith.constant 0 : index
    %c0_18 = arith.constant 0 : index
    %13 = vector.load %arg2[%c0_17, %c0_18] : memref<128x1xf32, #tpu.memory_space<vmem>>, vector<128x1xf32>
    %c0_19 = arith.constant 0 : index
    %c0_20 = arith.constant 0 : index
    %14 = vector.load %arg3[%c0_19, %c0_20] : memref<16x128xf32, #tpu.memory_space<vmem>>, vector<1x128xf32>
    %c8 = arith.constant 8 : index
    %c0_21 = arith.constant 0 : index
    %15 = vector.load %arg3[%c8, %c0_21] : memref<16x128xf32, #tpu.memory_space<vmem>>, vector<8x128xf32>
    %16 = vector.broadcast %13 : vector<128x1xf32> to vector<128x64xf32>
    %17 = vector.broadcast %8 : vector<1x64xf32> to vector<128x64xf32>
    %18 = arith.mulf %16, %17 : vector<128x64xf32>
    %19 = vector.broadcast %9 : vector<1x64xf32> to vector<128x64xf32>
    %20 = arith.addf %18, %19 : vector<128x64xf32>
    %c4_22 = arith.constant 4 : index
    %c0_23 = arith.constant 0 : index
    %c0_24 = arith.constant 0 : index
    %21 = vector.load %arg0[%c4_22, %c0_23, %c0_24] : memref<7x64x64xf32, #tpu.memory_space<vmem>>, vector<1x64x64xf32>
    %22 = vector.shape_cast %21 : vector<1x64x64xf32> to vector<64x64xf32>
    %c5 = arith.constant 5 : index
    %c0_25 = arith.constant 0 : index
    %23 = vector.load %arg1[%c5, %c0_25] : memref<8x64xf32, #tpu.memory_space<vmem>>, vector<1x64xf32>
    %24 = arith.mulf %20, %20 : vector<128x64xf32>
    %25 = tpu.concatenate %20, %24 in 0 : vector<128x64xf32>, vector<128x64xf32> -> vector<256x64xf32>
    %cst = arith.constant dense<0.000000e+00> : vector<256x64xf32>
    %26 = tpu.matmul %25, %7, %cst {dimension_numbers = #tpu.dot_dimension_numbers<[1], [0], [0], [1], [0, 0, 1, 1], [], []>} : vector<256x64xf32>, vector<64x64xf32>, vector<256x64xf32> -> vector<256x64xf32>
    %27 = vector.extract_strided_slice %26 {offsets = [0, 0], sizes = [128, 64], strides = [1, 1]} : vector<256x64xf32> to vector<128x64xf32>
    %28 = vector.extract_strided_slice %26 {offsets = [128, 0], sizes = [128, 64], strides = [1, 1]} : vector<256x64xf32> to vector<128x64xf32>
    %cst_26 = arith.constant 6.250000e-02 : f32
    %29 = vector.broadcast %cst_26 : f32 to vector<128x64xf32>
    %30 = arith.mulf %27, %29 : vector<128x64xf32>
    %31 = arith.mulf %27, %30 : vector<128x64xf32>
    %32 = arith.subf %28, %31 : vector<128x64xf32>
    %cst_27 = arith.constant 0.0666666701 : f32
    %33 = vector.broadcast %cst_27 : f32 to vector<128x64xf32>
    %34 = arith.mulf %32, %33 : vector<128x64xf32>
    %cst_28 = arith.constant 0.000000e+00 : f32
    %35 = vector.broadcast %cst_28 : f32 to vector<128x64xf32>
    %36 = arith.maximumf %34, %35 : vector<128x64xf32>
    %37 = math.sqrt %36 : vector<128x64xf32>
    %cst_29 = arith.constant 9.99999997E-7 : f32
    %38 = vector.broadcast %cst_29 : f32 to vector<128x64xf32>
    %39 = arith.addf %37, %38 : vector<128x64xf32>
    %40 = tpu.reciprocal %39 : vector<128x64xf32> -> vector<128x64xf32>
    %41 = arith.mulf %30, %40 : vector<128x64xf32>
    %42 = tpu.concatenate %40, %41 in 0 : vector<128x64xf32>, vector<128x64xf32> -> vector<256x64xf32>
    %cst_30 = arith.constant dense<0.000000e+00> : vector<256x64xf32>
    %43 = tpu.matmul %42, %22, %cst_30 {dimension_numbers = #tpu.dot_dimension_numbers<[1], [0], [0], [1], [0, 0, 1, 1], [], []>} : vector<256x64xf32>, vector<64x64xf32>, vector<256x64xf32> -> vector<256x64xf32>
    %44 = vector.extract_strided_slice %43 {offsets = [0, 0], sizes = [128, 64], strides = [1, 1]} : vector<256x64xf32> to vector<128x64xf32>
    %45 = vector.extract_strided_slice %43 {offsets = [128, 0], sizes = [128, 64], strides = [1, 1]} : vector<256x64xf32> to vector<128x64xf32>
    %46 = arith.mulf %20, %44 : vector<128x64xf32>
    %47 = arith.addf %20, %46 : vector<128x64xf32>
    %48 = arith.subf %47, %45 : vector<128x64xf32>
    %49 = vector.broadcast %23 : vector<1x64xf32> to vector<128x64xf32>
    %50 = arith.addf %48, %49 : vector<128x64xf32>
    %cst_31 = arith.constant 0.000000e+00 : f32
    %51 = vector.broadcast %cst_31 : f32 to vector<128x64xf32>
    %52 = arith.cmpf ogt, %50, %51 : vector<128x64xf32>
    %cst_32 = arith.constant 0.000000e+00 : f32
    %53 = vector.broadcast %cst_32 : f32 to vector<128x64xf32>
    %54 = arith.minimumf %50, %53 : vector<128x64xf32>
    %55 = math.exp %54 : vector<128x64xf32>
    %cst_33 = arith.constant 1.000000e+00 : f32
    %56 = vector.broadcast %cst_33 : f32 to vector<128x64xf32>
    %57 = arith.subf %55, %56 : vector<128x64xf32>
    %cst_34 = arith.constant 1.67326319 : f32
    %58 = vector.broadcast %cst_34 : f32 to vector<128x64xf32>
    %59 = arith.mulf %58, %57 : vector<128x64xf32>
    %60 = arith.select %52, %50, %59 : vector<128x64xi1>, vector<128x64xf32>
    %cst_35 = arith.constant 1.05070102 : f32
    %61 = vector.broadcast %cst_35 : f32 to vector<128x64xf32>
    %62 = arith.mulf %61, %60 : vector<128x64xf32>
    %cst_36 = arith.constant dense<0.000000e+00> : vector<128x64xf32>
    %63 = tpu.matmul %62, %1, %cst_36 {dimension_numbers = #tpu.dot_dimension_numbers<[1], [0], [0], [1], [0, 0, 1, 1], [], []>} : vector<128x64xf32>, vector<64x64xf32>, vector<128x64xf32> -> vector<128x64xf32>
    %64 = vector.broadcast %10 : vector<1x64xf32> to vector<128x64xf32>
    %65 = arith.addf %63, %64 : vector<128x64xf32>
    %c5_37 = arith.constant 5 : index
    %c0_38 = arith.constant 0 : index
    %c0_39 = arith.constant 0 : index
    %66 = vector.load %arg0[%c5_37, %c0_38, %c0_39] : memref<7x64x64xf32, #tpu.memory_space<vmem>>, vector<1x64x64xf32>
    %67 = vector.shape_cast %66 : vector<1x64x64xf32> to vector<64x64xf32>
    %c6 = arith.constant 6 : index
    %c0_40 = arith.constant 0 : index
    %68 = vector.load %arg1[%c6, %c0_40] : memref<8x64xf32, #tpu.memory_space<vmem>>, vector<1x64xf32>
    %69 = arith.mulf %65, %65 : vector<128x64xf32>
    %70 = tpu.concatenate %65, %69 in 0 : vector<128x64xf32>, vector<128x64xf32> -> vector<256x64xf32>
    %cst_41 = arith.constant dense<0.000000e+00> : vector<256x64xf32>
    %71 = tpu.matmul %70, %7, %cst_41 {dimension_numbers = #tpu.dot_dimension_numbers<[1], [0], [0], [1], [0, 0, 1, 1], [], []>} : vector<256x64xf32>, vector<64x64xf32>, vector<256x64xf32> -> vector<256x64xf32>
    %72 = vector.extract_strided_slice %71 {offsets = [0, 0], sizes = [128, 64], strides = [1, 1]} : vector<256x64xf32> to vector<128x64xf32>
    %73 = vector.extract_strided_slice %71 {offsets = [128, 0], sizes = [128, 64], strides = [1, 1]} : vector<256x64xf32> to vector<128x64xf32>
    %cst_42 = arith.constant 6.250000e-02 : f32
    %74 = vector.broadcast %cst_42 : f32 to vector<128x64xf32>
    %75 = arith.mulf %72, %74 : vector<128x64xf32>
    %76 = arith.mulf %72, %75 : vector<128x64xf32>
    %77 = arith.subf %73, %76 : vector<128x64xf32>
    %cst_43 = arith.constant 0.0666666701 : f32
    %78 = vector.broadcast %cst_43 : f32 to vector<128x64xf32>
    %79 = arith.mulf %77, %78 : vector<128x64xf32>
    %cst_44 = arith.constant 0.000000e+00 : f32
    %80 = vector.broadcast %cst_44 : f32 to vector<128x64xf32>
    %81 = arith.maximumf %79, %80 : vector<128x64xf32>
    %82 = math.sqrt %81 : vector<128x64xf32>
    %cst_45 = arith.constant 9.99999997E-7 : f32
    %83 = vector.broadcast %cst_45 : f32 to vector<128x64xf32>
    %84 = arith.addf %82, %83 : vector<128x64xf32>
    %85 = tpu.reciprocal %84 : vector<128x64xf32> -> vector<128x64xf32>
    %86 = arith.mulf %75, %85 : vector<128x64xf32>
    %87 = tpu.concatenate %85, %86 in 0 : vector<128x64xf32>, vector<128x64xf32> -> vector<256x64xf32>
    %cst_46 = arith.constant dense<0.000000e+00> : vector<256x64xf32>
    %88 = tpu.matmul %87, %67, %cst_46 {dimension_numbers = #tpu.dot_dimension_numbers<[1], [0], [0], [1], [0, 0, 1, 1], [], []>} : vector<256x64xf32>, vector<64x64xf32>, vector<256x64xf32> -> vector<256x64xf32>
    %89 = vector.extract_strided_slice %88 {offsets = [0, 0], sizes = [128, 64], strides = [1, 1]} : vector<256x64xf32> to vector<128x64xf32>
    %90 = vector.extract_strided_slice %88 {offsets = [128, 0], sizes = [128, 64], strides = [1, 1]} : vector<256x64xf32> to vector<128x64xf32>
    %91 = arith.mulf %65, %89 : vector<128x64xf32>
    %92 = arith.addf %65, %91 : vector<128x64xf32>
    %93 = arith.subf %92, %90 : vector<128x64xf32>
    %94 = vector.broadcast %68 : vector<1x64xf32> to vector<128x64xf32>
    %95 = arith.addf %93, %94 : vector<128x64xf32>
    %cst_47 = arith.constant 0.000000e+00 : f32
    %96 = vector.broadcast %cst_47 : f32 to vector<128x64xf32>
    %97 = arith.cmpf ogt, %95, %96 : vector<128x64xf32>
    %cst_48 = arith.constant 0.000000e+00 : f32
    %98 = vector.broadcast %cst_48 : f32 to vector<128x64xf32>
    %99 = arith.minimumf %95, %98 : vector<128x64xf32>
    %100 = math.exp %99 : vector<128x64xf32>
    %cst_49 = arith.constant 1.000000e+00 : f32
    %101 = vector.broadcast %cst_49 : f32 to vector<128x64xf32>
    %102 = arith.subf %100, %101 : vector<128x64xf32>
    %cst_50 = arith.constant 1.67326319 : f32
    %103 = vector.broadcast %cst_50 : f32 to vector<128x64xf32>
    %104 = arith.mulf %103, %102 : vector<128x64xf32>
    %105 = arith.select %97, %95, %104 : vector<128x64xi1>, vector<128x64xf32>
    %cst_51 = arith.constant 1.05070102 : f32
    %106 = vector.broadcast %cst_51 : f32 to vector<128x64xf32>
    %107 = arith.mulf %106, %105 : vector<128x64xf32>
    %cst_52 = arith.constant dense<0.000000e+00> : vector<128x64xf32>
    %108 = tpu.matmul %107, %3, %cst_52 {dimension_numbers = #tpu.dot_dimension_numbers<[1], [0], [0], [1], [0, 0, 1, 1], [], []>} : vector<128x64xf32>, vector<64x64xf32>, vector<128x64xf32> -> vector<128x64xf32>
    %109 = vector.broadcast %11 : vector<1x64xf32> to vector<128x64xf32>
    %110 = arith.addf %108, %109 : vector<128x64xf32>
    %c6_53 = arith.constant 6 : index
    %c0_54 = arith.constant 0 : index
    %c0_55 = arith.constant 0 : index
    %111 = vector.load %arg0[%c6_53, %c0_54, %c0_55] : memref<7x64x64xf32, #tpu.memory_space<vmem>>, vector<1x64x64xf32>
    %112 = vector.shape_cast %111 : vector<1x64x64xf32> to vector<64x64xf32>
    %c7 = arith.constant 7 : index
    %c0_56 = arith.constant 0 : index
    %113 = vector.load %arg1[%c7, %c0_56] : memref<8x64xf32, #tpu.memory_space<vmem>>, vector<1x64xf32>
    %114 = arith.mulf %110, %110 : vector<128x64xf32>
    %115 = tpu.concatenate %110, %114 in 0 : vector<128x64xf32>, vector<128x64xf32> -> vector<256x64xf32>
    %cst_57 = arith.constant dense<0.000000e+00> : vector<256x64xf32>
    %116 = tpu.matmul %115, %7, %cst_57 {dimension_numbers = #tpu.dot_dimension_numbers<[1], [0], [0], [1], [0, 0, 1, 1], [], []>} : vector<256x64xf32>, vector<64x64xf32>, vector<256x64xf32> -> vector<256x64xf32>
    %117 = vector.extract_strided_slice %116 {offsets = [0, 0], sizes = [128, 64], strides = [1, 1]} : vector<256x64xf32> to vector<128x64xf32>
    %118 = vector.extract_strided_slice %116 {offsets = [128, 0], sizes = [128, 64], strides = [1, 1]} : vector<256x64xf32> to vector<128x64xf32>
    %cst_58 = arith.constant 6.250000e-02 : f32
    %119 = vector.broadcast %cst_58 : f32 to vector<128x64xf32>
    %120 = arith.mulf %117, %119 : vector<128x64xf32>
    %121 = arith.mulf %117, %120 : vector<128x64xf32>
    %122 = arith.subf %118, %121 : vector<128x64xf32>
    %cst_59 = arith.constant 0.0666666701 : f32
    %123 = vector.broadcast %cst_59 : f32 to vector<128x64xf32>
    %124 = arith.mulf %122, %123 : vector<128x64xf32>
    %cst_60 = arith.constant 0.000000e+00 : f32
    %125 = vector.broadcast %cst_60 : f32 to vector<128x64xf32>
    %126 = arith.maximumf %124, %125 : vector<128x64xf32>
    %127 = math.sqrt %126 : vector<128x64xf32>
    %cst_61 = arith.constant 9.99999997E-7 : f32
    %128 = vector.broadcast %cst_61 : f32 to vector<128x64xf32>
    %129 = arith.addf %127, %128 : vector<128x64xf32>
    %130 = tpu.reciprocal %129 : vector<128x64xf32> -> vector<128x64xf32>
    %131 = arith.mulf %120, %130 : vector<128x64xf32>
    %132 = tpu.concatenate %130, %131 in 0 : vector<128x64xf32>, vector<128x64xf32> -> vector<256x64xf32>
    %cst_62 = arith.constant dense<0.000000e+00> : vector<256x64xf32>
    %133 = tpu.matmul %132, %112, %cst_62 {dimension_numbers = #tpu.dot_dimension_numbers<[1], [0], [0], [1], [0, 0, 1, 1], [], []>} : vector<256x64xf32>, vector<64x64xf32>, vector<256x64xf32> -> vector<256x64xf32>
    %134 = vector.extract_strided_slice %133 {offsets = [0, 0], sizes = [128, 64], strides = [1, 1]} : vector<256x64xf32> to vector<128x64xf32>
    %135 = vector.extract_strided_slice %133 {offsets = [128, 0], sizes = [128, 64], strides = [1, 1]} : vector<256x64xf32> to vector<128x64xf32>
    %136 = arith.mulf %110, %134 : vector<128x64xf32>
    %137 = arith.addf %110, %136 : vector<128x64xf32>
    %138 = arith.subf %137, %135 : vector<128x64xf32>
    %139 = vector.broadcast %113 : vector<1x64xf32> to vector<128x64xf32>
    %140 = arith.addf %138, %139 : vector<128x64xf32>
    %cst_63 = arith.constant 0.000000e+00 : f32
    %141 = vector.broadcast %cst_63 : f32 to vector<128x64xf32>
    %142 = arith.cmpf ogt, %140, %141 : vector<128x64xf32>
    %cst_64 = arith.constant 0.000000e+00 : f32
    %143 = vector.broadcast %cst_64 : f32 to vector<128x64xf32>
    %144 = arith.minimumf %140, %143 : vector<128x64xf32>
    %145 = math.exp %144 : vector<128x64xf32>
    %cst_65 = arith.constant 1.000000e+00 : f32
    %146 = vector.broadcast %cst_65 : f32 to vector<128x64xf32>
    %147 = arith.subf %145, %146 : vector<128x64xf32>
    %cst_66 = arith.constant 1.67326319 : f32
    %148 = vector.broadcast %cst_66 : f32 to vector<128x64xf32>
    %149 = arith.mulf %148, %147 : vector<128x64xf32>
    %150 = arith.select %142, %140, %149 : vector<128x64xi1>, vector<128x64xf32>
    %cst_67 = arith.constant 1.05070102 : f32
    %151 = vector.broadcast %cst_67 : f32 to vector<128x64xf32>
    %152 = arith.mulf %151, %150 : vector<128x64xf32>
    %cst_68 = arith.constant dense<0.000000e+00> : vector<128x64xf32>
    %153 = tpu.matmul %152, %5, %cst_68 {dimension_numbers = #tpu.dot_dimension_numbers<[1], [0], [0], [1], [0, 0, 1, 1], [], []>} : vector<128x64xf32>, vector<64x64xf32>, vector<128x64xf32> -> vector<128x64xf32>
    %154 = vector.broadcast %12 : vector<1x64xf32> to vector<128x64xf32>
    %155 = arith.addf %153, %154 : vector<128x64xf32>
    %156 = arith.mulf %155, %155 : vector<128x64xf32>
    %cst_69 = arith.constant dense<0.000000e+00> : vector<1x64xf32>
    %157 = tpu.matmul %14, %156, %cst_69 {dimension_numbers = #tpu.dot_dimension_numbers<[1], [0], [0], [1], [0, 0, 1, 1], [], []>} : vector<1x128xf32>, vector<128x64xf32>, vector<1x64xf32> -> vector<1x64xf32>
    %158 = math.sqrt %157 : vector<1x64xf32>
    %cst_70 = arith.constant 9.99999997E-7 : f32
    %159 = vector.broadcast %cst_70 : f32 to vector<1x64xf32>
    %160 = arith.addf %158, %159 : vector<1x64xf32>
    %161 = tpu.reciprocal %160 {approx = true} : vector<1x64xf32> -> vector<1x64xf32>
    %162 = vector.broadcast %161 : vector<1x64xf32> to vector<128x64xf32>
    %163 = arith.mulf %155, %162 : vector<128x64xf32>
    %164 = vector.broadcast %14 : vector<1x128xf32> to vector<8x128xf32>
    %165 = arith.mulf %15, %164 : vector<8x128xf32>
    %cst_71 = arith.constant dense<0.000000e+00> : vector<8x64xf32>
    %166 = tpu.matmul %165, %163, %cst_71 {dimension_numbers = #tpu.dot_dimension_numbers<[1], [0], [0], [1], [0, 0, 1, 1], [], []>} : vector<8x128xf32>, vector<128x64xf32>, vector<8x64xf32> -> vector<8x64xf32>
    %cst_72 = arith.constant dense<0.000000e+00> : vector<8x128xf32>
    %167 = tpu.matmul %166, %163, %cst_72 {dimension_numbers = #tpu.dot_dimension_numbers<[1], [1], [0], [0], [0, 0, 1, 0], [], []>} : vector<8x64xf32>, vector<128x64xf32>, vector<8x128xf32> -> vector<8x128xf32>
    %c0_73 = arith.constant 0 : index
    %c0_74 = arith.constant 0 : index
    %168 = vector.load %arg4[%c0_73, %c0_74] : memref<8x128xf32, #tpu.memory_space<vmem>>, vector<8x128xf32>
    tpu.vector_store %arg4[%c0_73, %c0_74], %167 {strides = array<i32>} : memref<8x128xf32, #tpu.memory_space<vmem>>, vector<8x128xf32>,
    return
  }
}

</mosaic_0001>

<bundles_post_ra>
// kernel: tpu_custom_call.1
= control target key start
LH: loop header
LB: loop body
LE: loop exit
PB: predicated region body
PF: predicated region fallthrough
CT: control target
= control target key end

     0   :  { %9 = vsyncpa [#allocation3], 0  ;;  %s8249_s0 = inlined_call_operand.hbm [shape: f32[7,64,64], index: 0, kind: input, shape index: {}]   ;;  %s8250_s1 = inlined_call_operand.vmem [shape: f32[8,64], index: 1, kind: input, shape index: {}]   ;;  %s8251_s2 = inlined_call_operand.vmem [shape: f32[128,1], index: 2, kind: input, shape index: {}]   ;;  %s8252_s3 = inlined_call_operand.vmem [shape: f32[16,128], index: 3, kind: input, shape index: {}]   ;;  %s8253_s4 = inlined_call_operand.hbm [shape: f32[8,128], index: 4, kind: output, shape index: {}]  }
   0x1   :  { %10 = vsyncpa [#allocation4], 0  ;;  %s6095_s15 = smov [#allocation2]  }
   0x2   :  { %s16_s16 = sshll.u32 %s6095_s15, 4  ;;  %s17_s16 = int_to_ptr.vmem [resolvable:$true] %s16_s16 }
   0x3   :  { %s6059_s17 = scalar_lea.vmem %s17_s16, 7168  ;;  %p6064_p1 = scmp.lt.s32.totalorder %s17_s16, %s17_s16 }
   0x4   :  { %p6060_p0 = scmp.ne.s32.totalorder %s17_s16, %s6059_s17  ;;  %p6065_p2 = scmp.lt.s32.totalorder %s6059_s17, %s6059_s17 }
   0x6   :  { %p6066_p3 = por %p6065_p2, %p6064_p1 }
   0x8   :  { %p6067_p4 = pnand %p6066_p3, %p6060_p0 }
   0xa   :  { %6070 = shalt.err (!%p6067_p4)
}
   0xb   :  { %s6096_s18 = smov 128   ;;  %s6097_s19 = smov 8  }
   0xc   :  { %22 = dma.hbm_to_vmem [thread:$0]  %s8249_s0, 7168, %s17_s16, [#allocation3], %s6096_s18, %s6096_s18, %s6097_s19  }
   0xd   :  { %6091 = dma.done.wait [#allocation3], 7168  }
   0xe   :  { %6092 = vsyncadd [#allocation3], 4294960128  ;;  %v6098_v0 = vmov 0   ;;  %v74_v1 = vld [vmem:[%s8251_s2 + $0x10] sm:$0xff]  ;;  %v72_v2 = vld [vmem:[%s8251_s2] sm:$0xff]  ;;  %vm236_vm0 = vcmask 523264  }
   0xf   :  { %5750 = vset.pattern.permute.xlu1 %v6098_v0  ;;  %5749 = vset.pattern.permute.xlu0 %v6098_v0  ;;  %v75_v3 = vld [vmem:[%s8251_s2 + $0x18] sm:$0xff]  ;;  %v73_v4 = vld [vmem:[%s8251_s2 + $0x8] sm:$0xff]  ;;  %v6144_v6 = vld [vmem:[#allocation2 + $0xf0] sm:$0xff] }
  0x10   :  { %102 = vperm.xlu1 %5750, %v74_v1   ;;  %92 = vperm.xlu0 %5749, %v72_v2   ;;  %v6142_v5 = vld [vmem:[#allocation2 + $0xf8] sm:$0xff]  ;;  %v77_v7 = vld [vmem:[%s8251_s2 + $0x28] sm:$0xff]  ;;  %v76_v8 = vld [vmem:[%s8251_s2 + $0x20] sm:$0xff] }
  0x11   :  { %5117 = vmatprep.subr.mxu0 %v6142_v5  ;;  %v6155_v9 = vld [vmem:[#allocation2 + $0xe8] sm:$0xff]  ;;  %v79_v10 = vld [vmem:[%s8251_s2 + $0x38] sm:$0xff]  ;;  %v78_v11 = vld [vmem:[%s8251_s2 + $0x30] sm:$0xff] }
  0x12   :  { %5118 = vmatpush3.msra.mxu0 %v6142_v5  ;;  %v6165_v12 = vld [vmem:[#allocation2 + $0xe0] sm:$0xff]  ;;  %v6168_v13 = vld [vmem:[#allocation2 + $0xd8] sm:$0xff]  ;;  %v81_v14 = vld [vmem:[%s8251_s2 + $0x48] sm:$0xff] }
  0x13   :  { %5119 = vmatprep.subr.mxu0 %v6144_v6  ;;  %v80_v15 = vld [vmem:[%s8251_s2 + $0x40] sm:$0xff]  ;;  %v6179_v16 = vld [vmem:[#allocation2 + $0xd0] sm:$0xff]  ;;  %v83_v17 = vld [vmem:[%s8251_s2 + $0x58] sm:$0xff] }
  0x14   :  { %107 = vperm.xlu1 %5750, %v75_v3   ;;  %97 = vperm.xlu0 %5749, %v73_v4   ;;  %v82_v18 = vld [vmem:[%s8251_s2 + $0x50] sm:$0xff]  ;;  %v6189_v19 = vld [vmem:[#allocation2 + $0xc8] sm:$0xff]  ;;  %v6192_v20 = vld [vmem:[#allocation2 + $0xc0] sm:$0xff] }
  0x15   :  { %5120 = vmatpush3.msra.mxu0 %v6144_v6  ;;  %v85_v21 = vld [vmem:[%s8251_s2 + $0x68] sm:$0xff]  ;;  %v84_v22 = vld [vmem:[%s8251_s2 + $0x60] sm:$0xff]  ;;  %v87_v23 = vld [vmem:[%s8251_s2 + $0x78] sm:$0xff] }
  0x16   :  { %5121 = vmatprep.subr.mxu0 %v6155_v9  ;;  %v86_v24 = vld [vmem:[%s8251_s2 + $0x70] sm:$0xff]  ;;  %v4441_v25 = vld [vmem:[%s8250_s1] ss:$0 sm:$0xff]  ;;  %v6216_v27 = vld [vmem:[%s8250_s1 + $0x1] ss:$0 sm:$0xff] }
  0x17   :  { %5122 = vmatpush3.msra.mxu0 %v6155_v9 }
  0x18   :  { %117 = vperm.xlu1 %5750, %v77_v7   ;;  %112 = vperm.xlu0 %5749, %v76_v8  }
  0x19   :  { %5123 = vmatprep.subr.mxu0 %v6165_v12 }
  0x1a   :  { %5124 = vmatpush3.msra.mxu0 %v6165_v12 }
  0x1b   :  { %5125 = vmatprep.subr.mxu0 %v6168_v13 }
  0x1c   :  { %127 = vperm.xlu1 %5750, %v79_v10   ;;  %122 = vperm.xlu0 %5749, %v78_v11  }
  0x1d   :  { %5126 = vmatpush3.msra.mxu0 %v6168_v13 }
  0x1e   :  { %5127 = vmatprep.subr.mxu0 %v6179_v16 }
  0x1f   :  { %5128 = vmatpush3.msra.mxu0 %v6179_v16 }
  0x20   :  { %137 = vperm.xlu1 %5750, %v81_v14   ;;  %132 = vperm.xlu0 %5749, %v80_v15  }
  0x21   :  { %5129 = vmatprep.subr.mxu0 %v6189_v19 }
  0x22   :  { %5130 = vmatpush3.msra.mxu0 %v6189_v19 }
  0x23   :  { %5131 = vmatprep.subr.mxu0 %v6192_v20 }
  0x24   :  { %147 = vperm.xlu1 %5750, %v83_v17   ;;  %142 = vperm.xlu0 %5749, %v82_v18  }
  0x25   :  { %5132 = vmatpush3.msra.mxu0 %v6192_v20 }
  0x28   :  { %157 = vperm.xlu1 %5750, %v85_v21   ;;  %152 = vperm.xlu0 %5749, %v84_v22  }
  0x2c   :  { %167 = vperm.xlu1 %5750, %v87_v23   ;;  %162 = vperm.xlu0 %5749, %v86_v24  }
  0x8b   :  { %v103_v26 = vpop.permute.xlu1 %102  ;;  %v93_v28 = vpop.permute.xlu0 %92 }
  0x8c   :  { %v174_v29 = vmul.f32 %v4441_v25, %v93_v28  ;;  %v176_v30 = vmul.f32 %v4441_v25, %v103_v26 }
  0x8e   :  { %v6219_v31 = vadd.f32 %v6216_v27, %v174_v29  ;;  %v6224_v35 = vadd.f32 %v6216_v27, %v176_v30 }
  0x8f   :  { %v108_v32 = vpop.permute.xlu1 %107  ;;  %v98_v33 = vpop.permute.xlu0 %97 }
  0x90   :  { %v175_v34 = vmul.f32 %v4441_v25, %v98_v33  ;;  %5133 = vmatprep.mubr.msk.f32.mxu0 %vm236_vm0, %v6219_v31  ;;  %v177_v36 = vmul.f32 %v4441_v25, %v108_v32  ;;  %v220_v17 = vmul.f32 %v6219_v31, %v6219_v31  ;;  %v222_v21 = vmul.f32 %v6224_v35, %v6224_v35 }
  0x92   :  { %v6227_v37 = vadd.f32 %v6216_v27, %v175_v34  ;;  %v6234_v41 = vadd.f32 %v6216_v27, %v177_v36 }
  0x93   :  { %v118_v38 = vpop.permute.xlu1 %117  ;;  %v113_v39 = vpop.permute.xlu0 %112 }
  0x94   :  { %v178_v40 = vmul.f32 %v4441_v25, %v113_v39  ;;  %5134 = vmatmul.mubr.msk.f32.vlgmr.msra.gmra.mxu0 %vm236_vm0, %v6227_v37  ;;  %v179_v42 = vmul.f32 %v4441_v25, %v118_v38  ;;  %v221_v18 = vmul.f32 %v6227_v37, %v6227_v37  ;;  %v223_v22 = vmul.f32 %v6234_v41, %v6234_v41  ;;  %v218_v38 = vld [vmem:[#allocation2 + $0x138] sm:$0xff]  ;;  %v217_v39 = vld [vmem:[#allocation2 + $0x130] sm:$0xff] }
  0x95   :  { %5136 = vmatprep.mubr.msk.f32.mxu0 %vm236_vm0, %v6224_v35  ;;  %5181 = vmatprep.subr.mxu0 %v218_v38 }
  0x96   :  { %v6237_v43 = vadd.f32 %v6216_v27, %v178_v40  ;;  %v6244_v47 = vadd.f32 %v6216_v27, %v179_v42  ;;  %5726 = vmatprep.subr.mxu1 %v218_v38  ;;  %5182 = vmatpush3.msra.mxu0 %v218_v38  ;;  %v216_v40 = vld [vmem:[#allocation2 + $0x128] sm:$0xff]  ;;  %v215_v42 = vld [vmem:[#allocation2 + $0x120] sm:$0xff] }
  0x97   :  { %v128_v44 = vpop.permute.xlu1 %127  ;;  %v123_v45 = vpop.permute.xlu0 %122  ;;  %5734 = vmatpush3.msra.mxu1 %v218_v38  ;;  %5183 = vmatprep.subr.mxu0 %v217_v39 }
  0x98   :  { %v180_v46 = vmul.f32 %v4441_v25, %v123_v45  ;;  %5137 = vmatmul.mubr.msk.f32.gmra.mxu0 %vm236_vm0, %v6234_v41  ;;  %v181_v48 = vmul.f32 %v4441_v25, %v128_v44  ;;  %v224_v23 = vmul.f32 %v6237_v43, %v6237_v43  ;;  %v225_v24 = vmul.f32 %v6244_v47, %v6244_v47  ;;  %v214_v44 = vld [vmem:[#allocation2 + $0x118] sm:$0xff]  ;;  %v213_v45 = vld [vmem:[#allocation2 + $0x110] sm:$0xff] }
  0x99   :  { %5139 = vmatprep.mubr.msk.f32.mxu0 %vm236_vm0, %v6237_v43  ;;  %5727 = vmatprep.subr.mxu1 %v217_v39 }
  0x9a   :  { %v6247_v49 = vadd.f32 %v6216_v27, %v180_v46  ;;  %v6254_v53 = vadd.f32 %v6216_v27, %v181_v48  ;;  %5184 = vmatpush3.msra.mxu0 %v217_v39  ;;  %5735 = vmatpush3.msra.mxu1 %v217_v39  ;;  %v212_v46 = vld [vmem:[#allocation2 + $0x108] sm:$0xff]  ;;  %v211_v48 = vld [vmem:[#allocation2 + $0x100] sm:$0xff] }
  0x9b   :  { %v138_v50 = vpop.permute.xlu1 %137  ;;  %v133_v51 = vpop.permute.xlu0 %132  ;;  %5185 = vmatprep.subr.mxu0 %v216_v40  ;;  %5728 = vmatprep.subr.mxu1 %v216_v40 }
  0x9c   :  { %v182_v52 = vmul.f32 %v4441_v25, %v133_v51  ;;  %5140 = vmatmul.mubr.msk.f32.gmra.mxu0 %vm236_vm0, %v6244_v47  ;;  %v183_v54 = vmul.f32 %v4441_v25, %v138_v50  ;;  %v227_v26 = vmul.f32 %v6254_v53, %v6254_v53  ;;  %5736 = vmatpush3.msra.mxu1 %v216_v40 }
  0x9d   :  { %5142 = vmatprep.mubr.msk.f32.mxu0 %vm236_vm0, %v6247_v49  ;;  %5186 = vmatpush3.msra.mxu0 %v216_v40 }
  0x9e   :  { %v6257_v55 = vadd.f32 %v6216_v27, %v182_v52  ;;  %v6264_v59 = vadd.f32 %v6216_v27, %v183_v54  ;;  %5187 = vmatprep.subr.mxu0 %v215_v42  ;;  %5729 = vmatprep.subr.mxu1 %v215_v42 }
  0x9f   :  { %v148_v56 = vpop.permute.xlu1 %147  ;;  %v143_v57 = vpop.permute.xlu0 %142  ;;  %5188 = vmatpush3.msra.mxu0 %v215_v42  ;;  %5737 = vmatpush3.msra.mxu1 %v215_v42 }
  0xa0   :  { %8276 = vst [vmem:[#allocation8_spill] sm:$0xff] %v6257_v55  ;;  %v184_v58 = vmul.f32 %v4441_v25, %v143_v57  ;;  %5143 = vmatmul.mubr.msk.f32.gmra.mxu0 %vm236_vm0, %v6254_v53  ;;  %8277 = vst [vmem:[#allocation9_spill] sm:$0xff] %v6264_v59  ;;  %v185_v60 = vmul.f32 %v4441_v25, %v148_v56  ;;  %v229_v28 = vmul.f32 %v6264_v59, %v6264_v59 }
  0xa1   :  { %5145 = vmatprep.mubr.msk.f32.mxu0 %vm236_vm0, %v6257_v55  ;;  %5189 = vmatprep.subr.mxu0 %v214_v44 }
  0xa2   :  { %v6267_v61 = vadd.f32 %v6216_v27, %v184_v58  ;;  %v6274_v1 = vadd.f32 %v6216_v27, %v185_v60  ;;  %5730 = vmatprep.subr.mxu1 %v214_v44  ;;  %5190 = vmatpush3.msra.mxu0 %v214_v44 }
  0xa3   :  { %v158_v62 = vpop.permute.xlu1 %157  ;;  %v153_v63 = vpop.permute.xlu0 %152  ;;  %5738 = vmatpush3.msra.mxu1 %v214_v44  ;;  %5191 = vmatprep.subr.mxu0 %v213_v45 }
  0xa4   :  { %8278 = vst [vmem:[#allocation10_spill] sm:$0xff] %v6267_v61  ;;  %v186_v0 = vmul.f32 %v4441_v25, %v153_v63  ;;  %5146 = vmatmul.mubr.msk.f32.gmra.mxu0 %vm236_vm0, %v6264_v59  ;;  %8279 = vst [vmem:[#allocation11_spill] sm:$0xff] %v6274_v1  ;;  %v187_v2 = vmul.f32 %v4441_v25, %v158_v62  ;;  %v230_v29 = vmul.f32 %v6267_v61, %v6267_v61 }
  0xa5   :  { %5148 = vmatprep.mubr.msk.f32.mxu0 %vm236_vm0, %v6267_v61  ;;  %v231_v30 = vmul.f32 %v6274_v1, %v6274_v1  ;;  %5731 = vmatprep.subr.mxu1 %v213_v45 }
  0xa6   :  { %v6277_v3 = vadd.f32 %v6216_v27, %v186_v0  ;;  %v6284_v10 = vadd.f32 %v6216_v27, %v187_v2  ;;  %5192 = vmatpush3.msra.mxu0 %v213_v45  ;;  %5739 = vmatpush3.msra.mxu1 %v213_v45 }
  0xa7   :  { %v168_v4 = vpop.permute.xlu1 %167  ;;  %v163_v7 = vpop.permute.xlu0 %162  ;;  %5193 = vmatprep.subr.mxu0 %v212_v46  ;;  %5732 = vmatprep.subr.mxu1 %v212_v46 }
  0xa8   :  { %8280 = vst [vmem:[#allocation12_spill] sm:$0xff] %v6277_v3  ;;  %v188_v8 = vmul.f32 %v4441_v25, %v163_v7  ;;  %5149 = vmatmul.mubr.msk.f32.gmra.mxu0 %vm236_vm0, %v6274_v1  ;;  %8281 = vst [vmem:[#allocation13_spill] sm:$0xff] %v6284_v10  ;;  %v189_v11 = vmul.f32 %v4441_v25, %v168_v4  ;;  %v226_v25 = vmul.f32 %v6247_v49, %v6247_v49 }
  0xa9   :  { %5151 = vmatprep.mubr.msk.f32.mxu0 %vm236_vm0, %v6277_v3  ;;  %v232_v32 = vmul.f32 %v6277_v3, %v6277_v3  ;;  %v233_v33 = vmul.f32 %v6284_v10, %v6284_v10  ;;  %5194 = vmatpush3.msra.mxu0 %v212_v46 }
  0xaa   :  { %v6287_v14 = vadd.f32 %v6216_v27, %v188_v8  ;;  %v6294_v15 = vadd.f32 %v6216_v27, %v189_v11  ;;  %v228_v27 = vmul.f32 %v6257_v55, %v6257_v55  ;;  %5740 = vmatpush3.msra.mxu1 %v212_v46  ;;  %5195 = vmatprep.subr.mxu0 %v211_v48 }
  0xab   :  { %5733 = vmatprep.subr.mxu1 %v211_v48  ;;  %5196 = vmatpush3.msra.mxu0 %v211_v48 }
  0xac   :  { %8282 = vst [vmem:[#allocation14_spill] sm:$0xff] %v6287_v14  ;;  %5152 = vmatmul.mubr.msk.f32.gmra.mxu0 %vm236_vm0, %v6284_v10  ;;  %8283 = vst [vmem:[#allocation15_spill] sm:$0xff] %v6294_v15  ;;  %v234_v34 = vmul.f32 %v6287_v14, %v6287_v14  ;;  %v235_v36 = vmul.f32 %v6294_v15, %v6294_v15  ;;  %5741 = vmatpush3.msra.mxu1 %v211_v48 }
  0xad   :  { %5154 = vmatprep.mubr.msk.f32.mxu0 %vm236_vm0, %v6287_v14  ;;  %5285 = vmatprep.subr.mxu1 %v6142_v5 }
  0xb0   :  { %5155 = vmatmul.mubr.msk.f32.gmra.mxu0 %vm236_vm0, %v6294_v15 }
  0xb1   :  { %5157 = vmatprep.mubr.msk.f32.mxu0 %vm236_vm0, %v220_v17 }
  0xb4   :  { %5158 = vmatmul.mubr.msk.f32.gmra.mxu0 %vm236_vm0, %v221_v18 }
  0xb5   :  { %5160 = vmatprep.mubr.msk.f32.mxu0 %vm236_vm0, %v222_v21 }
  0xb8   :  { %5161 = vmatmul.mubr.msk.f32.gmra.mxu0 %vm236_vm0, %v223_v22 }
  0xb9   :  { %5163 = vmatprep.mubr.msk.f32.mxu0 %vm236_vm0, %v224_v23 }
  0xbc   :  { %5164 = vmatmul.mubr.msk.f32.gmra.mxu0 %vm236_vm0, %v225_v24 }
  0xbd   :  { %5166 = vmatprep.mubr.msk.f32.mxu0 %vm236_vm0, %v226_v25 }
  0xc0   :  { %5167 = vmatmul.mubr.msk.f32.gmra.mxu0 %vm236_vm0, %v227_v26 }
  0xc1   :  { %5169 = vmatprep.mubr.msk.f32.mxu0 %vm236_vm0, %v228_v27 }
  0xc4   :  { %5170 = vmatmul.mubr.msk.f32.gmra.mxu0 %vm236_vm0, %v229_v28 }
  0xc5   :  { %5172 = vmatprep.mubr.msk.f32.mxu0 %vm236_vm0, %v230_v29 }
  0xc8   :  { %5173 = vmatmul.mubr.msk.f32.gmra.mxu0 %vm236_vm0, %v231_v30 }
  0xc9   :  { %5175 = vmatprep.mubr.msk.f32.mxu0 %vm236_vm0, %v232_v32 }
  0xcc   :  { %5176 = vmatmul.mubr.msk.f32.gmra.mxu0 %vm236_vm0, %v233_v33 }
  0xcd   :  { %5178 = vmatprep.mubr.msk.f32.mxu0 %vm236_vm0, %v234_v34 }
  0xd0   :  { %5179 = vmatmul.mubr.msk.f32.gmra.mxu0 %vm236_vm0, %v235_v36 }
 0x154   :  { %v5135_v50 = vpop.f32.mrf.mxu0 }
 0x155   :  { %v6353_v8 = vmul.f32 0.0625, %v5135_v50 }
 0x156   :  { %v399_v51 = vpop.f32.mrf.mxu0 }
 0x157   :  { %v6355_v17 = vmul.f32 0.0625, %v399_v51  ;;  %v575_v21 = vmul.f32 %v5135_v50, %v6353_v8 }
 0x158   :  { %v5138_v52 = vpop.f32.mrf.mxu0 }
 0x159   :  { %v6360_v22 = vmul.f32 0.0625, %v5138_v52  ;;  %v574_v24 = vmul.f32 %v6355_v17, %v399_v51 }
 0x15a   :  { %v409_v54 = vpop.f32.mrf.mxu0 }
 0x15b   :  { %v6363_v26 = vmul.f32 0.0625, %v409_v54  ;;  %v577_v28 = vmul.f32 %v5138_v52, %v6360_v22 }
 0x15c   :  { %v5141_v56 = vpop.f32.mrf.mxu0 }
 0x15d   :  { %v6366_v29 = vmul.f32 0.0625, %v5141_v56  ;;  %v576_v40 = vmul.f32 %v6363_v26, %v409_v54 }
 0x15e   :  { %v419_v57 = vpop.f32.mrf.mxu0 }
 0x15f   :  { %v6368_v34 = vmul.f32 0.0625, %v419_v57  ;;  %v579_v45 = vmul.f32 %v5141_v56, %v6366_v29 }
 0x160   :  { %v5144_v58 = vpop.f32.mrf.mxu0 }
 0x161   :  { %v6373_v42 = vmul.f32 0.0625, %v5144_v58 }
 0x162   :  { %v429_v60 = vpop.f32.mrf.mxu0 }
 0x163   :  { %v6377_v46 = vmul.f32 0.0625, %v429_v60 }
 0x164   :  { %v5147_v62 = vpop.f32.mrf.mxu0 }
 0x165   :  { %v6383_v54 = vmul.f32 0.0625, %v5147_v62 }
 0x166   :  { %v439_v63 = vpop.f32.mrf.mxu0 }
 0x168   :  { %v5150_v0 = vpop.f32.mrf.mxu0 }
 0x16a   :  { %v6347_v2 = vpop.f32.mrf.mxu0 }
 0x16c   :  { %v6349_v4 = vpop.f32.mrf.mxu0 }
 0x16e   :  { %v6351_v7 = vpop.f32.mrf.mxu0 }
 0x170   :  { %v5156_v11 = vpop.f32.mrf.mxu0 }
 0x172   :  { %v6357_v18 = vpop.f32.mrf.mxu0 }
 0x174   :  { %v5159_v23 = vpop.f32.mrf.mxu0 }
 0x175   :  { %v591_v25 = vsub.f32 %v5159_v23, %v575_v21  ;;  %v578_v21 = vmul.f32 %v6368_v34, %v419_v57  ;;  %v6394_v57 = vmul.f32 0.0625, %v6347_v2 }
 0x176   :  { %v479_v27 = vpop.f32.mrf.mxu0 }
 0x177   :  { %v607_v30 = vmul.f32 0.06666667, %v591_v25  ;;  %v590_v32 = vsub.f32 %v479_v27, %v574_v24  ;;  %v581_v24 = vmul.f32 %v5144_v58, %v6373_v42 }
 0x178   :  { %v5162_v33 = vpop.f32.mrf.mxu0 }
 0x179   :  { %v6370_v36 = vmax.f32 %v607_v30, 0.0  ;;  %v606_v38 = vmul.f32 0.06666667, %v590_v32  ;;  %v593_v39 = vsub.f32 %v5162_v33, %v577_v28  ;;  %v580_v32 = vmul.f32 %v6377_v46, %v429_v60 }
 0x17a   :  { %v489_v44 = vpop.f32.mrf.mxu0  ;;  %v6389_v33 = vmul.f32 0.0625, %v439_v63 }
 0x17b   :  { %5751 = vrsqrt.f32 %v6370_v36  ;;  %v6379_v48 = vmax.f32 %v606_v38, 0.0  ;;  %v609_v50 = vmul.f32 0.06666667, %v593_v39  ;;  %v592_v51 = vsub.f32 %v489_v44, %v576_v40 }
 0x17c   :  { %v5165_v52 = vpop.f32.mrf.mxu0  ;;  %v6391_v38 = vmul.f32 0.0625, %v5150_v0  ;;  %v6397_v39 = vmul.f32 0.0625, %v6349_v4  ;;  %v6400_v40 = vmul.f32 0.0625, %v6351_v7  ;;  %v6402_v44 = vmul.f32 0.0625, %v5156_v11 }
 0x17d   :  { %v595_v23 = vsub.f32 %v5165_v52, %v579_v45  ;;  %5753 = vrsqrt.f32 %v6379_v48  ;;  %v6386_v56 = vmax.f32 %v609_v50, 0.0  ;;  %v608_v27 = vmul.f32 0.06666667, %v592_v51 }
 0x17e   :  { %v499_v25 = vpop.f32.mrf.mxu0  ;;  %v582_v14 = vmul.f32 %v6389_v33, %v439_v63  ;;  %v585_v15 = vmul.f32 %v5150_v0, %v6391_v38  ;;  %v6430_v63 = vmul.f32 %v6400_v40, %v6351_v7  ;;  %vm647_vm1 = vcmp.eq.f32.partialorder %v6370_v36, inf }
 0x17f   :  { %v611_v28 = vmul.f32 0.06666667, %v595_v23  ;;  %v594_v30 = vsub.f32 %v499_v25, %v578_v21  ;;  %5755 = vrsqrt.f32 %v6386_v56  ;;  %v6405_v45 = vmax.f32 %v608_v27, 0.0 }
 0x180   :  { %v5168_v58 = vpop.f32.mrf.mxu0  ;;  %v583_v21 = vmul.f32 %v5147_v62, %v6383_v54  ;;  %v6411_v23 = vmul.f32 0.0625, %v6357_v18  ;;  %v6418_v27 = vmul.f32 %v6394_v57, %v6347_v2  ;;  %v6425_v62 = vmul.f32 %v5156_v11, %v6402_v44 }
 0x181   :  { %v6407_v60 = vmax.f32 %v611_v28, 0.0  ;;  %v610_v50 = vmul.f32 0.06666667, %v594_v30  ;;  %v597_v51 = vsub.f32 %v5168_v58, %v581_v24  ;;  %5757 = vrsqrt.f32 %v6405_v45 }
 0x182   :  { %v509_v52 = vpop.f32.mrf.mxu0  ;;  %v6422_v24 = vmul.f32 %v6349_v4, %v6397_v39  ;;  %vm649_vm2 = vcmp.eq.f32.partialorder %v6370_v36, 0.0  ;;  %v6438_v11 = vmul.f32 %v6411_v23, %v6357_v18  ;;  %vm640_vm3 = vcmp.eq.f32.partialorder %v6379_v48, inf }
 0x183   :  { %v596_v25 = vsub.f32 %v509_v52, %v580_v32  ;;  %5759 = vrsqrt.f32 %v6407_v60  ;;  %v6432_v0 = vmax.f32 %v610_v50, 0.0  ;;  %v613_v28 = vmul.f32 0.06666667, %v597_v51 }
 0x184   :  { %v5171_v3 = vpop.f32.mrf.mxu0  ;;  %v650_v52 = vand.u32 2147483648, %v6370_v36  ;;  %vm642_vm4 = vcmp.eq.f32.partialorder %v6379_v48, 0.0  ;;  %v643_v50 = vand.u32 2147483648, %v6379_v48  ;;  %vm661_vm5 = vcmp.eq.f32.partialorder %v6386_v56, inf }
 0x185   :  { %v612_v30 = vmul.f32 0.06666667, %v596_v25  ;;  %v599_v32 = vsub.f32 %v5171_v3, %v583_v21  ;;  %5761 = vrsqrt.f32 %v6432_v0  ;;  %v6446_v51 = vmax.f32 %v613_v28, 0.0 }
 0x186   :  { %v519_v2 = vpop.f32.mrf.mxu0  ;;  %vm663_vm6 = vcmp.eq.f32.partialorder %v6386_v56, 0.0  ;;  %vm654_vm7 = vcmp.eq.f32.partialorder %v6405_v45, inf  ;;  %vm656_vm8 = vcmp.eq.f32.partialorder %v6405_v45, 0.0  ;;  %vm675_vm9 = vcmp.eq.f32.partialorder %v6407_v60, inf }
 0x187   :  { %v598_v4 = vsub.f32 %v519_v2, %v582_v14  ;;  %v6448_v14 = vmax.f32 %v612_v30, 0.0  ;;  %v615_v18 = vmul.f32 0.06666667, %v599_v32  ;;  %5763 = vrsqrt.f32 %v6446_v51 }
 0x188   :  { %v5752_v58 = vpop.eup %5751  ;;  %v5174_v3 = vpop.f32.mrf.mxu0  ;;  %vm677_vm10 = vcmp.eq.f32.partialorder %v6407_v60, 0.0  ;;  %v678_v59 = vand.u32 2147483648, %v6407_v60  ;;  %vm668_vm11 = vcmp.eq.f32.partialorder %v6432_v0, inf  ;;  %vm670_vm12 = vcmp.eq.f32.partialorder %v6432_v0, 0.0 }
 0x189   :  { %v646_v7 = vmul.f32 %v5752_v58, %v6370_v36  ;;  %v614_v21 = vmul.f32 0.06666667, %v598_v4  ;;  %v601_v25 = vsub.f32 %v5174_v3, %v585_v15  ;;  %v664_v58 = vand.u32 2147483648, %v6386_v56 }
 0x18a   :  { %v529_v2 = vpop.f32.mrf.mxu0  ;;  %v5754_v10 = vpop.eup %5753  ;;  %5765 = vrsqrt.f32 %v6448_v14  ;;  %v657_v4 = vand.u32 2147483648, %v6405_v45  ;;  %vm689_vm13 = vcmp.eq.f32.partialorder %v6446_v51, inf  ;;  %vm691_vm14 = vcmp.eq.f32.partialorder %v6446_v51, 0.0 }
 0x18b   :  { %v648_v61 = vsel %vm647_vm1, %v6370_v36, %v646_v7  ;;  %v639_v30 = vmul.f32 %v5754_v10, %v6379_v48  ;;  %v6470_v10 = vmax.f32 %v614_v21, 0.0  ;;  %v600_v1 = vsub.f32 %v529_v2, %v6418_v27 }
 0x18c   :  { %v651_v28 = vsel %vm649_vm2, %v650_v52, %v648_v61  ;;  %v5177_v15 = vpop.f32.mrf.mxu0  ;;  %v5756_v3 = vpop.eup %5755  ;;  %v6468_v61 = vmax.f32 %v615_v18, 0.0  ;;  %v617_v52 = vmul.f32 0.06666667, %v601_v25  ;;  %vm682_vm15 = vcmp.eq.f32.partialorder %v6448_v14, inf }
 0x18d   :  { %v751_v32 = vadd.f32 1e-06, %v651_v28  ;;  %v641_v36 = vsel %vm640_vm3, %v6379_v48, %v639_v30  ;;  %v660_v28 = vmul.f32 %v5756_v3, %v6386_v56  ;;  %v616_v2 = vmul.f32 0.06666667, %v600_v1 }
 0x18e   :  { %v644_v7 = vsel %vm642_vm4, %v643_v50, %v641_v36  ;;  %v539_v18 = vpop.f32.mrf.mxu0  ;;  %v5758_v30 = vpop.eup %5757  ;;  %v6484_v48 = vmax.f32 %v617_v52, 0.0  ;;  %v671_v3 = vand.u32 2147483648, %v6432_v0  ;;  %vm684_vm1 = vcmp.eq.f32.partialorder %v6448_v14, 0.0 }
 0x18f   :  { %5767 = vrcp.f32 %v751_v32  ;;  %v750_v55 = vadd.f32 1e-06, %v644_v7  ;;  %v662_v21 = vsel %vm661_vm5, %v6386_v56, %v660_v28  ;;  %v653_v25 = vmul.f32 %v5758_v30, %v6405_v45 }
 0x190   :  { %5769 = vrsqrt.f32 %v6468_v61  ;;  %v5760_v27 = vpop.eup %5759  ;;  %v665_v50 = vsel %vm663_vm6, %v664_v58, %v662_v21  ;;  %v5180_v56 = vpop.f32.mrf.mxu0  ;;  %v603_v28 = vsub.f32 %v5177_v15, %v6422_v24  ;;  %vm703_vm2 = vcmp.eq.f32.partialorder %v6468_v61, inf }
 0x191   :  { %5771 = vrsqrt.f32 %v6470_v10  ;;  %v674_v32 = vmul.f32 %v5760_v27, %v6407_v60  ;;  %v655_v36 = vsel %vm654_vm7, %v6405_v45, %v653_v25  ;;  %v753_v58 = vadd.f32 1e-06, %v665_v50 }
 0x192   :  { %5773 = vrcp.f32 %v750_v55  ;;  %v6498_v55 = vmax.f32 %v616_v2, 0.0  ;;  %v5762_v1 = vpop.eup %5761  ;;  %v658_v52 = vsel %vm656_vm8, %v657_v4, %v655_v36  ;;  %v692_v50 = vand.u32 2147483648, %v6446_v51 }
 0x193   :  { %5775 = vrsqrt.f32 %v6484_v48  ;;  %v676_v7 = vsel %vm675_vm9, %v6407_v60, %v674_v32  ;;  %v752_v30 = vadd.f32 1e-06, %v658_v52  ;;  %v667_v27 = vmul.f32 %v5762_v1, %v6432_v0  ;;  %v549_v60 = vpop.f32.mrf.mxu0 }
 0x194   :  { %v679_v21 = vsel %vm677_vm10, %v678_v59, %v676_v7  ;;  %5777 = vrsqrt.f32 %v6498_v55  ;;  %v685_v45 = vand.u32 2147483648, %v6448_v14  ;;  %v5764_v4 = vpop.eup %5763  ;;  %v619_v15 = vmul.f32 0.06666667, %v603_v28 }
 0x195   :  { %v755_v25 = vadd.f32 1e-06, %v679_v21  ;;  %5779 = vrcp.f32 %v752_v30  ;;  %v669_v24 = vsel %vm668_vm11, %v6432_v0, %v667_v27  ;;  %v602_v59 = vsub.f32 %v539_v18, %v6430_v63 }
 0x196   :  { %5781 = vrcp.f32 %v753_v58  ;;  %v672_v32 = vsel %vm670_vm12, %v671_v3, %v669_v24  ;;  %v688_v36 = vmul.f32 %v5764_v4, %v6446_v51  ;;  %v605_v1 = vsub.f32 %v5180_v56, %v6425_v62 }
 0x197   :  { %v5766_v2 = vpop.eup %5765  ;;  %v754_v52 = vadd.f32 1e-06, %v672_v32  ;;  %v6522_v30 = vmax.f32 %v619_v15, 0.0  ;;  %v618_v21 = vmul.f32 0.06666667, %v602_v59  ;;  %5783 = vrcp.f32 %v755_v25 }
 0x198   :  { %v681_v7 = vmul.f32 %v5766_v2, %v6448_v14  ;;  %v690_v63 = vsel %vm689_vm13, %v6446_v51, %v688_v36  ;;  %v621_v18 = vmul.f32 0.06666667, %v605_v1  ;;  %v604_v58 = vsub.f32 %v549_v60, %v6438_v11 }
 0x199   :  { %5785 = vrcp.f32 %v754_v52  ;;  %v693_v62 = vsel %vm691_vm14, %v692_v50, %v690_v63  ;;  %v6538_v24 = vmax.f32 %v618_v21, 0.0  ;;  %vm705_vm3 = vcmp.eq.f32.partialorder %v6468_v61, 0.0 }
 0x19a   :  { %v683_v3 = vsel %vm682_vm15, %v6448_v14, %v681_v7  ;;  %v757_v28 = vadd.f32 1e-06, %v693_v62  ;;  %5787 = vrsqrt.f32 %v6522_v30  ;;  %v6542_v51 = vmax.f32 %v621_v18, 0.0 }
 0x19b   :  { %v686_v27 = vsel %vm684_vm1, %v685_v45, %v683_v3  ;;  %v620_v50 = vmul.f32 0.06666667, %v604_v58  ;;  %v706_v32 = vand.u32 2147483648, %v6468_v61  ;;  %vm717_vm4 = vcmp.eq.f32.partialorder %v6484_v48, inf }
 0x19c   :  { %v6528_v0 = vpop.eup %5767  ;;  %v756_v4 = vadd.f32 1e-06, %v686_v27  ;;  %5789 = vrcp.f32 %v757_v28  ;;  %vm710_vm5 = vcmp.eq.f32.partialorder %v6498_v55, inf  ;;  %vm696_vm6 = vcmp.eq.f32.partialorder %v6470_v10, inf }
 0x19d   :  { %v5770_v56 = vpop.eup %5769  ;;  %v6556_v36 = vmax.f32 %v620_v50, 0.0  ;;  %v713_v21 = vand.u32 2147483648, %v6498_v55  ;;  %vm712_vm7 = vcmp.eq.f32.partialorder %v6498_v55, 0.0  ;;  %v699_v62 = vand.u32 2147483648, %v6470_v10 }
 0x19e   :  { %v5772_v25 = vpop.eup %5771  ;;  %v702_v11 = vmul.f32 %v5770_v56, %v6468_v61  ;;  %5791 = vrcp.f32 %v756_v4  ;;  %v720_v3 = vand.u32 2147483648, %v6484_v48  ;;  %vm698_vm8 = vcmp.eq.f32.partialorder %v6470_v10, 0.0 }
 0x19f   :  { %v6540_v15 = vpop.eup %5773  ;;  %v695_v14 = vmul.f32 %v5772_v25, %v6470_v10  ;;  %5793 = vrsqrt.f32 %v6538_v24  ;;  %vm719_vm9 = vcmp.eq.f32.partialorder %v6484_v48, 0.0  ;;  %vm731_vm10 = vcmp.eq.f32.partialorder %v6522_v30, inf }
 0x1a0   :  { %v5776_v59 = vpop.eup %5775  ;;  %5197 = vmatprep.mubr.msk.f32.mxu0 %vm236_vm0, %v6540_v15  ;;  %v704_v45 = vsel %vm703_vm2, %v6468_v61, %v702_v11  ;;  %5795 = vrsqrt.f32 %v6542_v51  ;;  %vm733_vm11 = vcmp.eq.f32.partialorder %v6522_v30, 0.0  ;;  %vm724_vm12 = vcmp.eq.f32.partialorder %v6538_v24, inf }
 0x1a1   :  { %5198 = vmatmul.mubr.msk.f32.vlgmr.msra.gmra.mxu0 %vm236_vm0, %v6528_v0  ;;  %v716_v60 = vmul.f32 %v5776_v59, %v6484_v48  ;;  %v5778_v2 = vpop.eup %5777  ;;  %v707_v7 = vsel %vm705_vm3, %v706_v32, %v704_v45  ;;  %5797 = vrsqrt.f32 %v6556_v36  ;;  %v697_v63 = vsel %vm696_vm6, %v6470_v10, %v695_v14 }
 0x1a2   :  { %v709_v1 = vmul.f32 %v5778_v2, %v6498_v55  ;;  %v6562_v52 = vpop.eup %5779  ;;  %v759_v27 = vadd.f32 1e-06, %v707_v7  ;;  %v734_v2 = vand.u32 2147483648, %v6522_v30  ;;  %vm726_vm13 = vcmp.eq.f32.partialorder %v6538_v24, 0.0 }
 0x1a3   :  { %v6567_v61 = vpop.eup %5781  ;;  %v718_v18 = vsel %vm717_vm4, %v6484_v48, %v716_v60  ;;  %5200 = vmatprep.mubr.msk.f32.mxu0 %vm236_vm0, %v6562_v52  ;;  %vm745_vm14 = vcmp.eq.f32.partialorder %v6542_v51, inf  ;;  %vm747_vm15 = vcmp.eq.f32.partialorder %v6542_v51, 0.0  ;;  %vm738_vm1 = vcmp.eq.f32.partialorder %v6556_v36, inf }
 0x1a4   :  { %v711_v58 = vsel %vm710_vm5, %v6498_v55, %v709_v1  ;;  %v6579_v28 = vpop.eup %5783  ;;  %v700_v55 = vsel %vm698_vm8, %v699_v62, %v697_v63  ;;  %v721_v11 = vsel %vm719_vm9, %v720_v3, %v718_v18  ;;  %v727_v63 = vand.u32 2147483648, %v6538_v24 }
 0x1a5   :  { %v714_v56 = vsel %vm712_vm7, %v713_v21, %v711_v58  ;;  %5201 = vmatmul.mubr.msk.f32.gmra.mxu0 %vm236_vm0, %v6567_v61  ;;  %v758_v50 = vadd.f32 1e-06, %v700_v55  ;;  %v761_v48 = vadd.f32 1e-06, %v721_v11  ;;  %vm740_vm2 = vcmp.eq.f32.partialorder %v6556_v36, 0.0 }
 0x1a6   :  { %v760_v25 = vadd.f32 1e-06, %v714_v56  ;;  %v6582_v4 = vpop.eup %5785 }
 0x1a7   :  { %v5788_v59 = vpop.eup %5787  ;;  %5203 = vmatprep.mubr.msk.f32.mxu0 %vm236_vm0, %v6582_v4 }
 0x1a8   :  { %5799 = vrcp.f32 %v760_v25  ;;  %v730_v14 = vmul.f32 %v5788_v59, %v6522_v30 }
 0x1a9   :  { %5204 = vmatmul.mubr.msk.f32.gmra.mxu0 %vm236_vm0, %v6579_v28  ;;  %5801 = vrcp.f32 %v758_v50  ;;  %v6589_v10 = vpop.eup %5789  ;;  %v741_v50 = vand.u32 2147483648, %v6556_v36 }
 0x1aa   :  { %5803 = vrcp.f32 %v759_v27  ;;  %v732_v60 = vsel %vm731_vm10, %v6522_v30, %v730_v14  ;;  %v748_v30 = vand.u32 2147483648, %v6542_v51 }
 0x1ab   :  { %v6592_v45 = vpop.eup %5791  ;;  %v735_v7 = vsel %vm733_vm11, %v734_v2, %v732_v60  ;;  %5805 = vrcp.f32 %v761_v48 }
 0x1ac   :  { %v5794_v32 = vpop.eup %5793  ;;  %5206 = vmatprep.mubr.msk.f32.mxu0 %vm236_vm0, %v6592_v45  ;;  %v763_v3 = vadd.f32 1e-06, %v735_v7 }
 0x1ad   :  { %v5796_v1 = vpop.eup %5795  ;;  %v723_v21 = vmul.f32 %v5794_v32, %v6538_v24  ;;  %5207 = vmatmul.mubr.msk.f32.gmra.mxu0 %vm236_vm0, %v6589_v10 }
 0x1ae   :  { %v744_v18 = vmul.f32 %v5796_v1, %v6542_v51  ;;  %v5798_v62 = vpop.eup %5797 }
 0x1af   :  { %v725_v58 = vsel %vm724_vm12, %v6538_v24, %v723_v21  ;;  %v737_v11 = vmul.f32 %v5798_v62, %v6556_v36 }
 0x1b0   :  { %v728_v56 = vsel %vm726_vm13, %v727_v63, %v725_v58  ;;  %v746_v27 = vsel %vm745_vm14, %v6542_v51, %v744_v18 }
 0x1b1   :  { %v762_v25 = vadd.f32 1e-06, %v728_v56  ;;  %v749_v55 = vsel %vm747_vm15, %v748_v30, %v746_v27  ;;  %v739_v24 = vsel %vm738_vm1, %v6556_v36, %v737_v11  ;;  %v6696_v11 = vld [vmem:[%s8250_s1 + $0x5] ss:$0 sm:$0xff] }
 0x1b2   :  { %v765_v59 = vadd.f32 1e-06, %v749_v55  ;;  %v742_v14 = vsel %vm740_vm2, %v741_v50, %v739_v24 }
 0x1b3   :  { %5807 = vrcp.f32 %v762_v25  ;;  %v764_v60 = vadd.f32 1e-06, %v742_v14 }
 0x1b4   :  { %5809 = vrcp.f32 %v763_v3 }
 0x1b5   :  { %v5800_v48 = vpop.eup %5799  ;;  %5811 = vrcp.f32 %v764_v60 }
 0x1b6   :  { %v5802_v2 = vpop.eup %5801  ;;  %5813 = vrcp.f32 %v765_v59 }
 0x1b7   :  { %v5804_v51 = vpop.eup %5803  ;;  %5209 = vmatprep.mubr.msk.f32.mxu1 %vm236_vm0, %v5802_v2 }
 0x1b8   :  { %5210 = vmatmul.mubr.msk.f32.vlgmr.msra.gmra.mxu1 %vm236_vm0, %v5804_v51  ;;  %v5806_v36 = vpop.eup %5805 }
 0x1b9   :  { %5212 = vmatprep.mubr.msk.f32.mxu1 %vm236_vm0, %v5800_v48  ;;  %5286 = vmatpush3.msra.mxu1 %v6142_v5 }
 0x1ba   :  { %5287 = vmatprep.subr.mxu1 %v6144_v6 }
 0x1bb   :  { %5288 = vmatpush3.msra.mxu1 %v6144_v6 }
 0x1bc   :  { %5213 = vmatmul.mubr.msk.f32.gmra.mxu1 %vm236_vm0, %v5806_v36  ;;  %5289 = vmatprep.subr.mxu1 %v6155_v9 }
 0x1bd   :  { %5290 = vmatpush3.msra.mxu1 %v6155_v9  ;;  %v782_v9 = vmul.f32 %v6540_v15, %v6355_v17  ;;  %v789_v17 = vmul.f32 %v6589_v10, %v6373_v42  ;;  %v32_v15 = vld [vmem:[#allocation2] sm:$0xff] }
 0x1be   :  { %5291 = vmatprep.subr.mxu1 %v6165_v12 }
 0x1bf   :  { %5292 = vmatpush3.msra.mxu1 %v6165_v12  ;;  %v783_v12 = vmul.f32 %v6528_v0, %v6353_v8  ;;  %v788_v8 = vmul.f32 %v6592_v45, %v6377_v46  ;;  %v34_v0 = vld [vmem:[#allocation2 + $0x10] sm:$0xff] }
 0x1c0   :  { %v5808_v32 = vpop.eup %5807  ;;  %5293 = vmatprep.subr.mxu1 %v6168_v13 }
 0x1c1   :  { %v5810_v1 = vpop.eup %5809  ;;  %5215 = vmatprep.mubr.msk.f32.mxu1 %vm236_vm0, %v5808_v32  ;;  %5294 = vmatpush3.msra.mxu1 %v6168_v13  ;;  %v784_v13 = vmul.f32 %v6562_v52, %v6363_v26  ;;  %v791_v26 = vmul.f32 %v5804_v51, %v6383_v54  ;;  %v794_v46 = vmul.f32 %v5808_v32, %v6400_v40  ;;  %v37_v40 = vld [vmem:[#allocation2 + $0x28] sm:$0xff] }
 0x1c2   :  { %5216 = vmatmul.mubr.msk.f32.gmra.mxu1 %vm236_vm0, %v5810_v1  ;;  %5295 = vmatprep.subr.mxu1 %v6179_v16  ;;  %v5812_v5 = vpop.eup %5811  ;;  %v795_v42 = vmul.f32 %v5810_v1, %v6397_v39  ;;  %v36_v39 = vld [vmem:[#allocation2 + $0x20] sm:$0xff] }
 0x1c3   :  { %5296 = vmatpush3.msra.mxu1 %v6179_v16  ;;  %v5814_v6 = vpop.eup %5813  ;;  %5218 = vmatprep.mubr.msk.f32.mxu1 %vm236_vm0, %v5812_v5  ;;  %v785_v16 = vmul.f32 %v6567_v61, %v6360_v22  ;;  %v790_v22 = vmul.f32 %v5802_v2, %v6389_v33  ;;  %v796_v33 = vmul.f32 %v5812_v5, %v6411_v23  ;;  %v35_v23 = vld [vmem:[#allocation2 + $0x18] sm:$0xff] }
 0x1c4   :  { %5297 = vmatprep.subr.mxu1 %v6189_v19  ;;  %v797_v54 = vmul.f32 %v5814_v6, %v6402_v44  ;;  %v33_v44 = vld [vmem:[#allocation2 + $0x8] sm:$0xff] }
 0x1c5   :  { %5298 = vmatpush3.msra.mxu1 %v6189_v19  ;;  %v786_v19 = vmul.f32 %v6582_v4, %v6368_v34  ;;  %v793_v34 = vmul.f32 %v5806_v36, %v6391_v38  ;;  %v38_v38 = vld [vmem:[#allocation2 + $0x30] sm:$0xff] }
 0x1c6   :  { %5219 = vmatmul.mubr.msk.f32.gmra.mxu1 %vm236_vm0, %v5814_v6  ;;  %5299 = vmatprep.subr.mxu1 %v6192_v20 }
 0x1c7   :  { %5221 = vmatprep.mubr.msk.f32.mxu1 %vm236_vm0, %v782_v9  ;;  %5300 = vmatpush3.msra.mxu1 %v6192_v20  ;;  %v787_v20 = vmul.f32 %v6579_v28, %v6366_v29  ;;  %v792_v29 = vmul.f32 %v5800_v48, %v6394_v57  ;;  %v39_v57 = vld [vmem:[#allocation2 + $0x38] sm:$0xff] }
 0x1c8   :  { %5245 = vmatprep.subr.mxu0 %v39_v57 }
 0x1c9   :  { %5246 = vmatpush3.msra.mxu0 %v39_v57 }
 0x1ca   :  { %5222 = vmatmul.mubr.msk.f32.gmra.mxu1 %vm236_vm0, %v783_v12  ;;  %5247 = vmatprep.subr.mxu0 %v38_v38 }
 0x1cb   :  { %5224 = vmatprep.mubr.msk.f32.mxu1 %vm236_vm0, %v784_v13  ;;  %5248 = vmatpush3.msra.mxu0 %v38_v38 }
 0x1cc   :  { %5249 = vmatprep.subr.mxu0 %v37_v40 }
 0x1cd   :  { %5250 = vmatpush3.msra.mxu0 %v37_v40  ;;  %v8284_v40 = vld [vmem:[#allocation9_spill] sm:$0xff] }
 0x1ce   :  { %5225 = vmatmul.mubr.msk.f32.gmra.mxu1 %vm236_vm0, %v785_v16  ;;  %5251 = vmatprep.subr.mxu0 %v36_v39 }
 0x1cf   :  { %5227 = vmatprep.mubr.msk.f32.mxu1 %vm236_vm0, %v786_v19  ;;  %5252 = vmatpush3.msra.mxu0 %v36_v39 }
 0x1d0   :  { %5253 = vmatprep.subr.mxu0 %v35_v23 }
 0x1d1   :  { %5254 = vmatpush3.msra.mxu0 %v35_v23 }
 0x1d2   :  { %5228 = vmatmul.mubr.msk.f32.gmra.mxu1 %vm236_vm0, %v787_v20  ;;  %5255 = vmatprep.subr.mxu0 %v34_v0 }
 0x1d3   :  { %5230 = vmatprep.mubr.msk.f32.mxu1 %vm236_vm0, %v788_v8  ;;  %5256 = vmatpush3.msra.mxu0 %v34_v0 }
 0x1d4   :  { %5257 = vmatprep.subr.mxu0 %v33_v44 }
 0x1d5   :  { %5258 = vmatpush3.msra.mxu0 %v33_v44  ;;  %v8285_v44 = vld [vmem:[#allocation8_spill] sm:$0xff] }
 0x1d6   :  { %5231 = vmatmul.mubr.msk.f32.gmra.mxu1 %vm236_vm0, %v789_v17  ;;  %5259 = vmatprep.subr.mxu0 %v32_v15 }
 0x1d7   :  { %5233 = vmatprep.mubr.msk.f32.mxu1 %vm236_vm0, %v790_v22  ;;  %5260 = vmatpush3.msra.mxu0 %v32_v15 }
 0x1da   :  { %5234 = vmatmul.mubr.msk.f32.gmra.mxu1 %vm236_vm0, %v791_v26 }
 0x1db   :  { %5236 = vmatprep.mubr.msk.f32.mxu1 %vm236_vm0, %v792_v29 }
 0x1de   :  { %5237 = vmatmul.mubr.msk.f32.gmra.mxu1 %vm236_vm0, %v793_v34 }
 0x1df   :  { %5239 = vmatprep.mubr.msk.f32.mxu1 %vm236_vm0, %v794_v46 }
 0x1e2   :  { %5240 = vmatmul.mubr.msk.f32.gmra.mxu1 %vm236_vm0, %v795_v42 }
 0x1e3   :  { %5242 = vmatprep.mubr.msk.f32.mxu1 %vm236_vm0, %v796_v33 }
 0x1e6   :  { %5243 = vmatmul.mubr.msk.f32.gmra.mxu1 %vm236_vm0, %v797_v54 }
 0x261   :  { %v5199_v52 = vpop.f32.mrf.mxu0 }
 0x262   :  { %v1120_v30 = vmul.f32 %v5199_v52, %v6227_v37 }
 0x263   :  { %v960_v61 = vpop.f32.mrf.mxu0 }
 0x264   :  { %v1119_v3 = vmul.f32 %v960_v61, %v6219_v31  ;;  %v1136_v55 = vadd.f32 %v1120_v30, %v6227_v37  ;;  %v8287_v30 = vld [vmem:[#allocation10_spill] sm:$0xff] }
 0x265   :  { %v5202_v10 = vpop.f32.mrf.mxu0 }
 0x266   :  { %v1122_v25 = vmul.f32 %v5202_v10, %v6234_v41  ;;  %v1135_v14 = vadd.f32 %v1119_v3, %v6219_v31  ;;  %v8286_v10 = vld [vmem:[#allocation11_spill] sm:$0xff] }
 0x267   :  { %v970_v21 = vpop.f32.mrf.mxu0 }
 0x268   :  { %v1121_v48 = vmul.f32 %v970_v21, %v6224_v35  ;;  %v1138_v36 = vadd.f32 %v1122_v25, %v6234_v41 }
 0x269   :  { %v5205_v18 = vpop.f32.mrf.mxu0 }
 0x26a   :  { %v1124_v37 = vmul.f32 %v5205_v18, %v6244_v47  ;;  %v1137_v13 = vadd.f32 %v1121_v48, %v6224_v35 }
 0x26b   :  { %v980_v56 = vpop.f32.mrf.mxu0 }
 0x26c   :  { %v1123_v1 = vmul.f32 %v980_v56, %v6237_v43  ;;  %v1140_v26 = vadd.f32 %v1124_v37, %v6244_v47 }
 0x26d   :  { %v5208_v24 = vpop.f32.mrf.mxu0 }
 0x26e   :  { %v1126_v16 = vmul.f32 %v5208_v24, %v6254_v53  ;;  %v1139_v35 = vadd.f32 %v1123_v1, %v6237_v43 }
 0x26f   :  { %v990_v5 = vpop.f32.mrf.mxu0 }
 0x270   :  { %v1125_v8 = vmul.f32 %v990_v5, %v6247_v49  ;;  %v1142_v38 = vadd.f32 %v1126_v16, %v6254_v53  ;;  %v8289_v5 = vld [vmem:[#allocation12_spill] sm:$0xff] }
 0x272   :  { %v1141_v43 = vadd.f32 %v1125_v8, %v6247_v49 }
 0x278   :  { %v5211_v28 = vpop.f32.mrf.mxu1 }
 0x279   :  { %v1128_v39 = vmul.f32 %v5211_v28, %v8284_v40 }
 0x27a   :  { %v1000_v4 = vpop.f32.mrf.mxu1 }
 0x27b   :  { %v1127_v15 = vmul.f32 %v1000_v4, %v8285_v44 }
 0x27c   :  { %v5214_v45 = vpop.f32.mrf.mxu1 }
 0x27d   :  { %v1130_v21 = vmul.f32 %v5214_v45, %v8286_v10 }
 0x27e   :  { %v6679_v7 = vpop.f32.mrf.mxu1 }
 0x27f   :  { %v1129_v3 = vmul.f32 %v6679_v7, %v8287_v30  ;;  %v8288_v7 = vld [vmem:[#allocation13_spill] sm:$0xff] }
 0x281   :  { %v1145_v1 = vadd.f32 %v1129_v3, %v8287_v30 }
 0x282   :  { %v6681_v63 = vpop.f32.mrf.mxu1 }
 0x283   :  { %v1132_v48 = vmul.f32 %v6681_v63, %v8288_v7 }
 0x284   :  { %v6683_v58 = vpop.f32.mrf.mxu1 }
 0x286   :  { %v6686_v62 = vpop.f32.mrf.mxu1 }
 0x288   :  { %v6689_v27 = vpop.f32.mrf.mxu1 }
 0x28a   :  { %v5223_v50 = vpop.f32.mrf.mxu1 }
 0x28b   :  { %v1152_v59 = vsub.f32 %v1136_v55, %v5223_v50  ;;  %v1144_v50 = vadd.f32 %v1128_v39, %v8284_v40 }
 0x28c   :  { %v1040_v60 = vpop.f32.mrf.mxu1 }
 0x28d   :  { %v6701_v2 = vadd.f32 %v6696_v11, %v1152_v59  ;;  %v1151_v51 = vsub.f32 %v1135_v14, %v1040_v60  ;;  %v1143_v14 = vadd.f32 %v1127_v15, %v8285_v44 }
 0x28e   :  { %v5226_v32 = vpop.f32.mrf.mxu1 }
 0x28f   :  { %v1204_v6 = vmin.f32 %v6701_v2, 0.0  ;;  %v6708_v9 = vadd.f32 %v6696_v11, %v1151_v51  ;;  %v1154_v31 = vsub.f32 %v1138_v36, %v5226_v32  ;;  %v1146_v36 = vadd.f32 %v1130_v21, %v8286_v10 }
 0x290   :  { %v1050_v12 = vpop.f32.mrf.mxu1  ;;  %vm1188_vm3 = vcmp.gt.f32.partialorder %v6701_v2, 0.0 }
 0x291   :  { %v1221_v19 = vmul.f32 1.442695, %v1204_v6  ;;  %v1203_v41 = vmin.f32 %v6708_v9, 0.0  ;;  %v6714_v20 = vadd.f32 %v6696_v11, %v1154_v31  ;;  %v1153_v17 = vsub.f32 %v1137_v13, %v1050_v12  ;;  %v8290_v31 = vld [vmem:[#allocation15_spill] sm:$0xff] }
 0x292   :  { %v5229_v22 = vpop.f32.mrf.mxu1  ;;  %v1131_v6 = vmul.f32 %v6683_v58, %v8289_v5  ;;  %v1134_v12 = vmul.f32 %v6686_v62, %v8290_v31  ;;  %v1148_v62 = vadd.f32 %v1132_v48, %v8288_v7  ;;  %vm1187_vm4 = vcmp.gt.f32.partialorder %v6708_v9, 0.0 }
 0x293   :  { %5815 = vpow2.f32 %v1221_v19  ;;  %v1219_v29 = vmul.f32 1.442695, %v1203_v41  ;;  %v1206_v34 = vmin.f32 %v6714_v20, 0.0  ;;  %v6721_v46 = vadd.f32 %v6696_v11, %v1153_v17  ;;  %v8291_v19 = vld [vmem:[#allocation14_spill] sm:$0xff] }
 0x294   :  { %v1156_v42 = vsub.f32 %v1140_v26, %v5229_v22  ;;  %v1060_v33 = vpop.f32.mrf.mxu1  ;;  %v1133_v41 = vmul.f32 %v6689_v27, %v8291_v19  ;;  %v1150_v40 = vadd.f32 %v1134_v12, %v8290_v31  ;;  %vm1190_vm5 = vcmp.gt.f32.partialorder %v6714_v20, 0.0 }
 0x295   :  { %5817 = vpow2.f32 %v1219_v29  ;;  %v1225_v54 = vmul.f32 1.442695, %v1206_v34  ;;  %v1155_v57 = vsub.f32 %v1139_v35, %v1060_v33  ;;  %v1205_v47 = vmin.f32 %v6721_v46, 0.0 }
 0x296   :  { %v6727_v23 = vadd.f32 %v6696_v11, %v1156_v42  ;;  %v5232_v0 = vpop.f32.mrf.mxu1  ;;  %vm1189_vm6 = vcmp.gt.f32.partialorder %v6721_v46, 0.0 }
 0x297   :  { %5819 = vpow2.f32 %v1225_v54  ;;  %v6732_v52 = vadd.f32 %v6696_v11, %v1155_v57  ;;  %v1158_v61 = vsub.f32 %v1142_v38, %v5232_v0  ;;  %v1223_v53 = vmul.f32 1.442695, %v1205_v47 }
 0x298   :  { %v1208_v28 = vmin.f32 %v6727_v23, 0.0  ;;  %v1070_v18 = vpop.f32.mrf.mxu1  ;;  %v1147_v38 = vadd.f32 %v1131_v6, %v8289_v5  ;;  %vm1192_vm7 = vcmp.gt.f32.partialorder %v6727_v23, 0.0 }
 0x299   :  { %v1207_v56 = vmin.f32 %v6732_v52, 0.0  ;;  %v6740_v49 = vadd.f32 %v6696_v11, %v1158_v61  ;;  %v1157_v4 = vsub.f32 %v1141_v43, %v1070_v18  ;;  %5821 = vpow2.f32 %v1223_v53 }
 0x29a   :  { %v1229_v25 = vmul.f32 1.442695, %v1208_v28  ;;  %v5235_v55 = vpop.f32.mrf.mxu1  ;;  %v6775_v43 = vadd.f32 %v1133_v41, %v8291_v19  ;;  %vm1191_vm8 = vcmp.gt.f32.partialorder %v6732_v52, 0.0 }
 0x29b   :  { %v1227_v24 = vmul.f32 1.442695, %v1207_v56  ;;  %v1210_v45 = vmin.f32 %v6740_v49, 0.0  ;;  %v6745_v59 = vadd.f32 %v6696_v11, %v1157_v4  ;;  %v1160_v60 = vsub.f32 %v1144_v50, %v5235_v55 }
 0x29c   :  { %5823 = vpow2.f32 %v1229_v25  ;;  %v1080_v51 = vpop.f32.mrf.mxu1  ;;  %vm1194_vm9 = vcmp.gt.f32.partialorder %v6740_v49, 0.0 }
 0x29d   :  { %5825 = vpow2.f32 %v1227_v24  ;;  %v1233_v37 = vmul.f32 1.442695, %v1210_v45  ;;  %v1209_v32 = vmin.f32 %v6745_v59, 0.0  ;;  %v6758_v13 = vadd.f32 %v6696_v11, %v1160_v60 }
 0x29e   :  { %v1159_v63 = vsub.f32 %v1143_v14, %v1080_v51  ;;  %v5238_v16 = vpop.f32.mrf.mxu1  ;;  %vm1193_vm10 = vcmp.gt.f32.partialorder %v6745_v59, 0.0 }
 0x29f   :  { %5827 = vpow2.f32 %v1233_v37  ;;  %v1231_v8 = vmul.f32 1.442695, %v1209_v32  ;;  %v1162_v17 = vsub.f32 %v1146_v36, %v5238_v16  ;;  %v1212_v26 = vmin.f32 %v6758_v13, 0.0 }
 0x2a0   :  { %v5816_v22 = vpop.eup %5815  ;;  %v6764_v29 = vadd.f32 %v6696_v11, %v1159_v63  ;;  %v1090_v58 = vpop.f32.mrf.mxu1  ;;  %vm1196_vm11 = vcmp.gt.f32.partialorder %v6758_v13, 0.0 }
 0x2a1   :  { %v4509_v34 = vadd.f32 -1.0, %v5816_v22  ;;  %5829 = vpow2.f32 %v1231_v8  ;;  %v6768_v35 = vadd.f32 %v6696_v11, %v1162_v17  ;;  %v1161_v42 = vsub.f32 %v1145_v1, %v1090_v58 }
 0x2a2   :  { %v5818_v33 = vpop.eup %5817  ;;  %v1237_v27 = vmul.f32 1.442695, %v1212_v26  ;;  %v1211_v54 = vmin.f32 %v6764_v29, 0.0  ;;  %v5241_v57 = vpop.f32.mrf.mxu1  ;;  %vm1195_vm12 = vcmp.gt.f32.partialorder %v6764_v29, 0.0 }
 0x2a3   :  { %v1268_v39 = vmul.f32 1.6732632, %v4509_v34  ;;  %v4508_v47 = vadd.f32 -1.0, %v5818_v33  ;;  %v1214_v0 = vmin.f32 %v6768_v35, 0.0  ;;  %v6778_v61 = vadd.f32 %v6696_v11, %v1161_v42 }
 0x2a4   :  { %v5820_v44 = vpop.eup %5819  ;;  %5831 = vpow2.f32 %v1237_v27  ;;  %v1235_v15 = vmul.f32 1.442695, %v1211_v54  ;;  %v1164_v10 = vsub.f32 %v1148_v62, %v5241_v57  ;;  %v1100_v21 = vpop.f32.mrf.mxu1  ;;  %vm1198_vm13 = vcmp.gt.f32.partialorder %v6768_v35, 0.0 }
 0x2a5   :  { %v1267_v53 = vmul.f32 1.6732632, %v4508_v47  ;;  %v4511_v28 = vadd.f32 -1.0, %v5820_v44  ;;  %v1241_v18 = vmul.f32 1.442695, %v1214_v0  ;;  %v1284_v30 = vsel %vm1188_vm3, %v6701_v2, %v1268_v39 }
 0x2a6   :  { %5833 = vpow2.f32 %v1235_v15  ;;  %v1213_v3 = vmin.f32 %v6778_v61, 0.0  ;;  %v5244_v56 = vpop.f32.mrf.mxu1  ;;  %v5822_v4 = vpop.eup %5821  ;;  %v6786_v50 = vadd.f32 %v6696_v11, %v1164_v10  ;;  %v1163_v7 = vsub.f32 %v1147_v38, %v1100_v21 }
 0x2a7   :  { %v1283_v25 = vsel %vm1187_vm4, %v6708_v9, %v1267_v53  ;;  %v1270_v55 = vmul.f32 1.6732632, %v4511_v28  ;;  %5835 = vpow2.f32 %v1241_v18  ;;  %v4510_v45 = vadd.f32 -1.0, %v5822_v4 }
 0x2a8   :  { %v1299_v24 = vmul.f32 1.050701, %v1283_v25  ;;  %v1239_v14 = vmul.f32 1.442695, %v1213_v3  ;;  %v1300_v2 = vmul.f32 1.050701, %v1284_v30  ;;  %v1166_v51 = vsub.f32 %v1150_v40, %v5244_v56  ;;  %v1110_v36 = vpop.f32.mrf.mxu1 }
 0x2a9   :  { %v5824_v48 = vpop.eup %5823  ;;  %v1216_v60 = vmin.f32 %v6786_v50, 0.0  ;;  %v1269_v9 = vmul.f32 1.6732632, %v4510_v45  ;;  %v1286_v1 = vsel %vm1190_vm5, %v6714_v20, %v1270_v55  ;;  %v6794_v31 = vadd.f32 %v6696_v11, %v1163_v7 }
 0x2aa   :  { %v5826_v37 = vpop.eup %5825  ;;  %v4513_v32 = vadd.f32 -1.0, %v5824_v48  ;;  %5837 = vpow2.f32 %v1239_v14  ;;  %5261 = vmatprep.mubr.msk.f32.mxu0 %vm236_vm0, %v1299_v24  ;;  %v6799_v19 = vadd.f32 %v6696_v11, %v1166_v51  ;;  %v1165_v41 = vsub.f32 %v6775_v43, %v1110_v36 }
 0x2ab   :  { %v4512_v5 = vadd.f32 -1.0, %v5826_v37  ;;  %v1245_v6 = vmul.f32 1.442695, %v1216_v60  ;;  %5262 = vmatmul.mubr.msk.f32.vlgmr.msra.gmra.mxu0 %vm236_vm0, %v1300_v2  ;;  %v1285_v63 = vsel %vm1189_vm6, %v6721_v46, %v1269_v9  ;;  %v1302_v26 = vmul.f32 1.050701, %v1286_v1 }
 0x2ac   :  { %v5828_v12 = vpop.eup %5827  ;;  %v1272_v16 = vmul.f32 1.6732632, %v4513_v32  ;;  %v1301_v8 = vmul.f32 1.050701, %v1285_v63  ;;  %v1215_v58 = vmin.f32 %v6794_v31, 0.0  ;;  %v1218_v54 = vmin.f32 %v6799_v19, 0.0 }
 0x2ad   :  { %v1271_v17 = vmul.f32 1.6732632, %v4512_v5  ;;  %v4515_v22 = vadd.f32 -1.0, %v5828_v12  ;;  %5839 = vpow2.f32 %v1245_v6  ;;  %v6810_v57 = vadd.f32 %v6696_v11, %v1165_v41 }
 0x2ae   :  { %v5830_v20 = vpop.eup %5829  ;;  %v1288_v46 = vsel %vm1192_vm7, %v6727_v23, %v1272_v16  ;;  %5264 = vmatprep.mubr.msk.f32.mxu0 %vm236_vm0, %v1301_v8  ;;  %v1243_v27 = vmul.f32 1.442695, %v1215_v58  ;;  %v1249_v39 = vmul.f32 1.442695, %v1218_v54  ;;  %vm1197_vm14 = vcmp.gt.f32.partialorder %v6778_v61, 0.0 }
 0x2af   :  { %v1287_v62 = vsel %vm1191_vm8, %v6732_v52, %v1271_v17  ;;  %v1274_v34 = vmul.f32 1.6732632, %v4515_v22  ;;  %v4514_v42 = vadd.f32 -1.0, %v5830_v20  ;;  %5265 = vmatmul.mubr.msk.f32.gmra.mxu0 %vm236_vm0, %v1302_v26  ;;  %v1304_v52 = vmul.f32 1.050701, %v1288_v46 }
 0x2b0   :  { %v1303_v33 = vmul.f32 1.050701, %v1287_v62  ;;  %5841 = vpow2.f32 %v1243_v27  ;;  %v1217_v43 = vmin.f32 %v6810_v57, 0.0  ;;  %vm1200_vm15 = vcmp.gt.f32.partialorder %v6786_v50, 0.0  ;;  %v4524_v17 = vld [vmem:[%s8250_s1 + $0x2] ss:$0 sm:$0xff] }
 0x2b1   :  { %v5832_v38 = vpop.eup %5831  ;;  %v1273_v23 = vmul.f32 1.6732632, %v4514_v42  ;;  %v1290_v0 = vsel %vm1194_vm9, %v6740_v49, %v1274_v34  ;;  %5843 = vpow2.f32 %v1249_v39  ;;  %vm1199_vm1 = vcmp.gt.f32.partialorder %v6794_v31, 0.0 }
 0x2b2   :  { %v4517_v40 = vadd.f32 -1.0, %v5832_v38  ;;  %5267 = vmatprep.mubr.msk.f32.mxu0 %vm236_vm0, %v1303_v33  ;;  %v1247_v28 = vmul.f32 1.442695, %v1217_v43  ;;  %v1306_v18 = vmul.f32 1.050701, %v1290_v0  ;;  %vm1202_vm2 = vcmp.gt.f32.partialorder %v6799_v19, 0.0 }
 0x2b3   :  { %v5834_v47 = vpop.eup %5833  ;;  %v1289_v11 = vsel %vm1193_vm10, %v6745_v59, %v1273_v23  ;;  %5268 = vmatmul.mubr.msk.f32.gmra.mxu0 %vm236_vm0, %v1304_v52  ;;  %vm1201_vm3 = vcmp.gt.f32.partialorder %v6810_v57, 0.0 }
 0x2b4   :  { %v5836_v44 = vpop.eup %5835  ;;  %v1305_v15 = vmul.f32 1.050701, %v1289_v11  ;;  %v1276_v10 = vmul.f32 1.6732632, %v4517_v40  ;;  %v4516_v21 = vadd.f32 -1.0, %v5834_v47  ;;  %5845 = vpow2.f32 %v1247_v28 }
 0x2b5   :  { %v4519_v53 = vadd.f32 -1.0, %v5836_v44 }
 0x2b6   :  { %v1275_v30 = vmul.f32 1.6732632, %v4516_v21  ;;  %5270 = vmatprep.mubr.msk.f32.mxu0 %vm236_vm0, %v1305_v15  ;;  %v1292_v59 = vsel %vm1196_vm11, %v6758_v13, %v1276_v10 }
 0x2b7   :  { %v5838_v49 = vpop.eup %5837  ;;  %v1278_v3 = vmul.f32 1.6732632, %v4519_v53  ;;  %5271 = vmatmul.mubr.msk.f32.gmra.mxu0 %vm236_vm0, %v1306_v18  ;;  %v1308_v24 = vmul.f32 1.050701, %v1292_v59 }
 0x2b8   :  { %v1291_v56 = vsel %vm1195_vm12, %v6764_v29, %v1275_v30  ;;  %v4518_v4 = vadd.f32 -1.0, %v5838_v49 }
 0x2b9   :  { %v1307_v25 = vmul.f32 1.050701, %v1291_v56  ;;  %v1294_v14 = vsel %vm1198_vm13, %v6768_v35, %v1278_v3 }
 0x2ba   :  { %v5840_v55 = vpop.eup %5839  ;;  %v1277_v45 = vmul.f32 1.6732632, %v4518_v4  ;;  %v1310_v48 = vmul.f32 1.050701, %v1294_v14 }
 0x2bb   :  { %v4521_v13 = vadd.f32 -1.0, %v5840_v55  ;;  %5273 = vmatprep.mubr.msk.f32.mxu0 %vm236_vm0, %v1307_v25 }
 0x2bc   :  { %v1293_v7 = vsel %vm1197_vm14, %v6778_v61, %v1277_v45  ;;  %5274 = vmatmul.mubr.msk.f32.gmra.mxu0 %vm236_vm0, %v1308_v24 }
 0x2bd   :  { %v1309_v29 = vmul.f32 1.050701, %v1293_v7  ;;  %v5842_v2 = vpop.eup %5841  ;;  %v1280_v60 = vmul.f32 1.6732632, %v4521_v13 }
 0x2be   :  { %v4520_v51 = vadd.f32 -1.0, %v5842_v2  ;;  %v5844_v36 = vpop.eup %5843 }
 0x2bf   :  { %5276 = vmatprep.mubr.msk.f32.mxu0 %vm236_vm0, %v1309_v29  ;;  %v4523_v37 = vadd.f32 -1.0, %v5844_v36  ;;  %v1296_v9 = vsel %vm1200_vm15, %v6786_v50, %v1280_v60  ;;  %v1520_v36 = vld [vmem:[#allocation2 + $0x178] sm:$0xff] }
 0x2c0   :  { %5277 = vmatmul.mubr.msk.f32.gmra.mxu0 %vm236_vm0, %v1310_v48  ;;  %v1279_v35 = vmul.f32 1.6732632, %v4520_v51  ;;  %v1312_v12 = vmul.f32 1.050701, %v1296_v9  ;;  %5349 = vmatprep.subr.mxu0 %v1520_v36  ;;  %v1517_v9 = vld [vmem:[#allocation2 + $0x160] sm:$0xff] }
 0x2c1   :  { %v5846_v61 = vpop.eup %5845  ;;  %v1282_v1 = vmul.f32 1.6732632, %v4523_v37  ;;  %5350 = vmatpush3.msra.mxu0 %v1520_v36  ;;  %v1518_v37 = vld [vmem:[#allocation2 + $0x168] sm:$0xff] }
 0x2c2   :  { %v1295_v32 = vsel %vm1199_vm1, %v6794_v31, %v1279_v35  ;;  %v4522_v6 = vadd.f32 -1.0, %v5846_v61  ;;  %v1519_v35 = vld [vmem:[#allocation2 + $0x170] sm:$0xff]  ;;  %v1516_v61 = vld [vmem:[#allocation2 + $0x158] sm:$0xff] }
 0x2c3   :  { %v1311_v5 = vmul.f32 1.050701, %v1295_v32  ;;  %v1298_v16 = vsel %vm1202_vm2, %v6799_v19, %v1282_v1  ;;  %5351 = vmatprep.subr.mxu0 %v1519_v35  ;;  %v1515_v32 = vld [vmem:[#allocation2 + $0x150] sm:$0xff]  ;;  %v1514_v1 = vld [vmem:[#allocation2 + $0x148] sm:$0xff] }
 0x2c4   :  { %v1281_v63 = vmul.f32 1.6732632, %v4522_v6  ;;  %v1314_v8 = vmul.f32 1.050701, %v1298_v16  ;;  %5352 = vmatpush3.msra.mxu0 %v1519_v35  ;;  %v6961_v6 = vld [vmem:[#allocation2 + $0xf8] sm:$0xff] }
 0x2c5   :  { %5279 = vmatprep.mubr.msk.f32.mxu0 %vm236_vm0, %v1311_v5  ;;  %5353 = vmatprep.subr.mxu0 %v1518_v37  ;;  %v1513_v5 = vld [vmem:[#allocation2 + $0x140] sm:$0xff] }
 0x2c6   :  { %5280 = vmatmul.mubr.msk.f32.gmra.mxu0 %vm236_vm0, %v1312_v12  ;;  %v1297_v50 = vsel %vm1201_vm3, %v6810_v57, %v1281_v63 }
 0x2c7   :  { %v1313_v41 = vmul.f32 1.050701, %v1297_v50  ;;  %5354 = vmatpush3.msra.mxu0 %v1518_v37 }
 0x2c8   :  { %5355 = vmatprep.subr.mxu0 %v1517_v9 }
 0x2c9   :  { %5282 = vmatprep.mubr.msk.f32.mxu0 %vm236_vm0, %v1313_v41  ;;  %5356 = vmatpush3.msra.mxu0 %v1517_v9 }
 0x2ca   :  { %5283 = vmatmul.mubr.msk.f32.gmra.mxu0 %vm236_vm0, %v1314_v8  ;;  %5357 = vmatprep.subr.mxu0 %v1516_v61 }
 0x2cb   :  { %5358 = vmatpush3.msra.mxu0 %v1516_v61 }
 0x2cc   :  { %5359 = vmatprep.subr.mxu0 %v1515_v32 }
 0x2cd   :  { %5360 = vmatpush3.msra.mxu0 %v1515_v32 }
 0x2ce   :  { %5361 = vmatprep.subr.mxu0 %v1514_v1 }
 0x2cf   :  { %5362 = vmatpush3.msra.mxu0 %v1514_v1 }
 0x2d0   :  { %5363 = vmatprep.subr.mxu0 %v1513_v5 }
 0x2d1   :  { %5364 = vmatpush3.msra.mxu0 %v1513_v5 }
 0x2d2   :  { %5453 = vmatprep.subr.mxu0 %v6961_v6 }
 0x36b   :  { %v5263_v31 = vpop.f32.mrf.mxu0 }
 0x36c   :  { %v6851_v19 = vadd.f32 %v5263_v31, %v4524_v17 }
 0x36d   :  { %v1433_v22 = vpop.f32.mrf.mxu0 }
 0x36e   :  { %v6849_v20 = vadd.f32 %v4524_v17, %v1433_v22  ;;  %v1523_v3 = vmul.f32 %v6851_v19, %v6851_v19 }
 0x36f   :  { %v5266_v26 = vpop.f32.mrf.mxu0 }
 0x370   :  { %5301 = vmatprep.mubr.msk.f32.mxu1 %vm236_vm0, %v6849_v20  ;;  %v6859_v62 = vadd.f32 %v5266_v26, %v4524_v17  ;;  %v1522_v59 = vmul.f32 %v6849_v20, %v6849_v20 }
 0x371   :  { %5302 = vmatmul.mubr.msk.f32.vlgmr.msra.gmra.mxu1 %vm236_vm0, %v6851_v19  ;;  %v1443_v58 = vpop.f32.mrf.mxu0 }
 0x372   :  { %v6857_v46 = vadd.f32 %v4524_v17, %v1443_v58  ;;  %v1525_v4 = vmul.f32 %v6859_v62, %v6859_v62 }
 0x373   :  { %v5269_v34 = vpop.f32.mrf.mxu0 }
 0x374   :  { %5304 = vmatprep.mubr.msk.f32.mxu1 %vm236_vm0, %v6857_v46  ;;  %v6867_v27 = vadd.f32 %v5269_v34, %v4524_v17  ;;  %v1524_v56 = vmul.f32 %v6857_v46, %v6857_v46 }
 0x375   :  { %v1453_v42 = vpop.f32.mrf.mxu0  ;;  %5305 = vmatmul.mubr.msk.f32.gmra.mxu1 %vm236_vm0, %v6859_v62 }
 0x376   :  { %v6865_v33 = vadd.f32 %v4524_v17, %v1453_v42  ;;  %v1527_v55 = vmul.f32 %v6867_v27, %v6867_v27 }
 0x377   :  { %v5272_v54 = vpop.f32.mrf.mxu0 }
 0x378   :  { %5307 = vmatprep.mubr.msk.f32.mxu1 %vm236_vm0, %v6865_v33  ;;  %v6875_v23 = vadd.f32 %v5272_v54, %v4524_v17  ;;  %v1526_v25 = vmul.f32 %v6865_v33, %v6865_v33 }
 0x379   :  { %v1463_v57 = vpop.f32.mrf.mxu0  ;;  %5308 = vmatmul.mubr.msk.f32.gmra.mxu1 %vm236_vm0, %v6867_v27 }
 0x37a   :  { %v6873_v38 = vadd.f32 %v4524_v17, %v1463_v57  ;;  %v1529_v45 = vmul.f32 %v6875_v23, %v6875_v23 }
 0x37c   :  { %v5275_v52 = vpop.f32.mrf.mxu0  ;;  %5310 = vmatprep.mubr.msk.f32.mxu1 %vm236_vm0, %v6873_v38  ;;  %v1528_v24 = vmul.f32 %v6873_v38, %v6873_v38 }
 0x37d   :  { %5311 = vmatmul.mubr.msk.f32.gmra.mxu1 %vm236_vm0, %v6875_v23  ;;  %v6883_v47 = vadd.f32 %v5275_v52, %v4524_v17 }
 0x37e   :  { %v1473_v40 = vpop.f32.mrf.mxu0 }
 0x37f   :  { %v6881_v39 = vadd.f32 %v4524_v17, %v1473_v40  ;;  %v1531_v13 = vmul.f32 %v6883_v47, %v6883_v47 }
 0x380   :  { %v5278_v0 = vpop.f32.mrf.mxu0 }
 0x381   :  { %5313 = vmatprep.mubr.msk.f32.mxu1 %vm236_vm0, %v6881_v39  ;;  %v6891_v44 = vadd.f32 %v5278_v0, %v4524_v17  ;;  %v1530_v14 = vmul.f32 %v6881_v39, %v6881_v39 }
 0x382   :  { %v1483_v11 = vpop.f32.mrf.mxu0  ;;  %5314 = vmatmul.mubr.msk.f32.gmra.mxu1 %vm236_vm0, %v6883_v47 }
 0x383   :  { %v6889_v43 = vadd.f32 %v4524_v17, %v1483_v11  ;;  %v1533_v29 = vmul.f32 %v6891_v44, %v6891_v44 }
 0x385   :  { %5316 = vmatprep.mubr.msk.f32.mxu1 %vm236_vm0, %v6889_v43  ;;  %v1532_v7 = vmul.f32 %v6889_v43, %v6889_v43 }
 0x386   :  { %5317 = vmatmul.mubr.msk.f32.gmra.mxu1 %vm236_vm0, %v6891_v44  ;;  %v5281_v15 = vpop.f32.mrf.mxu0 }
 0x387   :  { %v6899_v53 = vadd.f32 %v5281_v15, %v4524_v17 }
 0x388   :  { %v1493_v10 = vpop.f32.mrf.mxu0 }
 0x389   :  { %v6897_v21 = vadd.f32 %v4524_v17, %v1493_v10  ;;  %v1535_v2 = vmul.f32 %v6899_v53, %v6899_v53 }
 0x38a   :  { %v5284_v28 = vpop.f32.mrf.mxu0 }
 0x38b   :  { %5319 = vmatprep.mubr.msk.f32.mxu1 %vm236_vm0, %v6897_v21  ;;  %v6907_v49 = vadd.f32 %v5284_v28, %v4524_v17  ;;  %v1534_v48 = vmul.f32 %v6897_v21, %v6897_v21 }
 0x38c   :  { %5320 = vmatmul.mubr.msk.f32.gmra.mxu1 %vm236_vm0, %v6899_v53  ;;  %v1503_v18 = vpop.f32.mrf.mxu0 }
 0x38d   :  { %v6905_v30 = vadd.f32 %v4524_v17, %v1503_v18  ;;  %8293 = vst [vmem:[#allocation8_spill] sm:$0xff] %v6907_v49  ;;  %v1537_v51 = vmul.f32 %v6907_v49, %v6907_v49 }
 0x38f   :  { %8292 = vst [vmem:[#allocation9_spill] sm:$0xff] %v6905_v30  ;;  %5322 = vmatprep.mubr.msk.f32.mxu1 %vm236_vm0, %v6905_v30  ;;  %v1536_v60 = vmul.f32 %v6905_v30, %v6905_v30 }
 0x390   :  { %5323 = vmatmul.mubr.msk.f32.gmra.mxu1 %vm236_vm0, %v6907_v49 }
 0x391   :  { %5325 = vmatprep.mubr.msk.f32.mxu1 %vm236_vm0, %v1522_v59 }
 0x394   :  { %5326 = vmatmul.mubr.msk.f32.gmra.mxu1 %vm236_vm0, %v1523_v3 }
 0x395   :  { %5328 = vmatprep.mubr.msk.f32.mxu1 %vm236_vm0, %v1524_v56 }
 0x398   :  { %5329 = vmatmul.mubr.msk.f32.gmra.mxu1 %vm236_vm0, %v1525_v4 }
 0x399   :  { %5331 = vmatprep.mubr.msk.f32.mxu1 %vm236_vm0, %v1526_v25 }
 0x39c   :  { %5332 = vmatmul.mubr.msk.f32.gmra.mxu1 %vm236_vm0, %v1527_v55 }
 0x39d   :  { %5334 = vmatprep.mubr.msk.f32.mxu1 %vm236_vm0, %v1528_v24 }
 0x3a0   :  { %5335 = vmatmul.mubr.msk.f32.gmra.mxu1 %vm236_vm0, %v1529_v45 }
 0x3a1   :  { %5337 = vmatprep.mubr.msk.f32.mxu1 %vm236_vm0, %v1530_v14 }
 0x3a4   :  { %5338 = vmatmul.mubr.msk.f32.gmra.mxu1 %vm236_vm0, %v1531_v13 }
 0x3a5   :  { %5340 = vmatprep.mubr.msk.f32.mxu1 %vm236_vm0, %v1532_v7 }
 0x3a8   :  { %5341 = vmatmul.mubr.msk.f32.gmra.mxu1 %vm236_vm0, %v1533_v29 }
 0x3a9   :  { %5343 = vmatprep.mubr.msk.f32.mxu1 %vm236_vm0, %v1534_v48 }
 0x3ac   :  { %5344 = vmatmul.mubr.msk.f32.gmra.mxu1 %vm236_vm0, %v1535_v2 }
 0x3ad   :  { %5346 = vmatprep.mubr.msk.f32.mxu1 %vm236_vm0, %v1536_v60 }
 0x3b0   :  { %5347 = vmatmul.mubr.msk.f32.gmra.mxu1 %vm236_vm0, %v1537_v51 }
 0x431   :  { %v5303_v12 = vpop.f32.mrf.mxu1 }
 0x432   :  { %v6970_v57 = vmul.f32 0.0625, %v5303_v12 }
 0x433   :  { %v1700_v63 = vpop.f32.mrf.mxu1 }
 0x434   :  { %v6974_v40 = vmul.f32 0.0625, %v1700_v63  ;;  %v1876_v11 = vmul.f32 %v5303_v12, %v6970_v57 }
 0x435   :  { %v5306_v16 = vpop.f32.mrf.mxu1 }
 0x436   :  { %v6979_v15 = vmul.f32 0.0625, %v5306_v16  ;;  %v1875_v28 = vmul.f32 %v6974_v40, %v1700_v63 }
 0x437   :  { %v1710_v50 = vpop.f32.mrf.mxu1 }
 0x438   :  { %v6982_v59 = vmul.f32 0.0625, %v1710_v50  ;;  %v1878_v56 = vmul.f32 %v5306_v16, %v6979_v15 }
 0x439   :  { %v5309_v41 = vpop.f32.mrf.mxu1 }
 0x43a   :  { %v6985_v4 = vmul.f32 0.0625, %v5309_v41  ;;  %v1877_v29 = vmul.f32 %v6982_v59, %v1710_v50 }
 0x43b   :  { %v1720_v8 = vpop.f32.mrf.mxu1 }
 0x43c   :  { %v6987_v45 = vmul.f32 0.0625, %v1720_v8  ;;  %v1880_v60 = vmul.f32 %v5309_v41, %v6985_v4 }
 0x43d   :  { %v5312_v31 = vpop.f32.mrf.mxu1 }
 0x43e   :  { %v6992_v48 = vmul.f32 0.0625, %v5312_v31  ;;  %v1879_v61 = vmul.f32 %v6987_v45, %v1720_v8 }
 0x43f   :  { %v1730_v17 = vpop.f32.mrf.mxu1 }
 0x440   :  { %v6996_v51 = vmul.f32 0.0625, %v1730_v17  ;;  %v1882_v1 = vmul.f32 %v5312_v31, %v6992_v48 }
 0x442   :  { %v5315_v22 = vpop.f32.mrf.mxu1  ;;  %v1881_v41 = vmul.f32 %v6996_v51, %v1730_v17 }
 0x444   :  { %v1740_v26 = vpop.f32.mrf.mxu1 }
 0x446   :  { %v5318_v58 = vpop.f32.mrf.mxu1 }
 0x448   :  { %v6964_v34 = vpop.f32.mrf.mxu1 }
 0x44c   :  { %v6966_v42 = vpop.f32.mrf.mxu1 }
 0x44d   :  { %v7016_v31 = vmul.f32 0.0625, %v6966_v42 }
 0x44e   :  { %v6968_v54 = vpop.f32.mrf.mxu1 }
 0x450   :  { %v6972_v52 = vpop.f32.mrf.mxu1 }
 0x452   :  { %v6976_v0 = vpop.f32.mrf.mxu1 }
 0x454   :  { %v5327_v10 = vpop.f32.mrf.mxu1 }
 0x455   :  { %v1892_v18 = vsub.f32 %v5327_v10, %v1876_v11  ;;  %v7006_v11 = vmul.f32 0.0625, %v5315_v22  ;;  %v7008_v10 = vmul.f32 0.0625, %v1740_v26 }
 0x456   :  { %v1780_v3 = vpop.f32.mrf.mxu1 }
 0x457   :  { %v1908_v25 = vmul.f32 0.06666667, %v1892_v18  ;;  %v1891_v55 = vsub.f32 %v1780_v3, %v1875_v28  ;;  %v7010_v28 = vmul.f32 0.0625, %v5318_v58  ;;  %v7013_v18 = vmul.f32 0.0625, %v6964_v34 }
 0x458   :  { %v5330_v24 = vpop.f32.mrf.mxu1  ;;  %v7019_v3 = vmul.f32 0.0625, %v6968_v54 }
 0x459   :  { %v6989_v14 = vmax.f32 %v1908_v25, 0.0  ;;  %v1907_v13 = vmul.f32 0.06666667, %v1891_v55  ;;  %v1894_v7 = vsub.f32 %v5330_v24, %v1878_v56 }
 0x45a   :  { %v1790_v2 = vpop.f32.mrf.mxu1 }
 0x45b   :  { %5847 = vrsqrt.f32 %v6989_v14  ;;  %v6998_v36 = vmax.f32 %v1907_v13, 0.0  ;;  %v1910_v35 = vmul.f32 0.06666667, %v1894_v7  ;;  %v1893_v37 = vsub.f32 %v1790_v2, %v1877_v29 }
 0x45c   :  { %v5333_v9 = vpop.f32.mrf.mxu1  ;;  %v7027_v13 = vmul.f32 0.0625, %v6972_v52  ;;  %v7030_v7 = vmul.f32 0.0625, %v6976_v0  ;;  %v1884_v2 = vmul.f32 %v5315_v22, %v7006_v11  ;;  %vm1948_vm4 = vcmp.eq.f32.partialorder %v6989_v14, inf }
 0x45d   :  { %v1896_v32 = vsub.f32 %v5333_v9, %v1880_v60  ;;  %5849 = vrsqrt.f32 %v6998_v36  ;;  %v7003_v12 = vmax.f32 %v1910_v35, 0.0  ;;  %v1909_v63 = vmul.f32 0.06666667, %v1893_v37 }
 0x45e   :  { %v1800_v5 = vpop.f32.mrf.mxu1  ;;  %v1883_v60 = vmul.f32 %v7008_v10, %v1740_v26  ;;  %v1886_v35 = vmul.f32 %v5318_v58, %v7010_v28  ;;  %v7038_v9 = vmul.f32 %v7013_v18, %v6964_v34  ;;  %v7053_v34 = vmul.f32 %v6972_v52, %v7027_v13 }
 0x45f   :  { %v1912_v16 = vmul.f32 0.06666667, %v1896_v32  ;;  %v1895_v50 = vsub.f32 %v1800_v5, %v1879_v61  ;;  %5851 = vrsqrt.f32 %v7003_v12  ;;  %v7022_v56 = vmax.f32 %v1909_v63, 0.0 }
 0x460   :  { %v5336_v8 = vpop.f32.mrf.mxu1  ;;  %v7042_v61 = vmul.f32 %v6966_v42, %v7016_v31  ;;  %v7046_v32 = vmul.f32 %v7019_v3, %v6968_v54  ;;  %v7057_v42 = vmul.f32 %v7030_v7, %v6976_v0  ;;  %vm1950_vm5 = vcmp.eq.f32.partialorder %v6989_v14, 0.0 }
 0x461   :  { %v7024_v17 = vmax.f32 %v1912_v16, 0.0  ;;  %v1911_v25 = vmul.f32 0.06666667, %v1895_v50  ;;  %v1898_v55 = vsub.f32 %v5336_v8, %v1882_v1  ;;  %5853 = vrsqrt.f32 %v7022_v56 }
 0x462   :  { %v1810_v24 = vpop.f32.mrf.mxu1  ;;  %v1951_v16 = vand.u32 2147483648, %v6989_v14  ;;  %vm1941_vm6 = vcmp.eq.f32.partialorder %v6998_v36, inf  ;;  %vm1943_vm7 = vcmp.eq.f32.partialorder %v6998_v36, 0.0  ;;  %v1944_v8 = vand.u32 2147483648, %v6998_v36 }
 0x463   :  { %v1897_v29 = vsub.f32 %v1810_v24, %v1881_v41  ;;  %5855 = vrsqrt.f32 %v7024_v17  ;;  %v7049_v22 = vmax.f32 %v1911_v25, 0.0  ;;  %v1914_v26 = vmul.f32 0.06666667, %v1898_v55 }
 0x464   :  { %v5339_v37 = vpop.f32.mrf.mxu1  ;;  %vm1962_vm8 = vcmp.eq.f32.partialorder %v7003_v12, inf  ;;  %vm1964_vm9 = vcmp.eq.f32.partialorder %v7003_v12, 0.0  ;;  %vm1955_vm10 = vcmp.eq.f32.partialorder %v7022_v56, inf  ;;  %vm1957_vm11 = vcmp.eq.f32.partialorder %v7022_v56, 0.0 }
 0x465   :  { %v1913_v58 = vmul.f32 0.06666667, %v1897_v29  ;;  %v1900_v1 = vsub.f32 %v5339_v37, %v1884_v2  ;;  %5857 = vrsqrt.f32 %v7049_v22  ;;  %v7066_v41 = vmax.f32 %v1914_v26, 0.0 }
 0x466   :  { %v1820_v5 = vpop.f32.mrf.mxu1  ;;  %vm1976_vm12 = vcmp.eq.f32.partialorder %v7024_v17, inf  ;;  %vm1978_vm13 = vcmp.eq.f32.partialorder %v7024_v17, 0.0  ;;  %v1979_v30 = vand.u32 2147483648, %v7024_v17  ;;  %vm1969_vm14 = vcmp.eq.f32.partialorder %v7049_v22, inf }
 0x467   :  { %v1899_v54 = vsub.f32 %v1820_v5, %v1883_v60  ;;  %v7068_v0 = vmax.f32 %v1913_v58, 0.0  ;;  %v1916_v25 = vmul.f32 0.06666667, %v1900_v1  ;;  %5859 = vrsqrt.f32 %v7066_v41 }
 0x468   :  { %v5848_v63 = vpop.eup %5847  ;;  %v5342_v50 = vpop.f32.mrf.mxu1  ;;  %v1965_v58 = vand.u32 2147483648, %v7003_v12  ;;  %v1958_v1 = vand.u32 2147483648, %v7022_v56  ;;  %vm1971_vm15 = vcmp.eq.f32.partialorder %v7049_v22, 0.0  ;;  %vm1990_vm1 = vcmp.eq.f32.partialorder %v7066_v41, inf }
 0x469   :  { %v1947_v52 = vmul.f32 %v5848_v63, %v6989_v14  ;;  %v1915_v55 = vmul.f32 0.06666667, %v1899_v54  ;;  %v1902_v60 = vsub.f32 %v5342_v50, %v1886_v35  ;;  %5861 = vrsqrt.f32 %v7068_v0 }
 0x46a   :  { %v1830_v24 = vpop.f32.mrf.mxu1  ;;  %v5850_v29 = vpop.eup %5849  ;;  %v7090_v35 = vmax.f32 %v1916_v25, 0.0  ;;  %vm1992_vm2 = vcmp.eq.f32.partialorder %v7066_v41, 0.0  ;;  %vm1983_vm3 = vcmp.eq.f32.partialorder %v7068_v0, inf }
 0x46b   :  { %v1949_v2 = vsel %vm1948_vm4, %v6989_v14, %v1947_v52  ;;  %v1940_v26 = vmul.f32 %v5850_v29, %v6998_v36  ;;  %v7092_v54 = vmax.f32 %v1915_v55, 0.0  ;;  %v1918_v29 = vmul.f32 0.06666667, %v1902_v60 }
 0x46c   :  { %v1952_v37 = vsel %vm1950_vm5, %v1951_v16, %v1949_v2  ;;  %v5852_v5 = vpop.eup %5851  ;;  %v5345_v63 = vpop.f32.mrf.mxu1  ;;  %5863 = vrsqrt.f32 %v7090_v35  ;;  %vm1985_vm4 = vcmp.eq.f32.partialorder %v7068_v0, 0.0  ;;  %vm2004_vm5 = vcmp.eq.f32.partialorder %v7090_v35, inf }
 0x46d   :  { %v1942_v14 = vsel %vm1941_vm6, %v6998_v36, %v1940_v26  ;;  %v2052_v16 = vadd.f32 1e-06, %v1952_v37  ;;  %v1961_v52 = vmul.f32 %v5852_v5, %v7003_v12  ;;  %v1901_v26 = vsub.f32 %v1830_v24, %v7038_v9 }
 0x46e   :  { %v1945_v50 = vsel %vm1943_vm7, %v1944_v8, %v1942_v14  ;;  %v5854_v49 = vpop.eup %5853  ;;  %5865 = vrsqrt.f32 %v7092_v54  ;;  %v1972_v9 = vand.u32 2147483648, %v7049_v22  ;;  %v1840_v24 = vpop.f32.mrf.mxu1  ;;  %v7112_v37 = vmax.f32 %v1918_v29, 0.0 }
 0x46f   :  { %v2051_v2 = vadd.f32 1e-06, %v1945_v50  ;;  %v1963_v25 = vsel %vm1962_vm8, %v7003_v12, %v1961_v52  ;;  %v1954_v55 = vmul.f32 %v5854_v49, %v7022_v56  ;;  %v1917_v12 = vmul.f32 0.06666667, %v1901_v26 }
 0x470   :  { %v5856_v36 = vpop.eup %5855  ;;  %v1966_v8 = vsel %vm1964_vm9, %v1965_v58, %v1963_v25  ;;  %v1904_v58 = vsub.f32 %v5345_v63, %v7042_v61  ;;  %v1903_v52 = vsub.f32 %v1840_v24, %v7046_v32  ;;  %v1993_v63 = vand.u32 2147483648, %v7066_v41 }
 0x471   :  { %5867 = vrcp.f32 %v2051_v2  ;;  %v1975_v60 = vmul.f32 %v5856_v36, %v7024_v17  ;;  %v1956_v5 = vsel %vm1955_vm10, %v7022_v56, %v1954_v55  ;;  %v2054_v14 = vadd.f32 1e-06, %v1966_v8  ;;  %v5348_v55 = vpop.f32.mrf.mxu1 }
 0x472   :  { %5869 = vrcp.f32 %v2052_v16  ;;  %v5858_v49 = vpop.eup %5857  ;;  %v1959_v16 = vsel %vm1957_vm11, %v1958_v1, %v1956_v5  ;;  %v7131_v56 = vmax.f32 %v1917_v12, 0.0  ;;  %v1919_v8 = vmul.f32 0.06666667, %v1903_v52 }
 0x473   :  { %v1977_v50 = vsel %vm1976_vm12, %v7024_v17, %v1975_v60  ;;  %v2053_v29 = vadd.f32 1e-06, %v1959_v16  ;;  %v1968_v25 = vmul.f32 %v5858_v49, %v7049_v22  ;;  %5871 = vrsqrt.f32 %v7112_v37 }
 0x474   :  { %v1980_v2 = vsel %vm1978_vm13, %v1979_v30, %v1977_v50  ;;  %v5860_v1 = vpop.eup %5859  ;;  %v1920_v30 = vmul.f32 0.06666667, %v1904_v58  ;;  %v1986_v5 = vand.u32 2147483648, %v7068_v0  ;;  %v1906_v49 = vsub.f32 %v5348_v55, %v7053_v34 }
 0x475   :  { %v2056_v61 = vadd.f32 1e-06, %v1980_v2  ;;  %5873 = vrcp.f32 %v2053_v29  ;;  %v1970_v32 = vsel %vm1969_vm14, %v7049_v22, %v1968_v25  ;;  %v1989_v36 = vmul.f32 %v5860_v1, %v7066_v41 }
 0x476   :  { %v5862_v17 = vpop.eup %5861  ;;  %5875 = vrcp.f32 %v2054_v14  ;;  %v1973_v26 = vsel %vm1971_vm15, %v1972_v9, %v1970_v32  ;;  %v7147_v22 = vmax.f32 %v1920_v30, 0.0  ;;  %v7158_v52 = vmax.f32 %v1919_v8, 0.0 }
 0x477   :  { %v2055_v24 = vadd.f32 1e-06, %v1973_v26  ;;  %v1982_v60 = vmul.f32 %v5862_v17, %v7068_v0  ;;  %5877 = vrsqrt.f32 %v7131_v56  ;;  %v1991_v12 = vsel %vm1990_vm1, %v7066_v41, %v1989_v36 }
 0x478   :  { %5879 = vrcp.f32 %v2056_v61  ;;  %v1994_v9 = vsel %vm1992_vm2, %v1993_v63, %v1991_v12  ;;  %vm2006_vm6 = vcmp.eq.f32.partialorder %v7090_v35, 0.0  ;;  %v2007_v25 = vand.u32 2147483648, %v7090_v35  ;;  %v1850_v61 = vpop.f32.mrf.mxu1  ;;  %v6044_v12 = vld [vmem:[#allocation2 + $0xf0] sm:$0xff] }
 0x479   :  { %5881 = vrcp.f32 %v2055_v24  ;;  %v1984_v58 = vsel %vm1983_vm3, %v7068_v0, %v1982_v60  ;;  %v5864_v14 = vpop.eup %5863  ;;  %v2058_v16 = vadd.f32 1e-06, %v1994_v9  ;;  %vm1997_vm7 = vcmp.eq.f32.partialorder %v7092_v54, inf }
 0x47a   :  { %v1987_v50 = vsel %vm1985_vm4, %v1986_v5, %v1984_v58  ;;  %5883 = vrsqrt.f32 %v7147_v22  ;;  %v2003_v41 = vmul.f32 %v5864_v14, %v7090_v35  ;;  %vm1999_vm8 = vcmp.eq.f32.partialorder %v7092_v54, 0.0  ;;  %v6045_v58 = vld [vmem:[#allocation2 + $0xe8] sm:$0xff] }
 0x47b   :  { %v5866_v29 = vpop.eup %5865  ;;  %v2057_v2 = vadd.f32 1e-06, %v1987_v50  ;;  %5885 = vrcp.f32 %v2058_v16  ;;  %v2000_v32 = vand.u32 2147483648, %v7092_v54  ;;  %v1922_v30 = vmul.f32 0.06666667, %v1906_v49  ;;  %v6046_v50 = vld [vmem:[#allocation2 + $0xe0] sm:$0xff] }
 0x47c   :  { %v1996_v34 = vmul.f32 %v5866_v29, %v7092_v54  ;;  %v2005_v1 = vsel %vm2004_vm5, %v7090_v35, %v2003_v41  ;;  %v1905_v36 = vsub.f32 %v1850_v61, %v7057_v42  ;;  %vm2018_vm9 = vcmp.eq.f32.partialorder %v7112_v37, inf }
 0x47d   :  { %5887 = vrcp.f32 %v2057_v2  ;;  %v2008_v17 = vsel %vm2006_vm6, %v2007_v25, %v2005_v1  ;;  %v7181_v24 = vmax.f32 %v1922_v30, 0.0  ;;  %v2021_v14 = vand.u32 2147483648, %v7112_v37 }
 0x47e   :  { %v7163_v63 = vpop.eup %5867  ;;  %v1998_v26 = vsel %vm1997_vm7, %v7092_v54, %v1996_v34  ;;  %5889 = vrsqrt.f32 %v7158_v52  ;;  %v2060_v8 = vadd.f32 1e-06, %v2008_v17  ;;  %v1921_v5 = vmul.f32 0.06666667, %v1905_v36 }
 0x47f   :  { %v7168_v0 = vpop.eup %5869  ;;  %5365 = vmatprep.mubr.msk.f32.mxu0 %vm236_vm0, %v7163_v63  ;;  %v2001_v55 = vsel %vm1999_vm8, %v2000_v32, %v1998_v26  ;;  %vm2020_vm10 = vcmp.eq.f32.partialorder %v7112_v37, 0.0  ;;  %vm2011_vm11 = vcmp.eq.f32.partialorder %v7131_v56, inf  ;;  %v2014_v61 = vand.u32 2147483648, %v7131_v56  ;;  %v6048_v26 = vld [vmem:[#allocation2 + $0xd0] sm:$0xff] }
 0x480   :  { %5366 = vmatmul.mubr.msk.f32.vlgmr.msra.gmra.mxu0 %vm236_vm0, %v7168_v0  ;;  %v5872_v35 = vpop.eup %5871  ;;  %v2059_v60 = vadd.f32 1e-06, %v2001_v55  ;;  %5891 = vrcp.f32 %v2060_v8  ;;  %v7188_v42 = vmax.f32 %v1921_v5, 0.0  ;;  %vm2013_vm12 = vcmp.eq.f32.partialorder %v7131_v56, 0.0 }
 0x481   :  { %5454 = vmatpush3.msra.mxu0 %v6961_v6  ;;  %v2017_v54 = vmul.f32 %v5872_v35, %v7112_v37  ;;  %vm2032_vm13 = vcmp.eq.f32.partialorder %v7147_v22, inf  ;;  %v2035_v35 = vand.u32 2147483648, %v7147_v22  ;;  %vm2034_vm14 = vcmp.eq.f32.partialorder %v7147_v22, 0.0 }
 0x482   :  { %5455 = vmatprep.subr.mxu0 %v6044_v12  ;;  %v7185_v9 = vpop.eup %5873  ;;  %5893 = vrcp.f32 %v2059_v60  ;;  %v6049_v60 = vld [vmem:[#allocation2 + $0xc8] sm:$0xff]  ;;  %vm2025_vm15 = vcmp.eq.f32.partialorder %v7158_v52, inf  ;;  %vm2027_vm1 = vcmp.eq.f32.partialorder %v7158_v52, 0.0  ;;  %vm2046_vm2 = vcmp.eq.f32.partialorder %v7181_v24, inf }
 0x483   :  { %5456 = vmatpush3.msra.mxu0 %v6044_v12  ;;  %v7190_v49 = vpop.eup %5875  ;;  %v2019_v6 = vsel %vm2018_vm9, %v7112_v37, %v2017_v54  ;;  %5895 = vrsqrt.f32 %v7181_v24  ;;  %5368 = vmatprep.mubr.msk.f32.mxu0 %vm236_vm0, %v7185_v9  ;;  %v6047_v37 = vld [vmem:[#allocation2 + $0xd8] sm:$0xff]  ;;  %vm2048_vm3 = vcmp.eq.f32.partialorder %v7181_v24, 0.0  ;;  %vm2039_vm4 = vcmp.eq.f32.partialorder %v7188_v42, inf }
 0x484   :  { %5457 = vmatprep.subr.mxu0 %v6045_v58  ;;  %v5878_v16 = vpop.eup %5877  ;;  %5897 = vrsqrt.f32 %v7188_v42  ;;  %5369 = vmatmul.mubr.msk.f32.gmra.mxu0 %vm236_vm0, %v7190_v49  ;;  %v2022_v2 = vsel %vm2020_vm10, %v2021_v14, %v2019_v6  ;;  %v2028_v6 = vand.u32 2147483648, %v7158_v52  ;;  %vm2041_vm5 = vcmp.eq.f32.partialorder %v7188_v42, 0.0 }
 0x485   :  { %5458 = vmatpush3.msra.mxu0 %v6045_v58  ;;  %v7201_v29 = vpop.eup %5879  ;;  %v2010_v41 = vmul.f32 %v5878_v16, %v7131_v56  ;;  %v2062_v32 = vadd.f32 1e-06, %v2022_v2  ;;  %v6050_v58 = vld [vmem:[#allocation2 + $0xc0] sm:$0xff] }
 0x486   :  { %5459 = vmatprep.subr.mxu0 %v6046_v50  ;;  %v7204_v25 = vpop.eup %5881 }
 0x487   :  { %5460 = vmatpush3.msra.mxu0 %v6046_v50  ;;  %v5884_v34 = vpop.eup %5883  ;;  %v2012_v1 = vsel %vm2011_vm11, %v7131_v56, %v2010_v41  ;;  %5371 = vmatprep.mubr.msk.f32.mxu0 %vm236_vm0, %v7204_v25 }
 0x488   :  { %5461 = vmatprep.subr.mxu0 %v6047_v37  ;;  %v2015_v30 = vsel %vm2013_vm12, %v2014_v61, %v2012_v1  ;;  %v2031_v17 = vmul.f32 %v5884_v34, %v7147_v22  ;;  %5372 = vmatmul.mubr.msk.f32.gmra.mxu0 %vm236_vm0, %v7201_v29  ;;  %v7215_v36 = vpop.eup %5885  ;;  %v2049_v1 = vand.u32 2147483648, %v7181_v24 }
 0x489   :  { %5462 = vmatpush3.msra.mxu0 %v6047_v37  ;;  %v2061_v8 = vadd.f32 1e-06, %v2015_v30  ;;  %v2042_v30 = vand.u32 2147483648, %v7188_v42 }
 0x48a   :  { %5463 = vmatprep.subr.mxu0 %v6048_v26  ;;  %v7218_v56 = vpop.eup %5887  ;;  %v2033_v55 = vsel %vm2032_vm13, %v7147_v22, %v2031_v17 }
 0x48b   :  { %5464 = vmatpush3.msra.mxu0 %v6048_v26  ;;  %v5890_v5 = vpop.eup %5889  ;;  %5899 = vrcp.f32 %v2061_v8  ;;  %5374 = vmatprep.mubr.msk.f32.mxu0 %vm236_vm0, %v7218_v56  ;;  %v2036_v12 = vsel %vm2034_vm14, %v2035_v35, %v2033_v55 }
 0x48c   :  { %5465 = vmatprep.subr.mxu0 %v6049_v60  ;;  %5901 = vrcp.f32 %v2062_v32  ;;  %v2024_v54 = vmul.f32 %v5890_v5, %v7158_v52  ;;  %5375 = vmatmul.mubr.msk.f32.gmra.mxu0 %vm236_vm0, %v7215_v36  ;;  %v2064_v50 = vadd.f32 1e-06, %v2036_v12 }
 0x48d   :  { %5466 = vmatpush3.msra.mxu0 %v6049_v60  ;;  %v5892_v14 = vpop.eup %5891 }
 0x48e   :  { %5467 = vmatprep.subr.mxu0 %v6050_v58  ;;  %v2026_v22 = vsel %vm2025_vm15, %v7158_v52, %v2024_v54 }
 0x48f   :  { %5468 = vmatpush3.msra.mxu0 %v6050_v58  ;;  %v5894_v16 = vpop.eup %5893  ;;  %v2029_v2 = vsel %vm2027_vm1, %v2028_v6, %v2026_v22  ;;  %v2084_v6 = vmul.f32 %v7168_v0, %v6970_v57  ;;  %v2085_v22 = vmul.f32 %v7185_v9, %v6982_v59  ;;  %v2088_v57 = vmul.f32 %v7201_v29, %v6985_v4  ;;  %v43_v9 = vld [vmem:[#allocation2 + $0x50] sm:$0xff] }
 0x490   :  { %v5896_v41 = vpop.eup %5895  ;;  %v2063_v61 = vadd.f32 1e-06, %v2029_v2  ;;  %5377 = vmatprep.mubr.msk.f32.mxu0 %vm236_vm0, %v5894_v16  ;;  %v2089_v59 = vmul.f32 %v7218_v56, %v6996_v51 }
 0x491   :  { %v5898_v37 = vpop.eup %5897  ;;  %v2045_v34 = vmul.f32 %v5896_v41, %v7181_v24  ;;  %5378 = vmatmul.mubr.msk.f32.gmra.mxu0 %vm236_vm0, %v5892_v14 }
 0x492   :  { %5903 = vrcp.f32 %v2063_v61  ;;  %v2038_v52 = vmul.f32 %v5898_v37, %v7188_v42 }
 0x493   :  { %5905 = vrcp.f32 %v2064_v50  ;;  %v2047_v32 = vsel %vm2046_vm2, %v7181_v24, %v2045_v34  ;;  %v2086_v50 = vmul.f32 %v7190_v49, %v6979_v15  ;;  %v2090_v15 = vmul.f32 %v7215_v36, %v6992_v48  ;;  %v41_v49 = vld [vmem:[#allocation2 + $0x40] sm:$0xff] }
 0x494   :  { %v2050_v17 = vsel %vm2048_vm3, %v2049_v1, %v2047_v32  ;;  %v2040_v26 = vsel %vm2039_vm4, %v7188_v42, %v2038_v52  ;;  %v2083_v42 = vmul.f32 %v7163_v63, %v6974_v40  ;;  %v2087_v40 = vmul.f32 %v7204_v25, %v6987_v45 }
 0x495   :  { %v2066_v8 = vadd.f32 1e-06, %v2050_v17  ;;  %v2043_v55 = vsel %vm2041_vm5, %v2042_v30, %v2040_v26  ;;  %v2091_v63 = vmul.f32 %v5894_v16, %v7008_v10  ;;  %v2092_v45 = vmul.f32 %v5892_v14, %v7006_v11 }
 0x496   :  { %v2065_v35 = vadd.f32 1e-06, %v2043_v55 }
 0x498   :  { %v5900_v60 = vpop.eup %5899  ;;  %5907 = vrcp.f32 %v2065_v35 }
 0x499   :  { %v5902_v5 = vpop.eup %5901  ;;  %5909 = vrcp.f32 %v2066_v8  ;;  %5380 = vmatprep.mubr.msk.f32.mxu0 %vm236_vm0, %v5900_v60  ;;  %v2093_v4 = vmul.f32 %v5900_v60, %v7013_v18  ;;  %v48_v18 = vld [vmem:[#allocation2 + $0x78] sm:$0xff]  ;;  %v7305_v60 = vld [vmem:[%s8250_s1 + $0x6] ss:$0 sm:$0xff] }
 0x49a   :  { %5381 = vmatmul.mubr.msk.f32.gmra.mxu0 %vm236_vm0, %v5902_v5  ;;  %v2094_v51 = vmul.f32 %v5902_v5, %v7010_v28  ;;  %5413 = vmatprep.subr.mxu1 %v48_v18  ;;  %v47_v28 = vld [vmem:[#allocation2 + $0x70] sm:$0xff] }
 0x49b   :  { %5414 = vmatpush3.msra.mxu1 %v48_v18 }
 0x49c   :  { %5415 = vmatprep.subr.mxu1 %v47_v28 }
 0x49d   :  { %5416 = vmatpush3.msra.mxu1 %v47_v28 }
 0x49f   :  { %v5904_v24 = vpop.eup %5903 }
 0x4a0   :  { %v5906_v12 = vpop.eup %5905  ;;  %5383 = vmatprep.mubr.msk.f32.mxu0 %vm236_vm0, %v5904_v24  ;;  %v2095_v0 = vmul.f32 %v5904_v24, %v7019_v3  ;;  %v46_v3 = vld [vmem:[#allocation2 + $0x68] sm:$0xff] }
 0x4a1   :  { %5384 = vmatmul.mubr.msk.f32.gmra.mxu0 %vm236_vm0, %v5906_v12  ;;  %v2096_v48 = vmul.f32 %v5906_v12, %v7016_v31  ;;  %5417 = vmatprep.subr.mxu1 %v46_v3  ;;  %v45_v31 = vld [vmem:[#allocation2 + $0x60] sm:$0xff] }
 0x4a2   :  { %5418 = vmatpush3.msra.mxu1 %v46_v3 }
 0x4a3   :  { %5419 = vmatprep.subr.mxu1 %v45_v31 }
 0x4a4   :  { %5420 = vmatpush3.msra.mxu1 %v45_v31 }
 0x4a5   :  { %v5908_v54 = vpop.eup %5907 }
 0x4a6   :  { %v5910_v58 = vpop.eup %5909  ;;  %5386 = vmatprep.mubr.msk.f32.mxu0 %vm236_vm0, %v5908_v54  ;;  %v2097_v10 = vmul.f32 %v5908_v54, %v7030_v7  ;;  %v44_v7 = vld [vmem:[#allocation2 + $0x58] sm:$0xff] }
 0x4a7   :  { %5387 = vmatmul.mubr.msk.f32.gmra.mxu0 %vm236_vm0, %v5910_v58  ;;  %v2098_v11 = vmul.f32 %v5910_v58, %v7027_v13  ;;  %5421 = vmatprep.subr.mxu1 %v44_v7  ;;  %v42_v13 = vld [vmem:[#allocation2 + $0x48] sm:$0xff] }
 0x4a8   :  { %5389 = vmatprep.mubr.msk.f32.mxu0 %vm236_vm0, %v2083_v42  ;;  %5422 = vmatpush3.msra.mxu1 %v44_v7 }
 0x4a9   :  { %5423 = vmatprep.subr.mxu1 %v43_v9 }
 0x4aa   :  { %5424 = vmatpush3.msra.mxu1 %v43_v9 }
 0x4ab   :  { %5390 = vmatmul.mubr.msk.f32.gmra.mxu0 %vm236_vm0, %v2084_v6  ;;  %5425 = vmatprep.subr.mxu1 %v42_v13 }
 0x4ac   :  { %5392 = vmatprep.mubr.msk.f32.mxu0 %vm236_vm0, %v2085_v22  ;;  %5426 = vmatpush3.msra.mxu1 %v42_v13 }
 0x4ad   :  { %5427 = vmatprep.subr.mxu1 %v41_v49 }
 0x4ae   :  { %5428 = vmatpush3.msra.mxu1 %v41_v49 }
 0x4af   :  { %5393 = vmatmul.mubr.msk.f32.gmra.mxu0 %vm236_vm0, %v2086_v50 }
 0x4b0   :  { %5395 = vmatprep.mubr.msk.f32.mxu0 %vm236_vm0, %v2087_v40 }
 0x4b3   :  { %5396 = vmatmul.mubr.msk.f32.gmra.mxu0 %vm236_vm0, %v2088_v57 }
 0x4b4   :  { %5398 = vmatprep.mubr.msk.f32.mxu0 %vm236_vm0, %v2089_v59 }
 0x4b7   :  { %5399 = vmatmul.mubr.msk.f32.gmra.mxu0 %vm236_vm0, %v2090_v15 }
 0x4b8   :  { %5401 = vmatprep.mubr.msk.f32.mxu0 %vm236_vm0, %v2091_v63 }
 0x4bb   :  { %5402 = vmatmul.mubr.msk.f32.gmra.mxu0 %vm236_vm0, %v2092_v45 }
 0x4bc   :  { %5404 = vmatprep.mubr.msk.f32.mxu0 %vm236_vm0, %v2093_v4 }
 0x4bf   :  { %5405 = vmatmul.mubr.msk.f32.gmra.mxu0 %vm236_vm0, %v2094_v51 }
 0x4c0   :  { %5407 = vmatprep.mubr.msk.f32.mxu0 %vm236_vm0, %v2095_v0 }
 0x4c3   :  { %5408 = vmatmul.mubr.msk.f32.gmra.mxu0 %vm236_vm0, %v2096_v48 }
 0x4c4   :  { %5410 = vmatprep.mubr.msk.f32.mxu0 %vm236_vm0, %v2097_v10 }
 0x4c7   :  { %5411 = vmatmul.mubr.msk.f32.gmra.mxu0 %vm236_vm0, %v2098_v11 }
 0x540   :  { %v5367_v29 = vpop.f32.mrf.mxu0 }
 0x541   :  { %v2421_v30 = vmul.f32 %v5367_v29, %v6851_v19 }
 0x542   :  { %v2261_v25 = vpop.f32.mrf.mxu0 }
 0x543   :  { %v2420_v26 = vmul.f32 %v2261_v25, %v6849_v20  ;;  %v2437_v35 = vadd.f32 %v2421_v30, %v6851_v19 }
 0x544   :  { %v5370_v36 = vpop.f32.mrf.mxu0 }
 0x545   :  { %v2423_v55 = vmul.f32 %v5370_v36, %v6859_v62  ;;  %v2436_v12 = vadd.f32 %v2420_v26, %v6849_v20 }
 0x546   :  { %v2271_v56 = vpop.f32.mrf.mxu0 }
 0x547   :  { %v2422_v54 = vmul.f32 %v2271_v56, %v6857_v46  ;;  %v2439_v22 = vadd.f32 %v2423_v55, %v6859_v62 }
 0x548   :  { %v5373_v14 = vpop.f32.mrf.mxu0 }
 0x549   :  { %v2425_v19 = vmul.f32 %v5373_v14, %v6867_v27  ;;  %v2438_v63 = vadd.f32 %v2422_v54, %v6857_v46 }
 0x54a   :  { %v2281_v16 = vpop.f32.mrf.mxu0 }
 0x54b   :  { %v2424_v40 = vmul.f32 %v2281_v16, %v6865_v33  ;;  %v2441_v11 = vadd.f32 %v2425_v19, %v6867_v27 }
 0x54c   :  { %v5376_v2 = vpop.f32.mrf.mxu0 }
 0x54d   :  { %v2427_v45 = vmul.f32 %v5376_v2, %v6875_v23  ;;  %v2440_v46 = vadd.f32 %v2424_v40, %v6865_v33 }
 0x54e   :  { %v2291_v41 = vpop.f32.mrf.mxu0 }
 0x54f   :  { %v2426_v0 = vmul.f32 %v2291_v41, %v6873_v38  ;;  %v2443_v49 = vadd.f32 %v2427_v45, %v6875_v23 }
 0x551   :  { %v5379_v61 = vpop.f32.mrf.mxu0  ;;  %v2442_v33 = vadd.f32 %v2426_v0, %v6873_v38 }
 0x552   :  { %v2429_v29 = vmul.f32 %v5379_v61, %v6883_v47 }
 0x553   :  { %v2301_v37 = vpop.f32.mrf.mxu0 }
 0x554   :  { %v2428_v56 = vmul.f32 %v2301_v37, %v6881_v39 }
 0x556   :  { %v2444_v54 = vadd.f32 %v2428_v56, %v6881_v39 }
 0x55a   :  { %v5382_v34 = vpop.f32.mrf.mxu0 }
 0x55b   :  { %v2431_v2 = vmul.f32 %v5382_v34, %v6891_v44 }
 0x55c   :  { %v2311_v1 = vpop.f32.mrf.mxu0 }
 0x55d   :  { %v2430_v30 = vmul.f32 %v2311_v1, %v6889_v43 }
 0x561   :  { %v7290_v52 = vpop.f32.mrf.mxu0 }
 0x562   :  { %v2433_v1 = vmul.f32 %v7290_v52, %v6899_v53 }
 0x563   :  { %v7292_v32 = vpop.f32.mrf.mxu0 }
 0x564   :  { %v2432_v40 = vmul.f32 %v7292_v32, %v6897_v21 }
 0x567   :  { %v7295_v17 = vpop.f32.mrf.mxu0 }
 0x569   :  { %v7298_v8 = vpop.f32.mrf.mxu0 }
 0x56b   :  { %v5391_v5 = vpop.f32.mrf.mxu0 }
 0x56c   :  { %v2453_v24 = vsub.f32 %v2437_v35, %v5391_v5  ;;  %v2445_v5 = vadd.f32 %v2429_v29, %v6883_v47 }
 0x56d   :  { %v2341_v58 = vpop.f32.mrf.mxu0 }
 0x56e   :  { %v7310_v42 = vadd.f32 %v7305_v60, %v2453_v24  ;;  %v2452_v6 = vsub.f32 %v2436_v12, %v2341_v58 }
 0x56f   :  { %v5394_v50 = vpop.f32.mrf.mxu0 }
 0x570   :  { %v2505_v57 = vmin.f32 %v7310_v42, 0.0  ;;  %v7317_v59 = vadd.f32 %v7305_v60, %v2452_v6  ;;  %v2455_v20 = vsub.f32 %v2439_v22, %v5394_v50  ;;  %v2447_v22 = vadd.f32 %v2431_v2, %v6891_v44 }
 0x571   :  { %v2351_v15 = vpop.f32.mrf.mxu0  ;;  %v2446_v50 = vadd.f32 %v2430_v30, %v6889_v43  ;;  %vm2489_vm6 = vcmp.gt.f32.partialorder %v7310_v42, 0.0 }
 0x572   :  { %v2522_v4 = vmul.f32 1.442695, %v2505_v57  ;;  %v2504_v51 = vmin.f32 %v7317_v59, 0.0  ;;  %v7323_v62 = vadd.f32 %v7305_v60, %v2455_v20  ;;  %v2454_v48 = vsub.f32 %v2438_v63, %v2351_v15  ;;  %v8294_v57 = vld [vmem:[#allocation8_spill] sm:$0xff]  ;;  %v8295_v63 = vld [vmem:[#allocation9_spill] sm:$0xff] }
 0x573   :  { %v5397_v10 = vpop.f32.mrf.mxu0  ;;  %v2435_v39 = vmul.f32 %v7295_v17, %v8294_v57  ;;  %v2434_v44 = vmul.f32 %v7298_v8, %v8295_v63  ;;  %v2449_v17 = vadd.f32 %v2433_v1, %v6899_v53  ;;  %vm2488_vm7 = vcmp.gt.f32.partialorder %v7317_v59, 0.0 }
 0x574   :  { %5911 = vpow2.f32 %v2522_v4  ;;  %v2520_v18 = vmul.f32 1.442695, %v2504_v51  ;;  %v2507_v28 = vmin.f32 %v7323_v62, 0.0  ;;  %v7330_v3 = vadd.f32 %v7305_v60, %v2454_v48 }
 0x575   :  { %v2457_v31 = vsub.f32 %v2441_v11, %v5397_v10  ;;  %v2361_v7 = vpop.f32.mrf.mxu0  ;;  %v7383_v53 = vadd.f32 %v2434_v44, %v8295_v63  ;;  %vm2491_vm8 = vcmp.gt.f32.partialorder %v7323_v62, 0.0 }
 0x576   :  { %5913 = vpow2.f32 %v2520_v18  ;;  %v2526_v9 = vmul.f32 1.442695, %v2507_v28  ;;  %v2456_v13 = vsub.f32 %v2440_v46, %v2361_v7  ;;  %v2506_v27 = vmin.f32 %v7330_v3, 0.0 }
 0x577   :  { %v7336_v25 = vadd.f32 %v7305_v60, %v2457_v31  ;;  %v5400_v36 = vpop.f32.mrf.mxu0  ;;  %v2448_v31 = vadd.f32 %v2432_v40, %v6897_v21  ;;  %v2451_v7 = vadd.f32 %v2435_v39, %v8294_v57  ;;  %vm2490_vm9 = vcmp.gt.f32.partialorder %v7330_v3, 0.0 }
 0x578   :  { %5915 = vpow2.f32 %v2526_v9  ;;  %v7341_v14 = vadd.f32 %v7305_v60, %v2456_v13  ;;  %v2459_v16 = vsub.f32 %v2443_v49, %v5400_v36  ;;  %v2524_v23 = vmul.f32 1.442695, %v2506_v27 }
 0x579   :  { %v2509_v41 = vmin.f32 %v7336_v25, 0.0  ;;  %v2371_v61 = vpop.f32.mrf.mxu0  ;;  %vm2493_vm10 = vcmp.gt.f32.partialorder %v7336_v25, 0.0 }
 0x57a   :  { %v2508_v26 = vmin.f32 %v7341_v14, 0.0  ;;  %v7348_v55 = vadd.f32 %v7305_v60, %v2459_v16  ;;  %v2458_v38 = vsub.f32 %v2442_v33, %v2371_v61  ;;  %5917 = vpow2.f32 %v2524_v23 }
 0x57b   :  { %v2530_v37 = vmul.f32 1.442695, %v2509_v41  ;;  %v5403_v35 = vpop.f32.mrf.mxu0  ;;  %vm2492_vm11 = vcmp.gt.f32.partialorder %v7341_v14, 0.0 }
 0x57c   :  { %v2528_v24 = vmul.f32 1.442695, %v2508_v26  ;;  %v2511_v34 = vmin.f32 %v7348_v55, 0.0  ;;  %v7353_v12 = vadd.f32 %v7305_v60, %v2458_v38  ;;  %v2461_v58 = vsub.f32 %v2445_v5, %v5403_v35 }
 0x57d   :  { %5919 = vpow2.f32 %v2530_v37  ;;  %v2381_v6 = vpop.f32.mrf.mxu0  ;;  %vm2495_vm12 = vcmp.gt.f32.partialorder %v7348_v55, 0.0 }
 0x57e   :  { %5921 = vpow2.f32 %v2528_v24  ;;  %v2534_v19 = vmul.f32 1.442695, %v2511_v34  ;;  %v2510_v47 = vmin.f32 %v7353_v12, 0.0  ;;  %v7366_v20 = vadd.f32 %v7305_v60, %v2461_v58 }
 0x57f   :  { %v2460_v52 = vsub.f32 %v2444_v54, %v2381_v6  ;;  %v5406_v15 = vpop.f32.mrf.mxu0  ;;  %vm2494_vm13 = vcmp.gt.f32.partialorder %v7353_v12, 0.0 }
 0x580   :  { %5923 = vpow2.f32 %v2534_v19  ;;  %v2532_v45 = vmul.f32 1.442695, %v2510_v47  ;;  %v2463_v4 = vsub.f32 %v2447_v22, %v5406_v15  ;;  %v2513_v43 = vmin.f32 %v7366_v20, 0.0 }
 0x581   :  { %v5912_v51 = vpop.eup %5911  ;;  %v7372_v0 = vadd.f32 %v7305_v60, %v2460_v52  ;;  %v2391_v32 = vpop.f32.mrf.mxu0  ;;  %vm2497_vm14 = vcmp.gt.f32.partialorder %v7366_v20, 0.0 }
 0x582   :  { %v4607_v48 = vadd.f32 -1.0, %v5912_v51  ;;  %5925 = vpow2.f32 %v2532_v45  ;;  %v7376_v10 = vadd.f32 %v7305_v60, %v2463_v4  ;;  %v2462_v11 = vsub.f32 %v2446_v50, %v2391_v32 }
 0x583   :  { %v5914_v18 = vpop.eup %5913  ;;  %v2538_v8 = vmul.f32 1.442695, %v2513_v43  ;;  %v2512_v28 = vmin.f32 %v7372_v0, 0.0  ;;  %v5409_v46 = vpop.f32.mrf.mxu0  ;;  %vm2496_vm15 = vcmp.gt.f32.partialorder %v7372_v0, 0.0 }
 0x584   :  { %v2569_v9 = vmul.f32 1.6732632, %v4607_v48  ;;  %v4606_v13 = vadd.f32 -1.0, %v5914_v18  ;;  %v2515_v49 = vmin.f32 %v7376_v10, 0.0  ;;  %v7386_v36 = vadd.f32 %v7305_v60, %v2462_v11 }
 0x585   :  { %v5916_v29 = vpop.eup %5915  ;;  %5927 = vpow2.f32 %v2538_v8  ;;  %v2536_v27 = vmul.f32 1.442695, %v2512_v28  ;;  %v2465_v33 = vsub.f32 %v2449_v17, %v5409_v46  ;;  %v2401_v56 = vpop.f32.mrf.mxu0  ;;  %vm2499_vm1 = vcmp.gt.f32.partialorder %v7376_v10, 0.0 }
 0x586   :  { %v2568_v21 = vmul.f32 1.6732632, %v4606_v13  ;;  %v4609_v16 = vadd.f32 -1.0, %v5916_v29  ;;  %v2542_v2 = vmul.f32 1.442695, %v2515_v49  ;;  %v2585_v23 = vsel %vm2489_vm6, %v7310_v42, %v2569_v9 }
 0x587   :  { %5929 = vpow2.f32 %v2536_v27  ;;  %v2514_v41 = vmin.f32 %v7386_v36, 0.0  ;;  %v5412_v61 = vpop.f32.mrf.mxu0  ;;  %v5918_v30 = vpop.eup %5917  ;;  %v7394_v37 = vadd.f32 %v7305_v60, %v2465_v33  ;;  %v2464_v34 = vsub.f32 %v2448_v31, %v2401_v56 }
 0x588   :  { %v2584_v26 = vsel %vm2488_vm7, %v7317_v59, %v2568_v21  ;;  %v2571_v38 = vmul.f32 1.6732632, %v4609_v16  ;;  %5931 = vpow2.f32 %v2542_v2  ;;  %v4608_v5 = vadd.f32 -1.0, %v5918_v30 }
 0x589   :  { %v2600_v35 = vmul.f32 1.050701, %v2584_v26  ;;  %v2540_v24 = vmul.f32 1.442695, %v2514_v41  ;;  %v2601_v42 = vmul.f32 1.050701, %v2585_v23  ;;  %v2467_v58 = vsub.f32 %v2451_v7, %v5412_v61  ;;  %v2411_v6 = vpop.f32.mrf.mxu0 }
 0x58a   :  { %v5920_v54 = vpop.eup %5919  ;;  %v2517_v1 = vmin.f32 %v7394_v37, 0.0  ;;  %v2570_v59 = vmul.f32 1.6732632, %v4608_v5  ;;  %v2587_v47 = vsel %vm2491_vm8, %v7323_v62, %v2571_v38  ;;  %v7402_v57 = vadd.f32 %v7305_v60, %v2464_v34 }
 0x58b   :  { %v5922_v22 = vpop.eup %5921  ;;  %v4611_v19 = vadd.f32 -1.0, %v5920_v54  ;;  %5933 = vpow2.f32 %v2540_v24  ;;  %5429 = vmatprep.mubr.msk.f32.mxu1 %vm236_vm0, %v2600_v35  ;;  %v7407_v63 = vadd.f32 %v7305_v60, %v2467_v58  ;;  %v2466_v44 = vsub.f32 %v7383_v53, %v2411_v6 }
 0x58c   :  { %v4610_v50 = vadd.f32 -1.0, %v5922_v22  ;;  %v2546_v40 = vmul.f32 1.442695, %v2517_v1  ;;  %5430 = vmatmul.mubr.msk.f32.vlgmr.msra.gmra.mxu1 %vm236_vm0, %v2601_v42  ;;  %v2586_v52 = vsel %vm2490_vm9, %v7330_v3, %v2570_v59  ;;  %v2603_v43 = vmul.f32 1.050701, %v2587_v47 }
 0x58d   :  { %v5924_v39 = vpop.eup %5923  ;;  %v2573_v15 = vmul.f32 1.6732632, %v4611_v19  ;;  %v2602_v45 = vmul.f32 1.050701, %v2586_v52  ;;  %v2516_v32 = vmin.f32 %v7402_v57, 0.0  ;;  %v2519_v28 = vmin.f32 %v7407_v63, 0.0 }
 0x58e   :  { %v2572_v4 = vmul.f32 1.6732632, %v4610_v50  ;;  %v4613_v51 = vadd.f32 -1.0, %v5924_v39  ;;  %5935 = vpow2.f32 %v2546_v40  ;;  %v7418_v46 = vadd.f32 %v7305_v60, %v2466_v44 }
 0x58f   :  { %v5926_v62 = vpop.eup %5925  ;;  %v2589_v3 = vsel %vm2493_vm10, %v7336_v25, %v2573_v15  ;;  %5432 = vmatprep.mubr.msk.f32.mxu1 %vm236_vm0, %v2602_v45  ;;  %v2544_v8 = vmul.f32 1.442695, %v2516_v32  ;;  %v2550_v9 = vmul.f32 1.442695, %v2519_v28  ;;  %vm2498_vm2 = vcmp.gt.f32.partialorder %v7386_v36, 0.0 }
 0x590   :  { %v2588_v17 = vsel %vm2492_vm11, %v7341_v14, %v2572_v4  ;;  %v2575_v48 = vmul.f32 1.6732632, %v4613_v51  ;;  %v4612_v11 = vadd.f32 -1.0, %v5926_v62  ;;  %5433 = vmatmul.mubr.msk.f32.gmra.mxu1 %vm236_vm0, %v2603_v43  ;;  %v2605_v14 = vmul.f32 1.050701, %v2589_v3 }
 0x591   :  { %v2604_v18 = vmul.f32 1.050701, %v2588_v17  ;;  %5937 = vpow2.f32 %v2544_v8  ;;  %v2518_v53 = vmin.f32 %v7418_v46, 0.0  ;;  %vm2501_vm3 = vcmp.gt.f32.partialorder %v7394_v37, 0.0  ;;  %v4622_v4 = vld [vmem:[%s8250_s1 + $0x3] ss:$0 sm:$0xff] }
 0x592   :  { %v5928_v31 = vpop.eup %5927  ;;  %v2574_v25 = vmul.f32 1.6732632, %v4612_v11  ;;  %v2591_v49 = vsel %vm2495_vm12, %v7348_v55, %v2575_v48  ;;  %5939 = vpow2.f32 %v2550_v9  ;;  %vm2500_vm4 = vcmp.gt.f32.partialorder %v7402_v57, 0.0 }
 0x593   :  { %v4615_v7 = vadd.f32 -1.0, %v5928_v31  ;;  %5435 = vmatprep.mubr.msk.f32.mxu1 %vm236_vm0, %v2604_v18  ;;  %v2548_v16 = vmul.f32 1.442695, %v2518_v53  ;;  %v2607_v2 = vmul.f32 1.050701, %v2591_v49  ;;  %vm2503_vm5 = vcmp.gt.f32.partialorder %v7407_v63, 0.0 }
 0x594   :  { %v5930_v13 = vpop.eup %5929  ;;  %v2590_v60 = vsel %vm2494_vm13, %v7353_v12, %v2574_v25  ;;  %5436 = vmatmul.mubr.msk.f32.gmra.mxu1 %vm236_vm0, %v2605_v14  ;;  %vm2502_vm6 = vcmp.gt.f32.partialorder %v7418_v46, 0.0 }
 0x595   :  { %v5932_v29 = vpop.eup %5931  ;;  %v2606_v27 = vmul.f32 1.050701, %v2590_v60  ;;  %v2577_v33 = vmul.f32 1.6732632, %v4615_v7  ;;  %v4614_v56 = vadd.f32 -1.0, %v5930_v13  ;;  %5941 = vpow2.f32 %v2548_v16 }
 0x596   :  { %v4617_v21 = vadd.f32 -1.0, %v5932_v29 }
 0x597   :  { %v2576_v23 = vmul.f32 1.6732632, %v4614_v56  ;;  %5438 = vmatprep.mubr.msk.f32.mxu1 %vm236_vm0, %v2606_v27  ;;  %v2593_v12 = vsel %vm2497_vm14, %v7366_v20, %v2577_v33 }
 0x598   :  { %v5934_v55 = vpop.eup %5933  ;;  %v2579_v41 = vmul.f32 1.6732632, %v4617_v21  ;;  %5439 = vmatmul.mubr.msk.f32.gmra.mxu1 %vm236_vm0, %v2607_v2  ;;  %v2609_v35 = vmul.f32 1.050701, %v2593_v12 }
 0x599   :  { %v2592_v61 = vsel %vm2496_vm15, %v7372_v0, %v2576_v23  ;;  %v4616_v30 = vadd.f32 -1.0, %v5934_v55 }
 0x59a   :  { %v2608_v26 = vmul.f32 1.050701, %v2592_v61  ;;  %v2595_v24 = vsel %vm2499_vm1, %v7376_v10, %v2579_v41 }
 0x59b   :  { %v5936_v38 = vpop.eup %5935  ;;  %v2578_v5 = vmul.f32 1.6732632, %v4616_v30  ;;  %v2611_v54 = vmul.f32 1.050701, %v2595_v24 }
 0x59c   :  { %v4619_v20 = vadd.f32 -1.0, %v5936_v38  ;;  %5441 = vmatprep.mubr.msk.f32.mxu1 %vm236_vm0, %v2608_v26 }
 0x59d   :  { %v2594_v34 = vsel %vm2498_vm2, %v7386_v36, %v2578_v5  ;;  %5442 = vmatmul.mubr.msk.f32.gmra.mxu1 %vm236_vm0, %v2609_v35 }
 0x59e   :  { %v2610_v0 = vmul.f32 1.050701, %v2594_v34  ;;  %v5938_v42 = vpop.eup %5937  ;;  %v2581_v1 = vmul.f32 1.6732632, %v4619_v20 }
 0x59f   :  { %v4618_v58 = vadd.f32 -1.0, %v5938_v42  ;;  %v5940_v6 = vpop.eup %5939 }
 0x5a0   :  { %5444 = vmatprep.mubr.msk.f32.mxu1 %vm236_vm0, %v2610_v0  ;;  %v4621_v22 = vadd.f32 -1.0, %v5940_v6  ;;  %v2597_v59 = vsel %vm2501_vm3, %v7394_v37, %v2581_v1  ;;  %v2821_v6 = vld [vmem:[#allocation2 + $0x1b8] sm:$0xff] }
 0x5a1   :  { %5445 = vmatmul.mubr.msk.f32.gmra.mxu1 %vm236_vm0, %v2611_v54  ;;  %v2580_v10 = vmul.f32 1.6732632, %v4618_v58  ;;  %v2613_v39 = vmul.f32 1.050701, %v2597_v59  ;;  %5517 = vmatprep.subr.mxu1 %v2821_v6  ;;  %v2818_v59 = vld [vmem:[#allocation2 + $0x1a0] sm:$0xff] }
 0x5a2   :  { %v5942_v36 = vpop.eup %5941  ;;  %v2583_v47 = vmul.f32 1.6732632, %v4621_v22  ;;  %5518 = vmatpush3.msra.mxu1 %v2821_v6  ;;  %v2819_v22 = vld [vmem:[#allocation2 + $0x1a8] sm:$0xff] }
 0x5a3   :  { %v2596_v19 = vsel %vm2500_vm4, %v7402_v57, %v2580_v10  ;;  %v4620_v40 = vadd.f32 -1.0, %v5942_v36  ;;  %v2820_v10 = vld [vmem:[#allocation2 + $0x1b0] sm:$0xff]  ;;  %v2817_v36 = vld [vmem:[#allocation2 + $0x198] sm:$0xff] }
 0x5a4   :  { %v2612_v50 = vmul.f32 1.050701, %v2596_v19  ;;  %v2599_v15 = vsel %vm2503_vm5, %v7407_v63, %v2583_v47  ;;  %5519 = vmatprep.subr.mxu1 %v2820_v10  ;;  %v2816_v19 = vld [vmem:[#allocation2 + $0x190] sm:$0xff]  ;;  %v2815_v47 = vld [vmem:[#allocation2 + $0x188] sm:$0xff] }
 0x5a5   :  { %v2582_v52 = vmul.f32 1.6732632, %v4620_v40  ;;  %v2615_v45 = vmul.f32 1.050701, %v2599_v15  ;;  %5520 = vmatpush3.msra.mxu1 %v2820_v10 }
 0x5a6   :  { %5447 = vmatprep.mubr.msk.f32.mxu1 %vm236_vm0, %v2612_v50  ;;  %5521 = vmatprep.subr.mxu1 %v2819_v22  ;;  %v2814_v50 = vld [vmem:[#allocation2 + $0x180] sm:$0xff] }
 0x5a7   :  { %5448 = vmatmul.mubr.msk.f32.gmra.mxu1 %vm236_vm0, %v2613_v39  ;;  %v2598_v37 = vsel %vm2502_vm6, %v7418_v46, %v2582_v52 }
 0x5a8   :  { %v2614_v44 = vmul.f32 1.050701, %v2598_v37  ;;  %5522 = vmatpush3.msra.mxu1 %v2819_v22 }
 0x5a9   :  { %5523 = vmatprep.subr.mxu1 %v2818_v59 }
 0x5aa   :  { %5450 = vmatprep.mubr.msk.f32.mxu1 %vm236_vm0, %v2614_v44  ;;  %5524 = vmatpush3.msra.mxu1 %v2818_v59 }
 0x5ab   :  { %5451 = vmatmul.mubr.msk.f32.gmra.mxu1 %vm236_vm0, %v2615_v45  ;;  %5525 = vmatprep.subr.mxu1 %v2817_v36 }
 0x5ac   :  { %5526 = vmatpush3.msra.mxu1 %v2817_v36 }
 0x5ad   :  { %5527 = vmatprep.subr.mxu1 %v2816_v19 }
 0x5ae   :  { %5528 = vmatpush3.msra.mxu1 %v2816_v19 }
 0x5af   :  { %5529 = vmatprep.subr.mxu1 %v2815_v47 }
 0x5b0   :  { %5530 = vmatpush3.msra.mxu1 %v2815_v47 }
 0x5b1   :  { %5531 = vmatprep.subr.mxu1 %v2814_v50 }
 0x5b2   :  { %5532 = vmatpush3.msra.mxu1 %v2814_v50 }
 0x64c   :  { %v5431_v57 = vpop.f32.mrf.mxu1 }
 0x64d   :  { %v7459_v63 = vadd.f32 %v5431_v57, %v4622_v4 }
 0x64e   :  { %v2734_v51 = vpop.f32.mrf.mxu1 }
 0x64f   :  { %v7457_v62 = vadd.f32 %v4622_v4, %v2734_v51  ;;  %v2824_v41 = vmul.f32 %v7459_v63, %v7459_v63 }
 0x650   :  { %v5434_v43 = vpop.f32.mrf.mxu1 }
 0x651   :  { %5469 = vmatprep.mubr.msk.f32.mxu0 %vm236_vm0, %v7457_v62  ;;  %v7467_v17 = vadd.f32 %v5434_v43, %v4622_v4  ;;  %v2823_v12 = vmul.f32 %v7457_v62, %v7457_v62 }
 0x652   :  { %5470 = vmatmul.mubr.msk.f32.vlgmr.msra.gmra.mxu0 %vm236_vm0, %v7459_v63  ;;  %v2744_v32 = vpop.f32.mrf.mxu1 }
 0x653   :  { %v7465_v3 = vadd.f32 %v4622_v4, %v2744_v32  ;;  %v2826_v30 = vmul.f32 %v7467_v17, %v7467_v17 }
 0x654   :  { %v5437_v48 = vpop.f32.mrf.mxu1 }
 0x655   :  { %5472 = vmatprep.mubr.msk.f32.mxu0 %vm236_vm0, %v7465_v3  ;;  %v7475_v8 = vadd.f32 %v5437_v48, %v4622_v4  ;;  %v2825_v61 = vmul.f32 %v7465_v3, %v7465_v3 }
 0x656   :  { %v2754_v11 = vpop.f32.mrf.mxu1  ;;  %5473 = vmatmul.mubr.msk.f32.gmra.mxu0 %vm236_vm0, %v7467_v17 }
 0x657   :  { %v7473_v18 = vadd.f32 %v4622_v4, %v2754_v11  ;;  %v2828_v38 = vmul.f32 %v7475_v8, %v7475_v8 }
 0x658   :  { %v5440_v28 = vpop.f32.mrf.mxu1 }
 0x659   :  { %5475 = vmatprep.mubr.msk.f32.mxu0 %vm236_vm0, %v7473_v18  ;;  %v7483_v25 = vadd.f32 %v5440_v28, %v4622_v4  ;;  %v2827_v26 = vmul.f32 %v7473_v18, %v7473_v18 }
 0x65a   :  { %v2764_v46 = vpop.f32.mrf.mxu1  ;;  %5476 = vmatmul.mubr.msk.f32.gmra.mxu0 %vm236_vm0, %v7475_v8 }
 0x65b   :  { %v7481_v31 = vadd.f32 %v4622_v4, %v2764_v46  ;;  %v2830_v5 = vmul.f32 %v7483_v25, %v7483_v25 }
 0x65d   :  { %v5443_v14 = vpop.f32.mrf.mxu1  ;;  %5478 = vmatprep.mubr.msk.f32.mxu0 %vm236_vm0, %v7481_v31  ;;  %v2829_v35 = vmul.f32 %v7481_v31, %v7481_v31 }
 0x65e   :  { %5479 = vmatmul.mubr.msk.f32.gmra.mxu0 %vm236_vm0, %v7483_v25  ;;  %v7491_v13 = vadd.f32 %v5443_v14, %v4622_v4 }
 0x65f   :  { %v2774_v7 = vpop.f32.mrf.mxu1 }
 0x660   :  { %v7489_v9 = vadd.f32 %v4622_v4, %v2774_v7  ;;  %v2832_v20 = vmul.f32 %v7491_v13, %v7491_v13 }
 0x661   :  { %v5446_v49 = vpop.f32.mrf.mxu1 }
 0x662   :  { %5481 = vmatprep.mubr.msk.f32.mxu0 %vm236_vm0, %v7489_v9  ;;  %v7499_v29 = vadd.f32 %v5446_v49, %v4622_v4  ;;  %v2831_v24 = vmul.f32 %v7489_v9, %v7489_v9 }
 0x663   :  { %v2784_v60 = vpop.f32.mrf.mxu1  ;;  %5482 = vmatmul.mubr.msk.f32.gmra.mxu0 %vm236_vm0, %v7491_v13 }
 0x664   :  { %v7497_v53 = vadd.f32 %v4622_v4, %v2784_v60  ;;  %v2834_v0 = vmul.f32 %v7499_v29, %v7499_v29 }
 0x666   :  { %5484 = vmatprep.mubr.msk.f32.mxu0 %vm236_vm0, %v7497_v53  ;;  %v2833_v34 = vmul.f32 %v7497_v53, %v7497_v53 }
 0x667   :  { %5485 = vmatmul.mubr.msk.f32.gmra.mxu0 %vm236_vm0, %v7499_v29  ;;  %v5449_v27 = vpop.f32.mrf.mxu1 }
 0x668   :  { %v7507_v21 = vadd.f32 %v5449_v27, %v4622_v4 }
 0x669   :  { %v2794_v33 = vpop.f32.mrf.mxu1 }
 0x66a   :  { %v7505_v56 = vadd.f32 %v4622_v4, %v2794_v33  ;;  %v2836_v42 = vmul.f32 %v7507_v21, %v7507_v21 }
 0x66b   :  { %v5452_v16 = vpop.f32.mrf.mxu1 }
 0x66c   :  { %5487 = vmatprep.mubr.msk.f32.mxu0 %vm236_vm0, %v7505_v56  ;;  %v7515_v55 = vadd.f32 %v5452_v16, %v4622_v4  ;;  %v2835_v54 = vmul.f32 %v7505_v56, %v7505_v56 }
 0x66d   :  { %5488 = vmatmul.mubr.msk.f32.gmra.mxu0 %vm236_vm0, %v7507_v21  ;;  %v2804_v2 = vpop.f32.mrf.mxu1 }
 0x66e   :  { %v7513_v23 = vadd.f32 %v4622_v4, %v2804_v2  ;;  %v2838_v58 = vmul.f32 %v7515_v55, %v7515_v55 }
 0x670   :  { %8296 = vst [vmem:[#allocation11_spill] sm:$0xff] %v7513_v23  ;;  %5490 = vmatprep.mubr.msk.f32.mxu0 %vm236_vm0, %v7513_v23  ;;  %v2837_v1 = vmul.f32 %v7513_v23, %v7513_v23 }
 0x671   :  { %5491 = vmatmul.mubr.msk.f32.gmra.mxu0 %vm236_vm0, %v7515_v55 }
 0x672   :  { %5493 = vmatprep.mubr.msk.f32.mxu0 %vm236_vm0, %v2823_v12 }
 0x675   :  { %5494 = vmatmul.mubr.msk.f32.gmra.mxu0 %vm236_vm0, %v2824_v41 }
 0x676   :  { %5496 = vmatprep.mubr.msk.f32.mxu0 %vm236_vm0, %v2825_v61 }
 0x679   :  { %5497 = vmatmul.mubr.msk.f32.gmra.mxu0 %vm236_vm0, %v2826_v30 }
 0x67a   :  { %5499 = vmatprep.mubr.msk.f32.mxu0 %vm236_vm0, %v2827_v26 }
 0x67d   :  { %5500 = vmatmul.mubr.msk.f32.gmra.mxu0 %vm236_vm0, %v2828_v38 }
 0x67e   :  { %5502 = vmatprep.mubr.msk.f32.mxu0 %vm236_vm0, %v2829_v35 }
 0x681   :  { %5503 = vmatmul.mubr.msk.f32.gmra.mxu0 %vm236_vm0, %v2830_v5 }
 0x682   :  { %5505 = vmatprep.mubr.msk.f32.mxu0 %vm236_vm0, %v2831_v24 }
 0x685   :  { %5506 = vmatmul.mubr.msk.f32.gmra.mxu0 %vm236_vm0, %v2832_v20 }
 0x686   :  { %5508 = vmatprep.mubr.msk.f32.mxu0 %vm236_vm0, %v2833_v34 }
 0x689   :  { %5509 = vmatmul.mubr.msk.f32.gmra.mxu0 %vm236_vm0, %v2834_v0 }
 0x68a   :  { %5511 = vmatprep.mubr.msk.f32.mxu0 %vm236_vm0, %v2835_v54 }
 0x68d   :  { %5512 = vmatmul.mubr.msk.f32.gmra.mxu0 %vm236_vm0, %v2836_v42 }
 0x68e   :  { %5514 = vmatprep.mubr.msk.f32.mxu0 %vm236_vm0, %v2837_v1 }
 0x691   :  { %5515 = vmatmul.mubr.msk.f32.gmra.mxu0 %vm236_vm0, %v2838_v58 }
 0x712   :  { %v5471_v40 = vpop.f32.mrf.mxu0 }
 0x713   :  { %v7575_v28 = vmul.f32 0.0625, %v5471_v40 }
 0x714   :  { %v3001_v39 = vpop.f32.mrf.mxu0 }
 0x715   :  { %v7579_v14 = vmul.f32 0.0625, %v3001_v39  ;;  %v3177_v49 = vmul.f32 %v5471_v40, %v7575_v28 }
 0x716   :  { %v5474_v52 = vpop.f32.mrf.mxu0 }
 0x717   :  { %v7584_v60 = vmul.f32 0.0625, %v5474_v52  ;;  %v3176_v33 = vmul.f32 %v7579_v14, %v3001_v39 }
 0x718   :  { %v3011_v15 = vpop.f32.mrf.mxu0 }
 0x719   :  { %v7587_v2 = vmul.f32 0.0625, %v3011_v15  ;;  %v3179_v41 = vmul.f32 %v5474_v52, %v7584_v60 }
 0x71a   :  { %v5477_v37 = vpop.f32.mrf.mxu0 }
 0x71b   :  { %v7590_v61 = vmul.f32 0.0625, %v5477_v37  ;;  %v3178_v34 = vmul.f32 %v7587_v2, %v3011_v15 }
 0x71c   :  { %v3021_v44 = vpop.f32.mrf.mxu0 }
 0x71d   :  { %v7592_v35 = vmul.f32 0.0625, %v3021_v44  ;;  %v3181_v42 = vmul.f32 %v5477_v37, %v7590_v61 }
 0x71e   :  { %v5480_v45 = vpop.f32.mrf.mxu0 }
 0x71f   :  { %v7597_v0 = vmul.f32 0.0625, %v5480_v45  ;;  %v3180_v59 = vmul.f32 %v7592_v35, %v3021_v44 }
 0x720   :  { %v3031_v57 = vpop.f32.mrf.mxu0 }
 0x721   :  { %v7601_v1 = vmul.f32 0.0625, %v3031_v57  ;;  %v3183_v19 = vmul.f32 %v5480_v45, %v7597_v0 }
 0x723   :  { %v5483_v4 = vpop.f32.mrf.mxu0  ;;  %v3182_v15 = vmul.f32 %v7601_v1, %v3031_v57 }
 0x724   :  { %v7611_v37 = vmul.f32 0.0625, %v5483_v4 }
 0x725   :  { %v3041_v51 = vpop.f32.mrf.mxu0 }
 0x727   :  { %v5486_v43 = vpop.f32.mrf.mxu0 }
 0x729   :  { %v7569_v32 = vpop.f32.mrf.mxu0 }
 0x72d   :  { %v7571_v48 = vpop.f32.mrf.mxu0 }
 0x72e   :  { %v7621_v45 = vmul.f32 0.0625, %v7571_v48 }
 0x72f   :  { %v7573_v11 = vpop.f32.mrf.mxu0 }
 0x731   :  { %v7577_v46 = vpop.f32.mrf.mxu0 }
 0x733   :  { %v7581_v7 = vpop.f32.mrf.mxu0 }
 0x735   :  { %v5495_v27 = vpop.f32.mrf.mxu0 }
 0x736   :  { %v3193_v16 = vsub.f32 %v5495_v27, %v3177_v49  ;;  %v7613_v49 = vmul.f32 0.0625, %v3041_v51  ;;  %v7615_v27 = vmul.f32 0.0625, %v5486_v43 }
 0x737   :  { %v3081_v12 = vpop.f32.mrf.mxu0 }
 0x738   :  { %v3209_v30 = vmul.f32 0.06666667, %v3193_v16  ;;  %v3192_v26 = vsub.f32 %v3081_v12, %v3176_v33  ;;  %v7618_v33 = vmul.f32 0.0625, %v7569_v32  ;;  %v7624_v16 = vmul.f32 0.0625, %v7573_v11 }
 0x739   :  { %v5498_v38 = vpop.f32.mrf.mxu0 }
 0x73a   :  { %v7594_v5 = vmax.f32 %v3209_v30, 0.0  ;;  %v3208_v24 = vmul.f32 0.06666667, %v3192_v26  ;;  %v3195_v20 = vsub.f32 %v5498_v38, %v3179_v41  ;;  %v7632_v38 = vmul.f32 0.0625, %v7577_v46 }
 0x73b   :  { %v3091_v54 = vpop.f32.mrf.mxu0 }
 0x73c   :  { %5943 = vrsqrt.f32 %v7594_v5  ;;  %v7603_v58 = vmax.f32 %v3208_v24, 0.0  ;;  %v3211_v6 = vmul.f32 0.06666667, %v3195_v20  ;;  %v3194_v10 = vsub.f32 %v3091_v54, %v3178_v34 }
 0x73d   :  { %v5501_v22 = vpop.f32.mrf.mxu0  ;;  %v7635_v24 = vmul.f32 0.0625, %v7581_v7  ;;  %v3185_v34 = vmul.f32 %v5483_v4, %v7611_v37  ;;  %v3184_v54 = vmul.f32 %v7613_v49, %v3041_v51  ;;  %vm3249_vm7 = vcmp.eq.f32.partialorder %v7594_v5, inf }
 0x73e   :  { %v3197_v36 = vsub.f32 %v5501_v22, %v3181_v42  ;;  %5945 = vrsqrt.f32 %v7603_v58  ;;  %v7608_v50 = vmax.f32 %v3211_v6, 0.0  ;;  %v3210_v40 = vmul.f32 0.06666667, %v3194_v10 }
 0x73f   :  { %v3101_v47 = vpop.f32.mrf.mxu0  ;;  %v3187_v42 = vmul.f32 %v5486_v43, %v7615_v27  ;;  %v7643_v10 = vmul.f32 %v7618_v33, %v7569_v32  ;;  %v7647_v22 = vmul.f32 %v7571_v48, %v7621_v45  ;;  %v7658_v32 = vmul.f32 %v7577_v46, %v7632_v38 }
 0x740   :  { %v3213_v39 = vmul.f32 0.06666667, %v3197_v36  ;;  %v3196_v52 = vsub.f32 %v3101_v47, %v3180_v59  ;;  %5947 = vrsqrt.f32 %v7608_v50  ;;  %v7627_v12 = vmax.f32 %v3210_v40, 0.0 }
 0x741   :  { %v5504_v44 = vpop.f32.mrf.mxu0  ;;  %v7651_v59 = vmul.f32 %v7624_v16, %v7573_v11  ;;  %v7662_v48 = vmul.f32 %v7635_v24, %v7581_v7  ;;  %vm3251_vm8 = vcmp.eq.f32.partialorder %v7594_v5, 0.0  ;;  %v3252_v40 = vand.u32 2147483648, %v7594_v5 }
 0x742   :  { %v7629_v57 = vmax.f32 %v3213_v39, 0.0  ;;  %v3212_v41 = vmul.f32 0.06666667, %v3196_v52  ;;  %v3199_v30 = vsub.f32 %v5504_v44, %v3183_v19  ;;  %5949 = vrsqrt.f32 %v7627_v12 }
 0x743   :  { %v3111_v26 = vpop.f32.mrf.mxu0  ;;  %vm3242_vm9 = vcmp.eq.f32.partialorder %v7603_v58, inf  ;;  %vm3244_vm10 = vcmp.eq.f32.partialorder %v7603_v58, 0.0  ;;  %vm3263_vm11 = vcmp.eq.f32.partialorder %v7608_v50, inf  ;;  %vm3265_vm12 = vcmp.eq.f32.partialorder %v7608_v50, 0.0 }
 0x744   :  { %v3198_v20 = vsub.f32 %v3111_v26, %v3182_v15  ;;  %5951 = vrsqrt.f32 %v7629_v57  ;;  %v7654_v4 = vmax.f32 %v3212_v41, 0.0  ;;  %v3215_v51 = vmul.f32 0.06666667, %v3199_v30 }
 0x745   :  { %v5507_v6 = vpop.f32.mrf.mxu0  ;;  %v3245_v15 = vand.u32 2147483648, %v7603_v58  ;;  %vm3256_vm13 = vcmp.eq.f32.partialorder %v7627_v12, inf  ;;  %vm3258_vm14 = vcmp.eq.f32.partialorder %v7627_v12, 0.0  ;;  %vm3277_vm15 = vcmp.eq.f32.partialorder %v7629_v57, inf }
 0x746   :  { %v3214_v43 = vmul.f32 0.06666667, %v3198_v20  ;;  %v3201_v36 = vsub.f32 %v5507_v6, %v3185_v34  ;;  %5953 = vrsqrt.f32 %v7654_v4  ;;  %v7671_v52 = vmax.f32 %v3215_v51, 0.0 }
 0x747   :  { %v3121_v19 = vpop.f32.mrf.mxu0  ;;  %v3266_v51 = vand.u32 2147483648, %v7608_v50  ;;  %vm3279_vm1 = vcmp.eq.f32.partialorder %v7629_v57, 0.0  ;;  %vm3270_vm2 = vcmp.eq.f32.partialorder %v7654_v4, inf  ;;  %vm3272_vm3 = vcmp.eq.f32.partialorder %v7654_v4, 0.0 }
 0x748   :  { %v3200_v11 = vsub.f32 %v3121_v19, %v3184_v54  ;;  %v7673_v7 = vmax.f32 %v3214_v43, 0.0  ;;  %v3217_v44 = vmul.f32 0.06666667, %v3201_v36  ;;  %5955 = vrsqrt.f32 %v7671_v52 }
 0x749   :  { %v5944_v47 = vpop.eup %5943  ;;  %v5510_v39 = vpop.f32.mrf.mxu0  ;;  %v3259_v43 = vand.u32 2147483648, %v7627_v12  ;;  %vm3291_vm4 = vcmp.eq.f32.partialorder %v7671_v52, inf  ;;  %vm3293_vm5 = vcmp.eq.f32.partialorder %v7671_v52, 0.0 }
 0x74a   :  { %v3248_v46 = vmul.f32 %v5944_v47, %v7594_v5  ;;  %v3216_v41 = vmul.f32 0.06666667, %v3200_v11  ;;  %v3203_v34 = vsub.f32 %v5510_v39, %v3187_v42  ;;  %5957 = vrsqrt.f32 %v7673_v7 }
 0x74b   :  { %v3131_v30 = vpop.f32.mrf.mxu0  ;;  %v5946_v26 = vpop.eup %5945  ;;  %v7695_v42 = vmax.f32 %v3217_v44, 0.0  ;;  %vm3284_vm6 = vcmp.eq.f32.partialorder %v7673_v7, inf }
 0x74c   :  { %v3250_v20 = vsel %vm3249_vm7, %v7594_v5, %v3248_v46  ;;  %v3241_v6 = vmul.f32 %v5946_v26, %v7603_v58  ;;  %v7697_v19 = vmax.f32 %v3216_v41, 0.0  ;;  %v3219_v46 = vmul.f32 0.06666667, %v3203_v34 }
 0x74d   :  { %v3253_v54 = vsel %vm3251_vm8, %v3252_v40, %v3250_v20  ;;  %v5948_v36 = vpop.eup %5947  ;;  %v5513_v11 = vpop.f32.mrf.mxu0  ;;  %v3280_v20 = vand.u32 2147483648, %v7629_v57  ;;  %5959 = vrsqrt.f32 %v7695_v42  ;;  %vm3286_vm7 = vcmp.eq.f32.partialorder %v7673_v7, 0.0 }
 0x74e   :  { %v3243_v5 = vsel %vm3242_vm9, %v7603_v58, %v3241_v6  ;;  %v3353_v47 = vadd.f32 1e-06, %v3253_v54  ;;  %v3262_v39 = vmul.f32 %v5948_v36, %v7608_v50  ;;  %v3202_v6 = vsub.f32 %v3131_v30, %v7643_v10 }
 0x74f   :  { %v3246_v40 = vsel %vm3244_vm10, %v3245_v15, %v3243_v5  ;;  %v5950_v23 = vpop.eup %5949  ;;  %5961 = vrsqrt.f32 %v7697_v19  ;;  %v3273_v10 = vand.u32 2147483648, %v7654_v4  ;;  %v3141_v30 = vpop.f32.mrf.mxu0  ;;  %v7717_v54 = vmax.f32 %v3219_v46, 0.0 }
 0x750   :  { %v3352_v26 = vadd.f32 1e-06, %v3246_v40  ;;  %v3264_v44 = vsel %vm3263_vm11, %v7608_v50, %v3262_v39  ;;  %v3255_v41 = vmul.f32 %v5950_v23, %v7627_v12  ;;  %v3218_v50 = vmul.f32 0.06666667, %v3202_v6 }
 0x751   :  { %v5952_v58 = vpop.eup %5951  ;;  %v3267_v15 = vsel %vm3265_vm12, %v3266_v51, %v3264_v44  ;;  %v3205_v51 = vsub.f32 %v5513_v11, %v7647_v22  ;;  %v3204_v39 = vsub.f32 %v3141_v30, %v7651_v59  ;;  %v3294_v11 = vand.u32 2147483648, %v7671_v52 }
 0x752   :  { %5963 = vrcp.f32 %v3352_v26  ;;  %v3276_v34 = vmul.f32 %v5952_v58, %v7629_v57  ;;  %v3257_v36 = vsel %vm3256_vm13, %v7627_v12, %v3255_v41  ;;  %v3355_v5 = vadd.f32 1e-06, %v3267_v15  ;;  %v5516_v41 = vpop.f32.mrf.mxu0 }
 0x753   :  { %5965 = vrcp.f32 %v3353_v47  ;;  %v5954_v23 = vpop.eup %5953  ;;  %v3260_v47 = vsel %vm3258_vm14, %v3259_v43, %v3257_v36  ;;  %v7736_v12 = vmax.f32 %v3218_v50, 0.0  ;;  %v3220_v15 = vmul.f32 0.06666667, %v3204_v39 }
 0x754   :  { %v3278_v40 = vsel %vm3277_vm15, %v7629_v57, %v3276_v34  ;;  %v3354_v46 = vadd.f32 1e-06, %v3260_v47  ;;  %v3269_v44 = vmul.f32 %v5954_v23, %v7654_v4  ;;  %5967 = vrsqrt.f32 %v7717_v54 }
 0x755   :  { %v3281_v26 = vsel %vm3279_vm1, %v3280_v20, %v3278_v40  ;;  %v5956_v43 = vpop.eup %5955  ;;  %v3221_v57 = vmul.f32 0.06666667, %v3205_v51  ;;  %v3287_v36 = vand.u32 2147483648, %v7673_v7  ;;  %vm3305_vm8 = vcmp.eq.f32.partialorder %v7695_v42, inf }
 0x756   :  { %v3357_v22 = vadd.f32 1e-06, %v3281_v26  ;;  %5969 = vrcp.f32 %v3354_v46  ;;  %v3271_v59 = vsel %vm3270_vm2, %v7654_v4, %v3269_v44  ;;  %v3290_v58 = vmul.f32 %v5956_v43, %v7671_v52 }
 0x757   :  { %v5958_v20 = vpop.eup %5957  ;;  %5971 = vrcp.f32 %v3355_v5  ;;  %v3274_v6 = vsel %vm3272_vm3, %v3273_v10, %v3271_v59  ;;  %v7752_v4 = vmax.f32 %v3221_v57, 0.0  ;;  %v3207_v23 = vsub.f32 %v5516_v41, %v7658_v32 }
 0x758   :  { %v3356_v30 = vadd.f32 1e-06, %v3274_v6  ;;  %v3283_v34 = vmul.f32 %v5958_v20, %v7673_v7  ;;  %5973 = vrsqrt.f32 %v7736_v12  ;;  %v3292_v50 = vsel %vm3291_vm4, %v7671_v52, %v3290_v58 }
 0x759   :  { %5975 = vrcp.f32 %v3357_v22  ;;  %v3295_v10 = vsel %vm3293_vm5, %v3294_v11, %v3292_v50  ;;  %v7763_v39 = vmax.f32 %v3220_v15, 0.0  ;;  %vm3307_vm9 = vcmp.eq.f32.partialorder %v7695_v42, 0.0  ;;  %v3151_v22 = vpop.f32.mrf.mxu0 }
 0x75a   :  { %5977 = vrcp.f32 %v3356_v30  ;;  %v3285_v51 = vsel %vm3284_vm6, %v7673_v7, %v3283_v34  ;;  %v5960_v5 = vpop.eup %5959  ;;  %v3359_v47 = vadd.f32 1e-06, %v3295_v10  ;;  %v3308_v44 = vand.u32 2147483648, %v7695_v42 }
 0x75b   :  { %v3288_v40 = vsel %vm3286_vm7, %v3287_v36, %v3285_v51  ;;  %5979 = vrsqrt.f32 %v7752_v4  ;;  %v3304_v52 = vmul.f32 %v5960_v5, %v7695_v42  ;;  %vm3298_vm10 = vcmp.eq.f32.partialorder %v7697_v19, inf }
 0x75c   :  { %v5962_v46 = vpop.eup %5961  ;;  %v3358_v26 = vadd.f32 1e-06, %v3288_v40  ;;  %5981 = vrcp.f32 %v3359_v47  ;;  %vm3300_vm11 = vcmp.eq.f32.partialorder %v7697_v19, 0.0  ;;  %v3301_v59 = vand.u32 2147483648, %v7697_v19 }
 0x75d   :  { %v3297_v32 = vmul.f32 %v5962_v46, %v7697_v19  ;;  %v3306_v43 = vsel %vm3305_vm8, %v7695_v42, %v3304_v52  ;;  %v3223_v57 = vmul.f32 0.06666667, %v3207_v23  ;;  %v3206_v58 = vsub.f32 %v3151_v22, %v7662_v48 }
 0x75e   :  { %5983 = vrcp.f32 %v3358_v26  ;;  %v3309_v20 = vsel %vm3307_vm9, %v3308_v44, %v3306_v43  ;;  %vm3319_vm12 = vcmp.eq.f32.partialorder %v7717_v54, inf  ;;  %v3322_v23 = vand.u32 2147483648, %v7717_v54 }
 0x75f   :  { %v7768_v11 = vpop.eup %5963  ;;  %v3299_v6 = vsel %vm3298_vm10, %v7697_v19, %v3297_v32  ;;  %5985 = vrsqrt.f32 %v7763_v39  ;;  %v3361_v15 = vadd.f32 1e-06, %v3309_v20  ;;  %v7786_v30 = vmax.f32 %v3223_v57, 0.0 }
 0x760   :  { %v7773_v7 = vpop.eup %5965  ;;  %5533 = vmatprep.mubr.msk.f32.mxu1 %vm236_vm0, %v7768_v11  ;;  %v3302_v41 = vsel %vm3300_vm11, %v3301_v59, %v3299_v6  ;;  %v3222_v36 = vmul.f32 0.06666667, %v3206_v58  ;;  %vm3321_vm13 = vcmp.eq.f32.partialorder %v7717_v54, 0.0  ;;  %vm3312_vm14 = vcmp.eq.f32.partialorder %v7736_v12, inf }
 0x761   :  { %5534 = vmatmul.mubr.msk.f32.vlgmr.msra.gmra.mxu1 %vm236_vm0, %v7773_v7  ;;  %v5968_v42 = vpop.eup %5967  ;;  %v3360_v34 = vadd.f32 1e-06, %v3302_v41  ;;  %5987 = vrcp.f32 %v3361_v15  ;;  %v3315_v52 = vand.u32 2147483648, %v7736_v12  ;;  %vm3314_vm15 = vcmp.eq.f32.partialorder %v7736_v12, 0.0 }
 0x762   :  { %v3318_v50 = vmul.f32 %v5968_v42, %v7717_v54  ;;  %v7792_v19 = vmax.f32 %v3222_v36, 0.0  ;;  %vm3333_vm1 = vcmp.eq.f32.partialorder %v7752_v4, inf  ;;  %vm3335_vm2 = vcmp.eq.f32.partialorder %v7752_v4, 0.0 }
 0x763   :  { %v7789_v10 = vpop.eup %5969  ;;  %5989 = vrcp.f32 %v3360_v34  ;;  %vm3326_vm3 = vcmp.eq.f32.partialorder %v7763_v39, inf  ;;  %v3329_v42 = vand.u32 2147483648, %v7763_v39  ;;  %vm3328_vm4 = vcmp.eq.f32.partialorder %v7763_v39, 0.0 }
 0x764   :  { %v7794_v48 = vpop.eup %5971  ;;  %v3320_v51 = vsel %vm3319_vm12, %v7717_v54, %v3318_v50  ;;  %5991 = vrsqrt.f32 %v7786_v30  ;;  %5536 = vmatprep.mubr.msk.f32.mxu1 %vm236_vm0, %v7789_v10  ;;  %vm3347_vm5 = vcmp.eq.f32.partialorder %v7786_v30, inf  ;;  %vm3349_vm6 = vcmp.eq.f32.partialorder %v7786_v30, 0.0 }
 0x765   :  { %v5974_v5 = vpop.eup %5973  ;;  %5993 = vrsqrt.f32 %v7792_v19  ;;  %5537 = vmatmul.mubr.msk.f32.gmra.mxu1 %vm236_vm0, %v7794_v48  ;;  %v3323_v40 = vsel %vm3321_vm13, %v3322_v23, %v3320_v51  ;;  %vm3340_vm7 = vcmp.eq.f32.partialorder %v7792_v19, inf  ;;  %vm3342_vm8 = vcmp.eq.f32.partialorder %v7792_v19, 0.0 }
 0x766   :  { %v7805_v47 = vpop.eup %5975  ;;  %v3311_v46 = vmul.f32 %v5974_v5, %v7736_v12  ;;  %v3363_v54 = vadd.f32 1e-06, %v3323_v40 }
 0x767   :  { %v7808_v26 = vpop.eup %5977 }
 0x768   :  { %v5980_v44 = vpop.eup %5979  ;;  %v3313_v22 = vsel %vm3312_vm14, %v7736_v12, %v3311_v46  ;;  %5539 = vmatprep.mubr.msk.f32.mxu1 %vm236_vm0, %v7808_v26  ;;  %v3336_v12 = vand.u32 2147483648, %v7752_v4 }
 0x769   :  { %v3316_v32 = vsel %vm3314_vm15, %v3315_v52, %v3313_v22  ;;  %v3332_v43 = vmul.f32 %v5980_v44, %v7752_v4  ;;  %5540 = vmatmul.mubr.msk.f32.gmra.mxu1 %vm236_vm0, %v7805_v47  ;;  %v7819_v59 = vpop.eup %5981  ;;  %v3350_v52 = vand.u32 2147483648, %v7786_v30  ;;  %v3343_v22 = vand.u32 2147483648, %v7792_v19 }
 0x76a   :  { %v3362_v57 = vadd.f32 1e-06, %v3316_v32 }
 0x76b   :  { %v7822_v20 = vpop.eup %5983  ;;  %v3334_v6 = vsel %vm3333_vm1, %v7752_v4, %v3332_v43 }
 0x76c   :  { %v5986_v58 = vpop.eup %5985  ;;  %5995 = vrcp.f32 %v3362_v57  ;;  %5542 = vmatprep.mubr.msk.f32.mxu1 %vm236_vm0, %v7822_v20  ;;  %v3337_v15 = vsel %vm3335_vm2, %v3336_v12, %v3334_v6 }
 0x76d   :  { %5997 = vrcp.f32 %v3363_v54  ;;  %v3325_v41 = vmul.f32 %v5986_v58, %v7763_v39  ;;  %5543 = vmatmul.mubr.msk.f32.gmra.mxu1 %vm236_vm0, %v7819_v59  ;;  %v3365_v50 = vadd.f32 1e-06, %v3337_v15 }
 0x76e   :  { %v5988_v34 = vpop.eup %5987 }
 0x76f   :  { %v3327_v36 = vsel %vm3326_vm3, %v7763_v39, %v3325_v41 }
 0x770   :  { %v5990_v4 = vpop.eup %5989  ;;  %v3330_v51 = vsel %vm3328_vm4, %v3329_v42, %v3327_v36  ;;  %v3385_v36 = vmul.f32 %v7773_v7, %v7575_v28  ;;  %v3389_v28 = vmul.f32 %v7805_v47, %v7590_v61 }
 0x771   :  { %v5992_v23 = vpop.eup %5991  ;;  %v3364_v5 = vadd.f32 1e-06, %v3330_v51  ;;  %5545 = vmatprep.mubr.msk.f32.mxu1 %vm236_vm0, %v5990_v4  ;;  %v3387_v51 = vmul.f32 %v7794_v48, %v7584_v60  ;;  %v3391_v60 = vmul.f32 %v7819_v59, %v7597_v0  ;;  %v50_v48 = vld [vmem:[#allocation2 + $0x80] sm:$0xff] }
 0x772   :  { %v5994_v40 = vpop.eup %5993  ;;  %v3346_v46 = vmul.f32 %v5992_v23, %v7786_v30  ;;  %5546 = vmatmul.mubr.msk.f32.gmra.mxu1 %vm236_vm0, %v5988_v34 }
 0x773   :  { %5999 = vrcp.f32 %v3364_v5  ;;  %v3339_v39 = vmul.f32 %v5994_v40, %v7792_v19 }
 0x774   :  { %6001 = vrcp.f32 %v3365_v50  ;;  %v3348_v44 = vsel %vm3347_vm5, %v7786_v30, %v3346_v46  ;;  %v3386_v50 = vmul.f32 %v7789_v10, %v7587_v2  ;;  %v3390_v2 = vmul.f32 %v7822_v20, %v7601_v1  ;;  %v52_v10 = vld [vmem:[#allocation2 + $0x90] sm:$0xff] }
 0x775   :  { %v3351_v54 = vsel %vm3349_vm6, %v3350_v52, %v3348_v44  ;;  %v3341_v32 = vsel %vm3340_vm7, %v7792_v19, %v3339_v39  ;;  %v3384_v19 = vmul.f32 %v7768_v11, %v7579_v14  ;;  %v3388_v14 = vmul.f32 %v7808_v26, %v7592_v35 }
 0x776   :  { %v3367_v43 = vadd.f32 1e-06, %v3351_v54  ;;  %v3344_v57 = vsel %vm3342_vm8, %v3343_v22, %v3341_v32  ;;  %v3392_v11 = vmul.f32 %v5990_v4, %v7613_v49  ;;  %v3393_v35 = vmul.f32 %v5988_v34, %v7611_v37 }
 0x777   :  { %v3366_v6 = vadd.f32 1e-06, %v3344_v57 }
 0x779   :  { %v5996_v12 = vpop.eup %5995  ;;  %6003 = vrcp.f32 %v3366_v6 }
 0x77a   :  { %v5998_v58 = vpop.eup %5997  ;;  %6005 = vrcp.f32 %v3367_v43  ;;  %5548 = vmatprep.mubr.msk.f32.mxu1 %vm236_vm0, %v5996_v12  ;;  %v3394_v61 = vmul.f32 %v5996_v12, %v7618_v33  ;;  %v57_v33 = vld [vmem:[#allocation2 + $0xb8] sm:$0xff] }
 0x77b   :  { %5549 = vmatmul.mubr.msk.f32.gmra.mxu1 %vm236_vm0, %v5998_v58  ;;  %v3395_v1 = vmul.f32 %v5998_v58, %v7615_v27  ;;  %5581 = vmatprep.subr.mxu0 %v57_v33  ;;  %v56_v27 = vld [vmem:[#allocation2 + $0xb0] sm:$0xff]  ;;  %v7909_v58 = vld [vmem:[%s8250_s1 + $0x7] ss:$0 sm:$0xff] }
 0x77c   :  { %5582 = vmatpush3.msra.mxu0 %v57_v33 }
 0x77d   :  { %5583 = vmatprep.subr.mxu0 %v56_v27 }
 0x77e   :  { %5584 = vmatpush3.msra.mxu0 %v56_v27 }
 0x780   :  { %v6000_v30 = vpop.eup %5999 }
 0x781   :  { %v6002_v15 = vpop.eup %6001  ;;  %5551 = vmatprep.mubr.msk.f32.mxu1 %vm236_vm0, %v6000_v30  ;;  %v3396_v7 = vmul.f32 %v6000_v30, %v7624_v16  ;;  %v55_v16 = vld [vmem:[#allocation2 + $0xa8] sm:$0xff] }
 0x782   :  { %5552 = vmatmul.mubr.msk.f32.gmra.mxu1 %vm236_vm0, %v6002_v15  ;;  %v3397_v0 = vmul.f32 %v6002_v15, %v7621_v45  ;;  %5585 = vmatprep.subr.mxu0 %v55_v16  ;;  %v54_v45 = vld [vmem:[#allocation2 + $0xa0] sm:$0xff] }
 0x783   :  { %5586 = vmatpush3.msra.mxu0 %v55_v16 }
 0x784   :  { %5587 = vmatprep.subr.mxu0 %v54_v45 }
 0x785   :  { %5588 = vmatpush3.msra.mxu0 %v54_v45 }
 0x786   :  { %v6004_v41 = vpop.eup %6003 }
 0x787   :  { %v6006_v42 = vpop.eup %6005  ;;  %5554 = vmatprep.mubr.msk.f32.mxu1 %vm236_vm0, %v6004_v41  ;;  %v3398_v49 = vmul.f32 %v6004_v41, %v7635_v24  ;;  %v53_v24 = vld [vmem:[#allocation2 + $0x98] sm:$0xff] }
 0x788   :  { %5555 = vmatmul.mubr.msk.f32.gmra.mxu1 %vm236_vm0, %v6006_v42  ;;  %v3399_v37 = vmul.f32 %v6006_v42, %v7632_v38  ;;  %5589 = vmatprep.subr.mxu0 %v53_v24  ;;  %v51_v38 = vld [vmem:[#allocation2 + $0x88] sm:$0xff] }
 0x789   :  { %5557 = vmatprep.mubr.msk.f32.mxu1 %vm236_vm0, %v3384_v19  ;;  %5590 = vmatpush3.msra.mxu0 %v53_v24 }
 0x78a   :  { %5591 = vmatprep.subr.mxu0 %v52_v10 }
 0x78b   :  { %5592 = vmatpush3.msra.mxu0 %v52_v10 }
 0x78c   :  { %5558 = vmatmul.mubr.msk.f32.gmra.mxu1 %vm236_vm0, %v3385_v36  ;;  %5593 = vmatprep.subr.mxu0 %v51_v38 }
 0x78d   :  { %5560 = vmatprep.mubr.msk.f32.mxu1 %vm236_vm0, %v3386_v50  ;;  %5594 = vmatpush3.msra.mxu0 %v51_v38 }
 0x78e   :  { %5595 = vmatprep.subr.mxu0 %v50_v48 }
 0x78f   :  { %5596 = vmatpush3.msra.mxu0 %v50_v48 }
 0x790   :  { %5561 = vmatmul.mubr.msk.f32.gmra.mxu1 %vm236_vm0, %v3387_v51 }
 0x791   :  { %5563 = vmatprep.mubr.msk.f32.mxu1 %vm236_vm0, %v3388_v14 }
 0x794   :  { %5564 = vmatmul.mubr.msk.f32.gmra.mxu1 %vm236_vm0, %v3389_v28 }
 0x795   :  { %5566 = vmatprep.mubr.msk.f32.mxu1 %vm236_vm0, %v3390_v2 }
 0x798   :  { %5567 = vmatmul.mubr.msk.f32.gmra.mxu1 %vm236_vm0, %v3391_v60 }
 0x799   :  { %5569 = vmatprep.mubr.msk.f32.mxu1 %vm236_vm0, %v3392_v11 }
 0x79c   :  { %5570 = vmatmul.mubr.msk.f32.gmra.mxu1 %vm236_vm0, %v3393_v35 }
 0x79d   :  { %5572 = vmatprep.mubr.msk.f32.mxu1 %vm236_vm0, %v3394_v61 }
 0x7a0   :  { %5573 = vmatmul.mubr.msk.f32.gmra.mxu1 %vm236_vm0, %v3395_v1 }
 0x7a1   :  { %5575 = vmatprep.mubr.msk.f32.mxu1 %vm236_vm0, %v3396_v7 }
 0x7a4   :  { %5576 = vmatmul.mubr.msk.f32.gmra.mxu1 %vm236_vm0, %v3397_v0 }
 0x7a5   :  { %5578 = vmatprep.mubr.msk.f32.mxu1 %vm236_vm0, %v3398_v49 }
 0x7a8   :  { %5579 = vmatmul.mubr.msk.f32.gmra.mxu1 %vm236_vm0, %v3399_v37 }
 0x821   :  { %v5535_v47 = vpop.f32.mrf.mxu1 }
 0x822   :  { %v3722_v54 = vmul.f32 %v5535_v47, %v7459_v63 }
 0x823   :  { %v3562_v26 = vpop.f32.mrf.mxu1 }
 0x824   :  { %v3721_v43 = vmul.f32 %v3562_v26, %v7457_v62  ;;  %v3738_v12 = vadd.f32 %v3722_v54, %v7459_v63 }
 0x825   :  { %v5538_v59 = vpop.f32.mrf.mxu1 }
 0x826   :  { %v3724_v6 = vmul.f32 %v5538_v59, %v7467_v17  ;;  %v3737_v41 = vadd.f32 %v3721_v43, %v7457_v62 }
 0x827   :  { %v3572_v20 = vpop.f32.mrf.mxu1 }
 0x828   :  { %v3723_v42 = vmul.f32 %v3572_v20, %v7465_v3  ;;  %v3740_v51 = vadd.f32 %v3724_v6, %v7467_v17 }
 0x829   :  { %v5541_v34 = vpop.f32.mrf.mxu1 }
 0x82a   :  { %v3726_v63 = vmul.f32 %v5541_v34, %v7475_v8  ;;  %v3739_v35 = vadd.f32 %v3723_v42, %v7465_v3 }
 0x82b   :  { %v3582_v4 = vpop.f32.mrf.mxu1 }
 0x82c   :  { %v3725_v28 = vmul.f32 %v3582_v4, %v7473_v18  ;;  %v3742_v33 = vadd.f32 %v3726_v63, %v7475_v8 }
 0x82d   :  { %v5544_v23 = vpop.f32.mrf.mxu1 }
 0x82e   :  { %v3728_v61 = vmul.f32 %v5544_v23, %v7483_v25  ;;  %v3741_v3 = vadd.f32 %v3725_v28, %v7473_v18 }
 0x82f   :  { %v3592_v5 = vpop.f32.mrf.mxu1 }
 0x830   :  { %v3727_v0 = vmul.f32 %v3592_v5, %v7481_v31  ;;  %v3744_v47 = vadd.f32 %v3728_v61, %v7483_v25 }
 0x832   :  { %v5547_v40 = vpop.f32.mrf.mxu1  ;;  %v3743_v18 = vadd.f32 %v3727_v0, %v7481_v31 }
 0x833   :  { %v3730_v26 = vmul.f32 %v5547_v40, %v7491_v13 }
 0x834   :  { %v3602_v46 = vpop.f32.mrf.mxu1 }
 0x835   :  { %v3729_v34 = vmul.f32 %v3602_v46, %v7489_v9 }
 0x83b   :  { %v5550_v52 = vpop.f32.mrf.mxu1 }
 0x83c   :  { %v3732_v5 = vmul.f32 %v5550_v52, %v7499_v29 }
 0x83d   :  { %v3612_v39 = vpop.f32.mrf.mxu1 }
 0x83e   :  { %v3731_v43 = vmul.f32 %v3612_v39, %v7497_v53  ;;  %v3748_v63 = vadd.f32 %v3732_v5, %v7499_v29 }
 0x840   :  { %v3747_v28 = vadd.f32 %v3731_v43, %v7497_v53 }
 0x842   :  { %v7894_v44 = vpop.f32.mrf.mxu1 }
 0x843   :  { %v3734_v39 = vmul.f32 %v7894_v44, %v7507_v21 }
 0x844   :  { %v7896_v22 = vpop.f32.mrf.mxu1 }
 0x848   :  { %v7899_v32 = vpop.f32.mrf.mxu1 }
 0x84a   :  { %v7902_v57 = vpop.f32.mrf.mxu1 }
 0x84c   :  { %v5559_v30 = vpop.f32.mrf.mxu1 }
 0x84d   :  { %v3754_v15 = vsub.f32 %v3738_v12, %v5559_v30 }
 0x84e   :  { %v3642_v19 = vpop.f32.mrf.mxu1 }
 0x84f   :  { %v7914_v36 = vadd.f32 %v7909_v58, %v3754_v15  ;;  %v3753_v50 = vsub.f32 %v3737_v41, %v3642_v19  ;;  %v3746_v15 = vadd.f32 %v3730_v26, %v7491_v13  ;;  %v3745_v19 = vadd.f32 %v3729_v34, %v7489_v9 }
 0x850   :  { %v5562_v14 = vpop.f32.mrf.mxu1  ;;  %v3736_v9 = vmul.f32 %v7899_v32, %v7515_v55  ;;  %v3750_v32 = vadd.f32 %v3734_v39, %v7507_v21 }
 0x851   :  { %v3806_v2 = vmin.f32 %v7914_v36, 0.0  ;;  %v7921_v60 = vadd.f32 %v7909_v58, %v3753_v50  ;;  %v3756_v62 = vsub.f32 %v3740_v51, %v5562_v14  ;;  %vm3790_vm9 = vcmp.gt.f32.partialorder %v7914_v36, 0.0 }
 0x852   :  { %v3652_v11 = vpop.f32.mrf.mxu1 }
 0x853   :  { %v3823_v1 = vmul.f32 1.442695, %v3806_v2  ;;  %v3805_v7 = vmin.f32 %v7921_v60, 0.0  ;;  %v7927_v17 = vadd.f32 %v7909_v58, %v3756_v62  ;;  %v3755_v49 = vsub.f32 %v3739_v35, %v3652_v11  ;;  %v8297_v35 = vld [vmem:[#allocation11_spill] sm:$0xff] }
 0x854   :  { %v5565_v37 = vpop.f32.mrf.mxu1  ;;  %v3733_v2 = vmul.f32 %v7896_v22, %v7505_v56  ;;  %v3735_v29 = vmul.f32 %v7902_v57, %v8297_v35  ;;  %vm3789_vm10 = vcmp.gt.f32.partialorder %v7921_v60, 0.0 }
 0x855   :  { %6007 = vpow2.f32 %v3823_v1  ;;  %v3821_v27 = vmul.f32 1.442695, %v3805_v7  ;;  %v3808_v16 = vmin.f32 %v7927_v17, 0.0  ;;  %v7934_v45 = vadd.f32 %v7909_v58, %v3755_v49 }
 0x856   :  { %v3758_v24 = vsub.f32 %v3742_v33, %v5565_v37  ;;  %v3662_v10 = vpop.f32.mrf.mxu1  ;;  %v7987_v21 = vadd.f32 %v3735_v29, %v8297_v35  ;;  %vm3792_vm11 = vcmp.gt.f32.partialorder %v7927_v17, 0.0 }
 0x857   :  { %6009 = vpow2.f32 %v3821_v27  ;;  %v3827_v38 = vmul.f32 1.442695, %v3808_v16  ;;  %v3757_v48 = vsub.f32 %v3741_v3, %v3662_v10  ;;  %v3807_v8 = vmin.f32 %v7934_v45, 0.0 }
 0x858   :  { %v7940_v59 = vadd.f32 %v7909_v58, %v3758_v24  ;;  %v5568_v20 = vpop.f32.mrf.mxu1  ;;  %v3749_v24 = vadd.f32 %v3733_v2, %v7505_v56  ;;  %v3752_v10 = vadd.f32 %v3736_v9, %v7515_v55  ;;  %vm3791_vm12 = vcmp.gt.f32.partialorder %v7934_v45, 0.0 }
 0x859   :  { %6011 = vpow2.f32 %v3827_v38  ;;  %v7945_v4 = vadd.f32 %v7909_v58, %v3757_v48  ;;  %v3760_v23 = vsub.f32 %v3744_v47, %v5568_v20  ;;  %v3825_v25 = vmul.f32 1.442695, %v3807_v8 }
 0x85a   :  { %v3810_v40 = vmin.f32 %v7940_v59, 0.0  ;;  %v3672_v54 = vpop.f32.mrf.mxu1  ;;  %vm3794_vm13 = vcmp.gt.f32.partialorder %v7940_v59, 0.0 }
 0x85b   :  { %v3809_v6 = vmin.f32 %v7945_v4, 0.0  ;;  %v7952_v12 = vadd.f32 %v7909_v58, %v3760_v23  ;;  %v3759_v31 = vsub.f32 %v3743_v18, %v3672_v54  ;;  %6013 = vpow2.f32 %v3825_v25 }
 0x85c   :  { %v3831_v46 = vmul.f32 1.442695, %v3810_v40  ;;  %v5571_v30 = vpop.f32.mrf.mxu1  ;;  %vm3793_vm14 = vcmp.gt.f32.partialorder %v7945_v4, 0.0 }
 0x85d   :  { %v3829_v41 = vmul.f32 1.442695, %v3809_v6  ;;  %v3812_v52 = vmin.f32 %v7952_v12, 0.0  ;;  %v7957_v42 = vadd.f32 %v7909_v58, %v3759_v31  ;;  %v3762_v50 = vsub.f32 %v3746_v15, %v5571_v30 }
 0x85e   :  { %6015 = vpow2.f32 %v3831_v46  ;;  %v3682_v51 = vpop.f32.mrf.mxu1  ;;  %vm3796_vm15 = vcmp.gt.f32.partialorder %v7952_v12, 0.0 }
 0x85f   :  { %6017 = vpow2.f32 %v3829_v41  ;;  %v3835_v14 = vmul.f32 1.442695, %v3812_v52  ;;  %v3811_v13 = vmin.f32 %v7957_v42, 0.0  ;;  %v7970_v62 = vadd.f32 %v7909_v58, %v3762_v50 }
 0x860   :  { %v3761_v44 = vsub.f32 %v3745_v19, %v3682_v51  ;;  %v5574_v11 = vpop.f32.mrf.mxu1  ;;  %vm3795_vm1 = vcmp.gt.f32.partialorder %v7957_v42, 0.0 }
 0x861   :  { %6019 = vpow2.f32 %v3835_v14  ;;  %v3833_v61 = vmul.f32 1.442695, %v3811_v13  ;;  %v3764_v1 = vsub.f32 %v3748_v63, %v5574_v11  ;;  %v3814_v53 = vmin.f32 %v7970_v62, 0.0 }
 0x862   :  { %v6008_v7 = vpop.eup %6007  ;;  %v7976_v0 = vadd.f32 %v7909_v58, %v3761_v44  ;;  %v3692_v22 = vpop.f32.mrf.mxu1  ;;  %vm3798_vm2 = vcmp.gt.f32.partialorder %v7970_v62, 0.0 }
 0x863   :  { %v4705_v49 = vadd.f32 -1.0, %v6008_v7  ;;  %6021 = vpow2.f32 %v3833_v61  ;;  %v7980_v37 = vadd.f32 %v7909_v58, %v3764_v1  ;;  %v3763_v33 = vsub.f32 %v3747_v28, %v3692_v22 }
 0x864   :  { %v6010_v27 = vpop.eup %6009  ;;  %v3839_v57 = vmul.f32 1.442695, %v3814_v53  ;;  %v3813_v16 = vmin.f32 %v7976_v0, 0.0  ;;  %v5577_v3 = vpop.f32.mrf.mxu1  ;;  %vm3797_vm3 = vcmp.gt.f32.partialorder %v7976_v0, 0.0 }
 0x865   :  { %v3870_v38 = vmul.f32 1.6732632, %v4705_v49  ;;  %v4704_v48 = vadd.f32 -1.0, %v6010_v27  ;;  %v3816_v47 = vmin.f32 %v7980_v37, 0.0  ;;  %v7990_v20 = vadd.f32 %v7909_v58, %v3763_v33 }
 0x866   :  { %v6012_v26 = vpop.eup %6011  ;;  %6023 = vpow2.f32 %v3839_v57  ;;  %v3837_v8 = vmul.f32 1.442695, %v3813_v16  ;;  %v3766_v18 = vsub.f32 %v3750_v32, %v5577_v3  ;;  %v3702_v34 = vpop.f32.mrf.mxu1  ;;  %vm3800_vm4 = vcmp.gt.f32.partialorder %v7980_v37, 0.0 }
 0x867   :  { %v3869_v56 = vmul.f32 1.6732632, %v4704_v48  ;;  %v4707_v23 = vadd.f32 -1.0, %v6012_v26  ;;  %v3843_v55 = vmul.f32 1.442695, %v3816_v47  ;;  %v3886_v5 = vsel %vm3790_vm9, %v7914_v36, %v3870_v38 }
 0x868   :  { %6025 = vpow2.f32 %v3837_v8  ;;  %v3815_v25 = vmin.f32 %v7990_v20, 0.0  ;;  %v5580_v40 = vpop.f32.mrf.mxu1  ;;  %v6014_v54 = vpop.eup %6013  ;;  %v7998_v31 = vadd.f32 %v7909_v58, %v3766_v18  ;;  %v3765_v41 = vsub.f32 %v3749_v24, %v3702_v34 }
 0x869   :  { %v3885_v43 = vsel %vm3789_vm10, %v7921_v60, %v3869_v56  ;;  %v3872_v6 = vmul.f32 1.6732632, %v4707_v23  ;;  %6027 = vpow2.f32 %v3843_v55  ;;  %v4706_v30 = vadd.f32 -1.0, %v6014_v54 }
 0x86a   :  { %v3901_v46 = vmul.f32 1.050701, %v3885_v43  ;;  %v3841_v15 = vmul.f32 1.442695, %v3815_v25  ;;  %v3902_v36 = vmul.f32 1.050701, %v3886_v5  ;;  %v3768_v39 = vsub.f32 %v3752_v10, %v5580_v40  ;;  %v3712_v50 = vpop.f32.mrf.mxu1 }
 0x86b   :  { %v6016_v52 = vpop.eup %6015  ;;  %v3818_v19 = vmin.f32 %v7998_v31, 0.0  ;;  %v3871_v60 = vmul.f32 1.6732632, %v4706_v30  ;;  %v3888_v14 = vsel %vm3792_vm11, %v7927_v17, %v3872_v6  ;;  %v8006_v2 = vadd.f32 %v7909_v58, %v3765_v41 }
 0x86c   :  { %v6018_v51 = vpop.eup %6017  ;;  %v4709_v63 = vadd.f32 -1.0, %v6016_v52  ;;  %6029 = vpow2.f32 %v3841_v15  ;;  %5597 = vmatprep.mubr.msk.f32.mxu0 %vm236_vm0, %v3901_v46  ;;  %v8011_v35 = vadd.f32 %v7909_v58, %v3768_v39  ;;  %v3767_v29 = vsub.f32 %v7987_v21, %v3712_v50 }
 0x86d   :  { %v4708_v13 = vadd.f32 -1.0, %v6018_v51  ;;  %v3847_v28 = vmul.f32 1.442695, %v3818_v19  ;;  %5598 = vmatmul.mubr.msk.f32.vlgmr.msra.gmra.mxu0 %vm236_vm0, %v3902_v36  ;;  %v3887_v44 = vsel %vm3791_vm12, %v7934_v45, %v3871_v60  ;;  %v3904_v53 = vmul.f32 1.050701, %v3888_v14 }
 0x86e   :  { %v6020_v9 = vpop.eup %6019  ;;  %v3874_v11 = vmul.f32 1.6732632, %v4709_v63  ;;  %v3903_v61 = vmul.f32 1.050701, %v3887_v44  ;;  %v3817_v22 = vmin.f32 %v8006_v2, 0.0  ;;  %v3820_v16 = vmin.f32 %v8011_v35, 0.0 }
 0x86f   :  { %v3873_v1 = vmul.f32 1.6732632, %v4708_v13  ;;  %v4711_v7 = vadd.f32 -1.0, %v6020_v9  ;;  %6031 = vpow2.f32 %v3847_v28  ;;  %v8022_v3 = vadd.f32 %v7909_v58, %v3767_v29 }
 0x870   :  { %v6022_v17 = vpop.eup %6021  ;;  %v3890_v45 = vsel %vm3794_vm13, %v7940_v59, %v3874_v11  ;;  %5600 = vmatprep.mubr.msk.f32.mxu0 %vm236_vm0, %v3903_v61  ;;  %v3845_v57 = vmul.f32 1.442695, %v3817_v22  ;;  %v3851_v38 = vmul.f32 1.442695, %v3820_v16  ;;  %vm3799_vm5 = vcmp.gt.f32.partialorder %v7990_v20, 0.0 }
 0x871   :  { %v3889_v32 = vsel %vm3793_vm14, %v7945_v4, %v3873_v1  ;;  %v3876_v49 = vmul.f32 1.6732632, %v4711_v7  ;;  %v4710_v33 = vadd.f32 -1.0, %v6022_v17  ;;  %5601 = vmatmul.mubr.msk.f32.gmra.mxu0 %vm236_vm0, %v3904_v53  ;;  %v3906_v4 = vmul.f32 1.050701, %v3890_v45 }
 0x872   :  { %v3905_v27 = vmul.f32 1.050701, %v3889_v32  ;;  %6033 = vpow2.f32 %v3845_v57  ;;  %v3819_v21 = vmin.f32 %v8022_v3, 0.0  ;;  %vm3802_vm6 = vcmp.gt.f32.partialorder %v7998_v31, 0.0 }
 0x873   :  { %v6024_v24 = vpop.eup %6023  ;;  %v3875_v59 = vmul.f32 1.6732632, %v4710_v33  ;;  %v3892_v47 = vsel %vm3796_vm15, %v7952_v12, %v3876_v49  ;;  %6035 = vpow2.f32 %v3851_v38  ;;  %vm3801_vm7 = vcmp.gt.f32.partialorder %v8006_v2, 0.0 }
 0x874   :  { %v4713_v10 = vadd.f32 -1.0, %v6024_v24  ;;  %5603 = vmatprep.mubr.msk.f32.mxu0 %vm236_vm0, %v3905_v27  ;;  %v3849_v23 = vmul.f32 1.442695, %v3819_v21  ;;  %v3908_v55 = vmul.f32 1.050701, %v3892_v47  ;;  %vm3804_vm8 = vcmp.gt.f32.partialorder %v8011_v35, 0.0 }
 0x875   :  { %v6026_v48 = vpop.eup %6025  ;;  %v3891_v58 = vsel %vm3795_vm1, %v7957_v42, %v3875_v59  ;;  %5604 = vmatmul.mubr.msk.f32.gmra.mxu0 %vm236_vm0, %v3906_v4  ;;  %vm3803_vm9 = vcmp.gt.f32.partialorder %v8022_v3, 0.0  ;;  %vm6100_vm10 = vmmov 0   ;;  %v4720_v24 = vld [vmem:[%s8250_s1 + $0x4] ss:$0 sm:$0xff] }
 0x876   :  { %v6028_v26 = vpop.eup %6027  ;;  %v3907_v8 = vmul.f32 1.050701, %v3891_v58  ;;  %v3878_v18 = vmul.f32 1.6732632, %v4713_v10  ;;  %v4712_v34 = vadd.f32 -1.0, %v6026_v48  ;;  %6037 = vpow2.f32 %v3849_v23 }
 0x877   :  { %v4715_v56 = vadd.f32 -1.0, %v6028_v26 }
 0x878   :  { %v3877_v5 = vmul.f32 1.6732632, %v4712_v34  ;;  %5606 = vmatprep.mubr.msk.f32.mxu0 %vm236_vm0, %v3907_v8  ;;  %v3894_v42 = vsel %vm3798_vm2, %v7970_v62, %v3878_v18 }
 0x879   :  { %v6030_v12 = vpop.eup %6029  ;;  %v3880_v25 = vmul.f32 1.6732632, %v4715_v56  ;;  %5607 = vmatmul.mubr.msk.f32.gmra.mxu0 %vm236_vm0, %v3908_v55  ;;  %v3910_v46 = vmul.f32 1.050701, %v3894_v42 }
 0x87a   :  { %v3893_v40 = vsel %vm3797_vm3, %v7976_v0, %v3877_v5  ;;  %v4714_v54 = vadd.f32 -1.0, %v6030_v12 }
 0x87b   :  { %v3909_v43 = vmul.f32 1.050701, %v3893_v40  ;;  %v3896_v15 = vsel %vm3800_vm4, %v7980_v37, %v3880_v25 }
 0x87c   :  { %v6032_v6 = vpop.eup %6031  ;;  %v3879_v30 = vmul.f32 1.6732632, %v4714_v54  ;;  %v3912_v52 = vmul.f32 1.050701, %v3896_v15 }
 0x87d   :  { %v4717_v62 = vadd.f32 -1.0, %v6032_v6  ;;  %5609 = vmatprep.mubr.msk.f32.mxu0 %vm236_vm0, %v3909_v43 }
 0x87e   :  { %v3895_v41 = vsel %vm3799_vm5, %v7990_v20, %v3879_v30  ;;  %5610 = vmatmul.mubr.msk.f32.gmra.mxu0 %vm236_vm0, %v3910_v46 }
 0x87f   :  { %v3911_v0 = vmul.f32 1.050701, %v3895_v41  ;;  %v6034_v36 = vpop.eup %6033  ;;  %v3882_v19 = vmul.f32 1.6732632, %v4717_v62 }
 0x880   :  { %v4716_v39 = vadd.f32 -1.0, %v6034_v36  ;;  %v6036_v50 = vpop.eup %6035 }
 0x881   :  { %5612 = vmatprep.mubr.msk.f32.mxu0 %vm236_vm0, %v3911_v0  ;;  %v4719_v51 = vadd.f32 -1.0, %v6036_v50  ;;  %v3898_v60 = vsel %vm3802_vm6, %v7998_v31, %v3882_v19 }
 0x882   :  { %5613 = vmatmul.mubr.msk.f32.gmra.mxu0 %vm236_vm0, %v3912_v52  ;;  %v3881_v37 = vmul.f32 1.6732632, %v4716_v39  ;;  %v3914_v9 = vmul.f32 1.050701, %v3898_v60 }
 0x883   :  { %v6038_v20 = vpop.eup %6037  ;;  %v3884_v14 = vmul.f32 1.6732632, %v4719_v51 }
 0x884   :  { %v3897_v63 = vsel %vm3801_vm7, %v8006_v2, %v3881_v37  ;;  %v4718_v28 = vadd.f32 -1.0, %v6038_v20  ;;  %v6099_v2 = vmov 0.0   ;;  %v8154_v37 = vld [vmem:[%s8252_s3] sm:$0x1] }
 0x885   :  { %v3913_v13 = vmul.f32 1.050701, %v3897_v63  ;;  %v3900_v11 = vsel %vm3804_vm8, %v8011_v35, %v3884_v14  ;;  %5621 = vmatprep.subr.mxu1 %v6099_v2  ;;  %5656 = vmatprep.subr.mxu0 %v6099_v2 }
 0x886   :  { %v3883_v44 = vmul.f32 1.6732632, %v4718_v28  ;;  %v3916_v61 = vmul.f32 1.050701, %v3900_v11  ;;  %5653 = vmatprep.mubr.msk.f32.mxu1 %vm6100_vm10, %v6099_v2 }
 0x887   :  { %5615 = vmatprep.mubr.msk.f32.mxu0 %vm236_vm0, %v3913_v13 }
 0x888   :  { %5616 = vmatmul.mubr.msk.f32.gmra.mxu0 %vm236_vm0, %v3914_v9  ;;  %v3899_v31 = vsel %vm3803_vm9, %v8022_v3, %v3883_v44  ;;  %v4209_v44 = vlaneseq }
 0x889   :  { %v3915_v29 = vmul.f32 1.050701, %v3899_v31 }
 0x88a   :  { %v4210_v11 = vshrl.u32 %v4209_v44, 7 }
 0x88b   :  { %5618 = vmatprep.mubr.msk.f32.mxu0 %vm236_vm0, %v3915_v29 }
 0x88c   :  { %5619 = vmatmul.mubr.msk.f32.gmra.mxu0 %vm236_vm0, %v3916_v61  ;;  %v4211_v31 = vsub.s32 0, %v4210_v11 }
 0x88d   :  { %5688 = vmatprep.mubr.msk.f32.mxu0 %vm6100_vm10, %v6099_v2 }
 0x92d   :  { %v8064_v35 = vpop.f32.mrf.mxu0 }
 0x92e   :  { %v8135_v0 = vadd.f32 %v8064_v35, %v4720_v24 }
 0x92f   :  { %v8066_v1 = vpop.f32.mrf.mxu0 }
 0x930   :  { %v8141_v36 = vadd.f32 %v4720_v24, %v8066_v1  ;;  %v4115_v39 = vmul.f32 %v8135_v0, %v8135_v0 }
 0x931   :  { %v5602_v7 = vpop.f32.mrf.mxu0 }
 0x932   :  { %v8124_v30 = vadd.f32 %v5602_v7, %v4720_v24  ;;  %v4114_v50 = vmul.f32 %v8141_v36, %v8141_v36 }
 0x933   :  { %v4045_v17 = vpop.f32.mrf.mxu0 }
 0x934   :  { %v8129_v62 = vadd.f32 %v4720_v24, %v4045_v17  ;;  %v4117_v52 = vmul.f32 %v8124_v30, %v8124_v30 }
 0x935   :  { %v5605_v53 = vpop.f32.mrf.mxu0 }
 0x936   :  { %v8114_v54 = vadd.f32 %v5605_v53, %v4720_v24  ;;  %v4116_v19 = vmul.f32 %v8129_v62, %v8129_v62 }
 0x937   :  { %v4055_v22 = vpop.f32.mrf.mxu0 }
 0x938   :  { %v8119_v6 = vadd.f32 %v4720_v24, %v4055_v22  ;;  %v4119_v15 = vmul.f32 %v8114_v54, %v8114_v54 }
 0x939   :  { %v5608_v45 = vpop.f32.mrf.mxu0 }
 0x93a   :  { %v8104_v12 = vadd.f32 %v5608_v45, %v4720_v24  ;;  %v4118_v41 = vmul.f32 %v8119_v6, %v8119_v6 }
 0x93b   :  { %v4065_v32 = vpop.f32.mrf.mxu0 }
 0x93c   :  { %v8109_v25 = vadd.f32 %v4720_v24, %v4065_v32  ;;  %v4121_v43 = vmul.f32 %v8104_v12, %v8104_v12 }
 0x93e   :  { %v5611_v49 = vpop.f32.mrf.mxu0  ;;  %v4120_v46 = vmul.f32 %v8109_v25, %v8109_v25 }
 0x93f   :  { %v8094_v56 = vadd.f32 %v5611_v49, %v4720_v24 }
 0x940   :  { %v4075_v33 = vpop.f32.mrf.mxu0 }
 0x941   :  { %v8099_v55 = vadd.f32 %v4720_v24, %v4075_v33  ;;  %v4123_v42 = vmul.f32 %v8094_v56, %v8094_v56 }
 0x942   :  { %v5614_v27 = vpop.f32.mrf.mxu0 }
 0x943   :  { %v8084_v26 = vadd.f32 %v5614_v27, %v4720_v24  ;;  %v4122_v40 = vmul.f32 %v8099_v55, %v8099_v55 }
 0x944   :  { %v4085_v57 = vpop.f32.mrf.mxu0 }
 0x945   :  { %v8089_v18 = vadd.f32 %v4720_v24, %v4085_v57  ;;  %v4125_v23 = vmul.f32 %v8084_v26, %v8084_v26 }
 0x947   :  { %v4124_v5 = vmul.f32 %v8089_v18, %v8089_v18 }
 0x948   :  { %v5617_v16 = vpop.f32.mrf.mxu0 }
 0x949   :  { %v8073_v38 = vadd.f32 %v5617_v16, %v4720_v24 }
 0x94a   :  { %v4095_v3 = vpop.f32.mrf.mxu0 }
 0x94b   :  { %v8079_v58 = vadd.f32 %v4720_v24, %v4095_v3  ;;  %v4127_v8 = vmul.f32 %v8073_v38, %v8073_v38  ;;  %v4232_v3 = vrot.slane %v8154_v37, %v4211_v31 }
 0x94c   :  { %v5620_v59 = vpop.f32.mrf.mxu0 }
 0x94d   :  { %v8071_v4 = vadd.f32 %v5620_v59, %v4720_v24  ;;  %v4126_v34 = vmul.f32 %v8079_v58, %v8079_v58 }
 0x94e   :  { %v4105_v10 = vpop.f32.mrf.mxu0 }
 0x94f   :  { %v4129_v48 = vmul.f32 %v8071_v4, %v8071_v4  ;;  %v8077_v47 = vadd.f32 %v4720_v24, %v4105_v10  ;;  %v89_v24 = vld [vmem:[%s8252_s3 + $0x8] sm:$0xff]  ;;  %s6101_s3 = smov [#allocation5]  }
 0x950   :  { %v4233_v10 = vmul.f32 %v4232_v3, %v89_v24  ;;  %s4432_s18 = sshll.u32 %s6101_s3, 4  ;;  %s4433_s18 = int_to_ptr.vmem [resolvable:$true] %s4432_s18 }
 0x951   :  { %v4128_v21 = vmul.f32 %v8077_v47, %v8077_v47  ;;  %5622 = vmatpush3.msra.mxu1 %v4129_v48  ;;  %s6071_s19 = scalar_lea.vmem %s4433_s18, 128  ;;  %p6076_p6 = scmp.lt.s32.totalorder %s4433_s18, %s4433_s18 }
 0x952   :  { %5623 = vmatprep.subr.mxu1 %v6099_v2  ;;  %p6072_p5 = scmp.ne.s32.totalorder %s4433_s18, %s6071_s19  ;;  %p6077_p7 = scmp.lt.s32.totalorder %s6071_s19, %s6071_s19 }
 0x953   :  { %5624 = vmatpush3.msra.mxu1 %v4128_v21 }
 0x954   :  { %5625 = vmatprep.subr.mxu1 %v6099_v2  ;;  %p6078_p8 = por %p6077_p7, %p6076_p6 }
 0x955   :  { %5626 = vmatpush3.msra.mxu1 %v4127_v8 }
 0x956   :  { %5627 = vmatprep.subr.mxu1 %v6099_v2  ;;  %p6079_p9 = pnand %p6078_p8, %p6072_p5 }
 0x957   :  { %5628 = vmatpush3.msra.mxu1 %v4126_v34 }
 0x958   :  { %5629 = vmatprep.subr.mxu1 %v6099_v2 }
 0x959   :  { %5630 = vmatpush3.msra.mxu1 %v4125_v23 }
 0x95a   :  { %5631 = vmatprep.subr.mxu1 %v6099_v2 }
 0x95b   :  { %5632 = vmatpush3.msra.mxu1 %v4124_v5 }
 0x95c   :  { %5633 = vmatprep.subr.mxu1 %v6099_v2 }
 0x95d   :  { %5634 = vmatpush3.msra.mxu1 %v4123_v42 }
 0x95e   :  { %5635 = vmatprep.subr.mxu1 %v6099_v2 }
 0x95f   :  { %5636 = vmatpush3.msra.mxu1 %v4122_v40 }
 0x960   :  { %5637 = vmatprep.subr.mxu1 %v6099_v2 }
 0x961   :  { %5638 = vmatpush3.msra.mxu1 %v4121_v43 }
 0x962   :  { %5639 = vmatprep.subr.mxu1 %v6099_v2 }
 0x963   :  { %5640 = vmatpush3.msra.mxu1 %v4120_v46 }
 0x964   :  { %5641 = vmatprep.subr.mxu1 %v6099_v2 }
 0x965   :  { %5642 = vmatpush3.msra.mxu1 %v4119_v15 }
 0x966   :  { %5643 = vmatprep.subr.mxu1 %v6099_v2 }
 0x967   :  { %5644 = vmatpush3.msra.mxu1 %v4118_v41 }
 0x968   :  { %5645 = vmatprep.subr.mxu1 %v6099_v2 }
 0x969   :  { %5646 = vmatpush3.msra.mxu1 %v4117_v52 }
 0x96a   :  { %5647 = vmatprep.subr.mxu1 %v6099_v2 }
 0x96b   :  { %5648 = vmatpush3.msra.mxu1 %v4116_v19 }
 0x96c   :  { %5649 = vmatprep.subr.mxu1 %v6099_v2 }
 0x96d   :  { %5650 = vmatpush3.msra.mxu1 %v4115_v39 }
 0x96e   :  { %5651 = vmatprep.subr.mxu1 %v6099_v2 }
 0x96f   :  { %5652 = vmatpush3.msra.mxu1 %v4114_v50 }
 0x970   :  { %5654 = vmatmul.mubr.f32.vlgmr.msra.gmra.mxu1 %v8154_v37  ;;  %5691 = vmatprep.subr.mxu1 %v6099_v2 }
 0x971   :  { %5723 = vmatprep.mubr.msk.f32.mxu1 %vm6100_vm10, %v6099_v2 }
 0xa30   :  { %v4196_v51 = vpop.f32.mrf.mxu1 }
 0xa31   :  { %6039 = vrsqrt.f32 %v4196_v51  ;;  %vm4202_vm11 = vcmp.eq.f32.partialorder %v4196_v51, inf  ;;  %v4205_v14 = vand.u32 2147483648, %v4196_v51  ;;  %vm4204_vm12 = vcmp.eq.f32.partialorder %v4196_v51, 0.0 }
 0xa32   :  { %v5655_v60 = vpop.f32.mrf.mxu1 }
 0xa3e   :  { %v6040_v20 = vpop.eup %6039 }
 0xa3f   :  { %v4201_v63 = vmul.f32 %v6040_v20, %v4196_v51 }
 0xa41   :  { %v4203_v13 = vsel %vm4202_vm11, %v4196_v51, %v4201_v63 }
 0xa42   :  { %v4206_v28 = vsel %vm4204_vm12, %v4205_v14, %v4203_v13 }
 0xa43   :  { %v4207_v9 = vadd.f32 1e-06, %v4206_v28 }
 0xa45   :  { %6041 = vrcp.f32 %v4207_v9 }
 0xa52   :  { %v6042_v29 = vpop.eup %6041 }
 0xa53   :  { %v8161_v61 = vrot.slane %v6042_v29, %v4211_v31 }
 0xa55   :  { %v4228_v35 = vmul.f32 %v8161_v61, %v8071_v4  ;;  %v4227_v1 = vmul.f32 %v8161_v61, %v8077_v47  ;;  %v4226_v7 = vmul.f32 %v8161_v61, %v8073_v38  ;;  %v4225_v17 = vmul.f32 %v8161_v61, %v8079_v58 }
 0xa56   :  { %v4224_v53 = vmul.f32 %v8161_v61, %v8084_v26  ;;  %v4223_v22 = vmul.f32 %v8161_v61, %v8089_v18  ;;  %v4222_v45 = vmul.f32 %v8161_v61, %v8094_v56  ;;  %v4221_v32 = vmul.f32 %v8161_v61, %v8099_v55 }
 0xa57   :  { %5657 = vmatpush3.msra.mxu0 %v4228_v35  ;;  %5692 = vmatpush3.xpose.msk.msra.mxu1 %vm236_vm0, %v4228_v35  ;;  %v4220_v49 = vmul.f32 %v8161_v61, %v8104_v12  ;;  %v4219_v33 = vmul.f32 %v8161_v61, %v8109_v25  ;;  %v4218_v27 = vmul.f32 %v8161_v61, %v8114_v54 }
 0xa58   :  { %5658 = vmatprep.subr.mxu0 %v6099_v2  ;;  %5693 = vmatprep.subr.mxu1 %v6099_v2  ;;  %v4217_v57 = vmul.f32 %v8161_v61, %v8119_v6  ;;  %v4216_v16 = vmul.f32 %v8161_v61, %v8124_v30  ;;  %v4215_v59 = vmul.f32 %v8161_v61, %v8129_v62 }
 0xa59   :  { %5659 = vmatpush3.msra.mxu0 %v4227_v1  ;;  %v4214_v4 = vmul.f32 %v8161_v61, %v8135_v0  ;;  %v4213_v38 = vmul.f32 %v8161_v61, %v8141_v36 }
 0xa5a   :  { %5660 = vmatprep.subr.mxu0 %v6099_v2 }
 0xa5b   :  { %5661 = vmatpush3.msra.mxu0 %v4226_v7  ;;  %5694 = vmatpush3.xpose.msk.msra.mxu1 %vm236_vm0, %v4227_v1 }
 0xa5c   :  { %5662 = vmatprep.subr.mxu0 %v6099_v2  ;;  %5695 = vmatprep.subr.mxu1 %v6099_v2 }
 0xa5d   :  { %5663 = vmatpush3.msra.mxu0 %v4225_v17 }
 0xa5e   :  { %5664 = vmatprep.subr.mxu0 %v6099_v2 }
 0xa5f   :  { %5665 = vmatpush3.msra.mxu0 %v4224_v53  ;;  %5696 = vmatpush3.xpose.msk.msra.mxu1 %vm236_vm0, %v4226_v7 }
 0xa60   :  { %5666 = vmatprep.subr.mxu0 %v6099_v2  ;;  %5697 = vmatprep.subr.mxu1 %v6099_v2 }
 0xa61   :  { %5667 = vmatpush3.msra.mxu0 %v4223_v22 }
 0xa62   :  { %5668 = vmatprep.subr.mxu0 %v6099_v2 }
 0xa63   :  { %5669 = vmatpush3.msra.mxu0 %v4222_v45  ;;  %5698 = vmatpush3.xpose.msk.msra.mxu1 %vm236_vm0, %v4225_v17 }
 0xa64   :  { %5670 = vmatprep.subr.mxu0 %v6099_v2  ;;  %5699 = vmatprep.subr.mxu1 %v6099_v2 }
 0xa65   :  { %5671 = vmatpush3.msra.mxu0 %v4221_v32 }
 0xa66   :  { %5672 = vmatprep.subr.mxu0 %v6099_v2 }
 0xa67   :  { %5673 = vmatpush3.msra.mxu0 %v4220_v49  ;;  %5700 = vmatpush3.xpose.msk.msra.mxu1 %vm236_vm0, %v4224_v53 }
 0xa68   :  { %5674 = vmatprep.subr.mxu0 %v6099_v2  ;;  %5701 = vmatprep.subr.mxu1 %v6099_v2 }
 0xa69   :  { %5675 = vmatpush3.msra.mxu0 %v4219_v33 }
 0xa6a   :  { %5676 = vmatprep.subr.mxu0 %v6099_v2 }
 0xa6b   :  { %5677 = vmatpush3.msra.mxu0 %v4218_v27  ;;  %5702 = vmatpush3.xpose.msk.msra.mxu1 %vm236_vm0, %v4223_v22 }
 0xa6c   :  { %5678 = vmatprep.subr.mxu0 %v6099_v2  ;;  %5703 = vmatprep.subr.mxu1 %v6099_v2 }
 0xa6d   :  { %5679 = vmatpush3.msra.mxu0 %v4217_v57 }
 0xa6e   :  { %5680 = vmatprep.subr.mxu0 %v6099_v2 }
 0xa6f   :  { %5681 = vmatpush3.msra.mxu0 %v4216_v16  ;;  %5704 = vmatpush3.xpose.msk.msra.mxu1 %vm236_vm0, %v4222_v45 }
 0xa70   :  { %5682 = vmatprep.subr.mxu0 %v6099_v2  ;;  %5705 = vmatprep.subr.mxu1 %v6099_v2 }
 0xa71   :  { %5683 = vmatpush3.msra.mxu0 %v4215_v59 }
 0xa72   :  { %5684 = vmatprep.subr.mxu0 %v6099_v2 }
 0xa73   :  { %5685 = vmatpush3.msra.mxu0 %v4214_v4  ;;  %5706 = vmatpush3.xpose.msk.msra.mxu1 %vm236_vm0, %v4221_v32 }
 0xa74   :  { %5686 = vmatprep.subr.mxu0 %v6099_v2  ;;  %5707 = vmatprep.subr.mxu1 %v6099_v2 }
 0xa75   :  { %5687 = vmatpush3.msra.mxu0 %v4213_v38 }
 0xa76   :  { %5689 = vmatmul.mubr.f32.vlgmr.msra.gmra.mxu0 %v4233_v10 }
 0xa77   :  { %5708 = vmatpush3.xpose.msk.msra.mxu1 %vm236_vm0, %v4220_v49 }
 0xa78   :  { %5709 = vmatprep.subr.mxu1 %v6099_v2 }
 0xa7b   :  { %5710 = vmatpush3.xpose.msk.msra.mxu1 %vm236_vm0, %v4219_v33 }
 0xa7c   :  { %5711 = vmatprep.subr.mxu1 %v6099_v2 }
 0xa7f   :  { %5712 = vmatpush3.xpose.msk.msra.mxu1 %vm236_vm0, %v4218_v27 }
 0xa80   :  { %5713 = vmatprep.subr.mxu1 %v6099_v2 }
 0xa83   :  { %5714 = vmatpush3.xpose.msk.msra.mxu1 %vm236_vm0, %v4217_v57 }
 0xa84   :  { %5715 = vmatprep.subr.mxu1 %v6099_v2 }
 0xa87   :  { %5716 = vmatpush3.xpose.msk.msra.mxu1 %vm236_vm0, %v4216_v16 }
 0xa88   :  { %5717 = vmatprep.subr.mxu1 %v6099_v2 }
 0xa8b   :  { %5718 = vmatpush3.xpose.msk.msra.mxu1 %vm236_vm0, %v4215_v59 }
 0xa8c   :  { %5719 = vmatprep.subr.mxu1 %v6099_v2 }
 0xa8f   :  { %5720 = vmatpush3.xpose.msk.msra.mxu1 %vm236_vm0, %v4214_v4 }
 0xa90   :  { %5721 = vmatprep.subr.mxu1 %v6099_v2 }
 0xa93   :  { %5722 = vmatpush3.xpose.msk.msra.mxu1 %vm236_vm0, %v4213_v38 }
 0xb36   :  { %v4300_v48 = vpop.f32.mrf.mxu0 }
 0xb37   :  { %5724 = vmatmul.mubr.msk.f32.vlgmr.msra.gmra.mxu1 %vm236_vm0, %v4300_v48 }
 0xb38   :  { %v5690_v47 = vpop.f32.mrf.mxu0 }
 0xbf7   :  { %v4421_v58 = vpop.f32.mrf.mxu1 }
 0xbf8   :  { %4425 = vst [vmem:[#allocation5] sm:$0xff] %v4421_v58 }
 0xbf9   :  { %v5725_v21 = vpop.f32.mrf.mxu1 }
 0xbfa   :  { %6082 = shalt.err (!%p6079_p9)
}
 0xbfb   :  { %4435 = dma.vmem_to_hbm [thread:$0]  %s4433_s18, 128, %s8253_s4, [#allocation4]  }
 0xbfc   :  { %6093 = dma.done.wait [#allocation4], 128  }
 0xbfd   :  { %6094 = vsyncadd [#allocation4], 4294967168 }
 0xbfe   :  { %4439 = vsyncpa [#allocation3], 1 }
 0xbff   :  { %4440 = vsyncpa [#allocation4], 1 }

</bundles_post_ra>
